<compile_context>
chip_gen: v6e
topology: v6e:2x2x1
jax: 0.10.0
libtpu: 0.0.40
codegen_flags: <defaults>
</compile_context>

<pallas_src>
import jax
import jax.numpy as jnp
from jax.experimental import pallas as pl
from jax.experimental.pallas import tpu as pltpu

LEAKY_SLOPE = 0.2  # nn.LeakyReLU(0.2)


# ----------------------------------------------------------------------------- Pallas kernel

def _discriminator_kernel(x_ref, w1_ref, b1_ref, w2_ref, b2_ref, w3_ref, b3_ref, o_ref):
    """Fused MLP: sigmoid(LReLU(LReLU(x@W1+b1)@W2+b2) . w3 + b3) for one batch tile.

    x/W1/W2 are bf16 (native MXU dtype); all accumulation / activations are f32.
    """
    # Linear(D -> 512): bf16 MXU matmul, f32 accumulate, bias + LeakyReLU in f32.
    h = jnp.dot(x_ref[...], w1_ref[...], preferred_element_type=jnp.float32) + b1_ref[...]
    h = jnp.where(h >= 0.0, h, LEAKY_SLOPE * h)

    # Linear(512 -> 256): re-cast activations to bf16 for the MXU, accumulate in f32.
    h = jnp.dot(h.astype(jnp.bfloat16), w2_ref[...],
                preferred_element_type=jnp.float32) + b2_ref[...]
    h = jnp.where(h >= 0.0, h, LEAKY_SLOPE * h)

    # Linear(256 -> 1): matrix-vector product as VPU multiply + XLU lane reduce
    # (avoids a 1-column MXU matmul and its masked-lane result path).
    logits = jnp.sum(h * w3_ref[...], axis=-1, keepdims=True) + b3_ref[...]

    # Sigmoid: exp and approximate reciprocal both run on the (otherwise idle) EUP slot.
    o_ref[...] = pl.reciprocal(1.0 + jnp.exp(-logits), approx=True).astype(o_ref.dtype)


# ----------------------------------------------------------------------------- param prep (one-time)

def prepare_params(params):
    """One-time preprocessing, hoisted out of the forward path.

    Transposes weights to (in, out) layout, casts MXU operands to bf16, keeps biases and the
    final row-vector in f32. Call this ONCE (e.g. after init / after each optimizer step), not
    inside the per-step forward.
    """
    return dict(
        w1=jnp.transpose(params["w1"]).astype(jnp.bfloat16),           # (D, 512)
        b1=params["b1"].reshape(1, -1).astype(jnp.float32),            # (1, 512)
        w2=jnp.transpose(params["w2"]).astype(jnp.bfloat16),           # (512, 256)
        b2=params["b2"].reshape(1, -1).astype(jnp.float32),            # (1, 256)
        w3=params["w3"].reshape(1, -1).astype(jnp.float32),            # (1, 256) row for lane-reduce
        b3=params["b3"].reshape(1, 1).astype(jnp.float32),             # (1, 1)
    )


# ----------------------------------------------------------------------------- wrapper

def _pick_batch_tile(B, max_tile=512):
    """Full batch for small/medium B (single grid point, no per-step overhead); otherwise the
    largest multiple-of-8 divisor <= max_tile so the parallel grid has balanced points (v7x)."""
    if B <= max_tile:
        return B
    for tb in range(max_tile, 7, -8):
        if B % tb == 0:
            return tb
    return B  # no aligned divisor: fall back to one full-batch block (full-array block is exempt)


def low_res_discriminator(img, prepared, *, max_batch_tile=512):
    """img: (B, img_shape). prepared: output of prepare_params(). Returns (B, 1) f32 in [0,1]."""
    B, D = img.shape
    H1 = prepared["w1"].shape[1]   # 512
    H2 = prepared["w2"].shape[1]   # 256

    tb = _pick_batch_tile(B, max_batch_tile)
    grid = (B // tb,)

    x = img.astype(jnp.bfloat16)   # input cast (per-call, unavoidable); halves input DMA bytes

    return pl.pallas_call(
        _discriminator_kernel,
        out_shape=jax.ShapeDtypeStruct((B, 1), jnp.float32),
        grid=grid,
        in_specs=[
            pl.BlockSpec((tb, D), lambda i: (i, 0)),      # batch tile of the input (bf16)
            pl.BlockSpec((D, H1), lambda i: (0, 0)),      # W1 (resident, constant index_map, bf16)
            pl.BlockSpec((1, H1), lambda i: (0, 0)),      # b1 (f32)
            pl.BlockSpec((H1, H2), lambda i: (0, 0)),     # W2 (bf16)
            pl.BlockSpec((1, H2), lambda i: (0, 0)),      # b2 (f32)
            pl.BlockSpec((1, H2), lambda i: (0, 0)),      # w3 row (f32)
            pl.BlockSpec((1, 1), lambda i: (0, 0)),       # b3 (f32)
        ],
        out_specs=pl.BlockSpec((tb, 1), lambda i: (i, 0)),
        compiler_params=pltpu.CompilerParams(
            dimension_semantics=("parallel",),
        ),
    )(x, prepared["w1"], prepared["b1"], prepared["w2"], prepared["b2"],
      prepared["w3"], prepared["b3"])


# ----------------------------------------------------------------------------- parameters

def _linear_init(key, out_f, in_f):
    """PyTorch nn.Linear default init: U(-1/sqrt(fan_in), 1/sqrt(fan_in)) for weight and bias."""
    kw, kb = jax.random.split(key)
    bound = 1.0 / (in_f ** 0.5)
    w = jax.random.uniform(kw, (out_f, in_f), jnp.float32, -bound, bound)
    b = jax.random.uniform(kb, (out_f,), jnp.float32, -bound, bound)
    return w, b


def init_params(key, img_shape):
    k1, k2, k3 = jax.random.split(key, 3)
    w1, b1 = _linear_init(k1, 512, img_shape)
    w2, b2 = _linear_init(k2, 256, 512)
    w3, b3 = _linear_init(k3, 1, 256)
    return dict(w1=w1, b1=b1, w2=w2, b2=b2, w3=w3, b3=b3)


# ----------------------------------------------------------------------------- reference

def _reference(img, p):
    h = img @ p["w1"].T + p["b1"]
    h = jnp.where(h >= 0.0, h, LEAKY_SLOPE * h)
    h = h @ p["w2"].T + p["b2"]
    h = jnp.where(h >= 0.0, h, LEAKY_SLOPE * h)
    z = h @ p["w3"].T + p["b3"]
    return 1.0 / (1.0 + jnp.exp(-z))


# ----------------------------------------------------------------------------- main

if __name__ == "__main__":
    key = jax.random.PRNGKey(0)
    pkey, xkey = jax.random.split(key)

    IMG_SHAPE = 16 * 16          # flattened 16x16 low-res image
    BATCH = 256                  # single full-batch tile -> one grid step, MXU-friendly M dim

    raw_params = init_params(pkey, IMG_SHAPE)
    prepared = prepare_params(raw_params)        # hoisted one-time weight preprocessing
    img = jax.random.normal(xkey, (BATCH, IMG_SHAPE), jnp.float32)

    fwd = jax.jit(low_res_discriminator)
    out = jax.block_until_ready(fwd(img, prepared))

    assert out.shape == (BATCH, 1), out.shape
    assert out.dtype == jnp.float32
    assert bool(jnp.all(jnp.isfinite(out)))
    assert bool(jnp.all((out >= 0.0) & (out <= 1.0)))        # sigmoid range

    ref = _reference(img, raw_params)                        # f32 reference, original layout
    assert bool(jnp.allclose(out, ref, atol=1e-2, rtol=1e-2)), "mismatch vs JAX reference"

    print("KERNEL_OK")
</pallas_src>

<mosaic_0001>
module attributes {stable_mosaic.version = 11 : i64} {
  func.func @_discriminator_kernel(%arg0: i32, %arg1: memref<256x256xbf16, #tpu.memory_space<vmem>>, %arg2: memref<256x512xbf16, #tpu.memory_space<vmem>>, %arg3: memref<1x512xf32, #tpu.memory_space<vmem>>, %arg4: memref<512x256xbf16, #tpu.memory_space<vmem>>, %arg5: memref<1x256xf32, #tpu.memory_space<vmem>>, %arg6: memref<1x256xf32, #tpu.memory_space<vmem>>, %arg7: memref<1x1xf32, #tpu.memory_space<vmem>>, %arg8: memref<256x1xf32, #tpu.memory_space<vmem>>) attributes {dimension_semantics = [#tpu.dimension_semantics<parallel>], iteration_bounds = array<i64: 1>, scalar_prefetch = 0 : i64, scratch_operands = 0 : i64, tpu.core_type = #tpu.core_type<tc>, window_params = [{transform_indices = @transform_0, window_bounds = array<i64: 256, 256>}, {pipeline_mode = #tpu.pipeline_mode<synchronous>, transform_indices = @transform_1, window_bounds = array<i64: 256, 512>}, {pipeline_mode = #tpu.pipeline_mode<synchronous>, transform_indices = @transform_2, window_bounds = array<i64: 1, 512>}, {pipeline_mode = #tpu.pipeline_mode<synchronous>, transform_indices = @transform_3, window_bounds = array<i64: 512, 256>}, {pipeline_mode = #tpu.pipeline_mode<synchronous>, transform_indices = @transform_4, window_bounds = array<i64: 1, 256>}, {pipeline_mode = #tpu.pipeline_mode<synchronous>, transform_indices = @transform_5, window_bounds = array<i64: 1, 256>}, {pipeline_mode = #tpu.pipeline_mode<synchronous>, transform_indices = @transform_6, window_bounds = array<i64: 1, 1>}, {transform_indices = @transform_7, window_bounds = array<i64: 256, 1>}]} {
    %c0 = arith.constant 0 : index
    %c0_0 = arith.constant 0 : index
    %0 = vector.load %arg1[%c0, %c0_0] : memref<256x256xbf16, #tpu.memory_space<vmem>>, vector<256x256xbf16>
    %c0_1 = arith.constant 0 : index
    %c0_2 = arith.constant 0 : index
    %1 = vector.load %arg2[%c0_1, %c0_2] : memref<256x512xbf16, #tpu.memory_space<vmem>>, vector<256x512xbf16>
    %cst = arith.constant dense<0.000000e+00> : vector<256x512xf32>
    %2 = tpu.matmul %0, %1, %cst {dimension_numbers = #tpu.dot_dimension_numbers<[1], [0], [0], [1], [0, 0, 1, 1], [], []>} : vector<256x256xbf16>, vector<256x512xbf16>, vector<256x512xf32> -> vector<256x512xf32>
    %c0_3 = arith.constant 0 : index
    %c0_4 = arith.constant 0 : index
    %3 = vector.load %arg3[%c0_3, %c0_4] : memref<1x512xf32, #tpu.memory_space<vmem>>, vector<1x512xf32>
    %4 = vector.broadcast %3 : vector<1x512xf32> to vector<256x512xf32>
    %5 = arith.addf %2, %4 : vector<256x512xf32>
    %cst_5 = arith.constant 0.000000e+00 : f32
    %6 = vector.broadcast %cst_5 : f32 to vector<256x512xf32>
    %7 = arith.cmpf oge, %5, %6 : vector<256x512xf32>
    %cst_6 = arith.constant 2.000000e-01 : f32
    %8 = vector.broadcast %cst_6 : f32 to vector<256x512xf32>
    %9 = arith.mulf %8, %5 : vector<256x512xf32>
    %10 = arith.select %7, %5, %9 : vector<256x512xi1>, vector<256x512xf32>
    %11 = arith.truncf %10 : vector<256x512xf32> to vector<256x512xbf16>
    %c0_7 = arith.constant 0 : index
    %c0_8 = arith.constant 0 : index
    %12 = vector.load %arg4[%c0_7, %c0_8] : memref<512x256xbf16, #tpu.memory_space<vmem>>, vector<512x256xbf16>
    %cst_9 = arith.constant dense<0.000000e+00> : vector<256x256xf32>
    %13 = tpu.matmul %11, %12, %cst_9 {dimension_numbers = #tpu.dot_dimension_numbers<[1], [0], [0], [1], [0, 0, 1, 1], [], []>} : vector<256x512xbf16>, vector<512x256xbf16>, vector<256x256xf32> -> vector<256x256xf32>
    %c0_10 = arith.constant 0 : index
    %c0_11 = arith.constant 0 : index
    %14 = vector.load %arg5[%c0_10, %c0_11] : memref<1x256xf32, #tpu.memory_space<vmem>>, vector<1x256xf32>
    %15 = vector.broadcast %14 : vector<1x256xf32> to vector<256x256xf32>
    %16 = arith.addf %13, %15 : vector<256x256xf32>
    %cst_12 = arith.constant 0.000000e+00 : f32
    %17 = vector.broadcast %cst_12 : f32 to vector<256x256xf32>
    %18 = arith.cmpf oge, %16, %17 : vector<256x256xf32>
    %cst_13 = arith.constant 2.000000e-01 : f32
    %19 = vector.broadcast %cst_13 : f32 to vector<256x256xf32>
    %20 = arith.mulf %19, %16 : vector<256x256xf32>
    %21 = arith.select %18, %16, %20 : vector<256x256xi1>, vector<256x256xf32>
    %c0_14 = arith.constant 0 : index
    %c0_15 = arith.constant 0 : index
    %22 = vector.load %arg6[%c0_14, %c0_15] : memref<1x256xf32, #tpu.memory_space<vmem>>, vector<1x256xf32>
    %23 = vector.broadcast %22 : vector<1x256xf32> to vector<256x256xf32>
    %24 = arith.mulf %21, %23 : vector<256x256xf32>
    %cst_16 = arith.constant dense<0.000000e+00> : vector<256xf32>
    %25 = vector.multi_reduction <add>, %24, %cst_16 [1] : vector<256x256xf32> to vector<256xf32>
    %26 = vector.shape_cast %25 : vector<256xf32> to vector<256x1xf32>
    %c0_17 = arith.constant 0 : index
    %c0_18 = arith.constant 0 : index
    %27 = vector.load %arg7[%c0_17, %c0_18] : memref<1x1xf32, #tpu.memory_space<vmem>>, vector<1x1xf32>
    %28 = vector.broadcast %27 : vector<1x1xf32> to vector<256x1xf32>
    %29 = arith.addf %26, %28 : vector<256x1xf32>
    %cst_19 = arith.constant 0.000000e+00 : f32
    %30 = vector.broadcast %cst_19 : f32 to vector<256x1xf32>
    %31 = arith.subf %30, %29 : vector<256x1xf32>
    %32 = math.exp %31 : vector<256x1xf32>
    %cst_20 = arith.constant 1.000000e+00 : f32
    %33 = vector.broadcast %cst_20 : f32 to vector<256x1xf32>
    %34 = arith.addf %33, %32 : vector<256x1xf32>
    %35 = tpu.reciprocal %34 {approx = true} : vector<256x1xf32> -> vector<256x1xf32>
    %c0_21 = arith.constant 0 : index
    %c0_22 = arith.constant 0 : index
    %36 = vector.load %arg8[%c0_21, %c0_22] : memref<256x1xf32, #tpu.memory_space<vmem>>, vector<256x1xf32>
    tpu.vector_store %arg8[%c0_21, %c0_22], %35 {strides = array<i32>} : memref<256x1xf32, #tpu.memory_space<vmem>>, vector<256x1xf32>,
    return
  }
  func.func @transform_0(%arg0: i32) -> (i32, i32) {
    %c0_i32 = arith.constant 0 : i32
    %c0_i32_0 = arith.constant 0 : i32
    return %arg0, %c0_i32 : i32, i32
  }
  func.func @transform_1(%arg0: i32) -> (i32, i32) {
    %c0_i32 = arith.constant 0 : i32
    %c0_i32_0 = arith.constant 0 : i32
    %c0_i32_1 = arith.constant 0 : i32
    return %c0_i32, %c0_i32_0 : i32, i32
  }
  func.func @transform_2(%arg0: i32) -> (i32, i32) {
    %c0_i32 = arith.constant 0 : i32
    %c0_i32_0 = arith.constant 0 : i32
    %c0_i32_1 = arith.constant 0 : i32
    return %c0_i32, %c0_i32_0 : i32, i32
  }
  func.func @transform_3(%arg0: i32) -> (i32, i32) {
    %c0_i32 = arith.constant 0 : i32
    %c0_i32_0 = arith.constant 0 : i32
    %c0_i32_1 = arith.constant 0 : i32
    return %c0_i32, %c0_i32_0 : i32, i32
  }
  func.func @transform_4(%arg0: i32) -> (i32, i32) {
    %c0_i32 = arith.constant 0 : i32
    %c0_i32_0 = arith.constant 0 : i32
    %c0_i32_1 = arith.constant 0 : i32
    return %c0_i32, %c0_i32_0 : i32, i32
  }
  func.func @transform_5(%arg0: i32) -> (i32, i32) {
    %c0_i32 = arith.constant 0 : i32
    %c0_i32_0 = arith.constant 0 : i32
    %c0_i32_1 = arith.constant 0 : i32
    return %c0_i32, %c0_i32_0 : i32, i32
  }
  func.func @transform_6(%arg0: i32) -> (i32, i32) {
    %c0_i32 = arith.constant 0 : i32
    %c0_i32_0 = arith.constant 0 : i32
    %c0_i32_1 = arith.constant 0 : i32
    return %c0_i32, %c0_i32_0 : i32, i32
  }
  func.func @transform_7(%arg0: i32) -> (i32, i32) {
    %c0_i32 = arith.constant 0 : i32
    %c0_i32_0 = arith.constant 0 : i32
    return %arg0, %c0_i32 : i32, i32
  }
}

</mosaic_0001>

<bundles_post_ra>
// kernel: low_res_discriminator.1
= control target key start
LH: loop header
LB: loop body
LE: loop exit
PB: predicated region body
PF: predicated region fallthrough
CT: control target
= control target key end

     0   :  { %s4633_s0 = inlined_call_operand.vmem [shape: bf16[256,256], index: 0, kind: input, shape index: {}]   ;;  %s4634_s1 = inlined_call_operand.vmem [shape: bf16[256,512], index: 1, kind: input, shape index: {}]   ;;  %s4635_s2 = inlined_call_operand.vmem [shape: f32[1,512], index: 2, kind: input, shape index: {}]   ;;  %s4636_s3 = inlined_call_operand.hbm [shape: bf16[512,256], index: 3, kind: input, shape index: {}]   ;;  %s4637_s4 = inlined_call_operand.vmem [shape: f32[1,256], index: 4, kind: input, shape index: {}]   ;;  %s4638_s5 = inlined_call_operand.vmem [shape: f32[1,256], index: 5, kind: input, shape index: {}]   ;;  %s4639_s6 = inlined_call_operand.<no memory space> [shape: f32[1,1], index: 6, kind: input, shape index: {}]   ;;  %s4640_s7 = inlined_call_operand.vmem [shape: f32[256,1], index: 7, kind: output, shape index: {}]  }
   0x1   :  { %v12_v0 = vstv %s4639_s6 }
   0x2   :  { %13 = vst [vmem:[#allocation2] sm:$0x1] %v12_v0 }
   0x3   :  { %14 = vsyncpa [#allocation4], 0  ;;  %s3411_s26 = smov [#allocation3]  }
   0x4   :  { %s26_s27 = sshll.u32 %s3411_s26, 4  ;;  %s27_s27 = int_to_ptr.vmem [resolvable:$true] %s26_s27 }
   0x5   :  { %s3397_s28 = scalar_lea.vmem %s27_s27, 8192  ;;  %p3402_p1 = scmp.lt.s32.totalorder %s27_s27, %s27_s27 }
   0x6   :  { %p3398_p0 = scmp.ne.s32.totalorder %s27_s27, %s3397_s28  ;;  %p3403_p2 = scmp.lt.s32.totalorder %s3397_s28, %s3397_s28 }
   0x8   :  { %p3404_p3 = por %p3403_p2, %p3402_p1 }
   0xa   :  { %p3405_p4 = pnand %p3404_p3, %p3398_p0 }
   0xc   :  { %3408 = shalt.err (!%p3405_p4)
}
   0xd   :  { %s3412_s29 = smov 128   ;;  %s3413_s30 = smov 8  }
   0xe   :  { %32 = dma.hbm_to_vmem [thread:$0]  %s4636_s3, 8192, %s27_s27, [#allocation4], %s3412_s29, %s3412_s29, %s3413_s30  }
   0xf   :  { %3409 = dma.done.wait [#allocation4], 8192  }
  0x10   :  { %3410 = vsyncadd [#allocation4], 4294959104  ;;  %v3021_v1 = vld [vmem:[%s4634_s1 + $0xe4] ss:$16 sps:$4 sm:$0xff]   ;;  %v3023_v2 = vld [vmem:[%s4634_s1 + $0xec] ss:$16 sps:$4 sm:$0xff]  }
  0x11   :  { %640 = vmatprep.subr.bf16.mxu0 %v3021_v1  ;;  %v3025_v3 = vld [vmem:[%s4634_s1 + $0xe0] ss:$16 sps:$4 sm:$0xff]   ;;  %v3026_v4 = vld [vmem:[%s4634_s1 + $0xe8] ss:$16 sps:$4 sm:$0xff]   ;;  %833 = vmatprep.subr.bf16.mxu1 %v3023_v2  ;;  %v3027_v5 = vld [vmem:[%s4634_s1 + $0xc4] ss:$16 sps:$4 sm:$0xff]  }
  0x12   :  { %641 = vmatpush1.bf16.msra.mxu0 %v3025_v3  ;;  %834 = vmatpush1.bf16.msra.mxu1 %v3026_v4  ;;  %v3029_v6 = vld [vmem:[%s4634_s1 + $0xcc] ss:$16 sps:$4 sm:$0xff]   ;;  %v3031_v7 = vld [vmem:[%s4634_s1 + $0xc0] ss:$16 sps:$4 sm:$0xff]   ;;  %v3032_v8 = vld [vmem:[%s4634_s1 + $0xc8] ss:$16 sps:$4 sm:$0xff]  }
  0x13   :  { %642 = vmatprep.subr.bf16.mxu0 %v3027_v5  ;;  %835 = vmatprep.subr.bf16.mxu1 %v3029_v6  ;;  %v3033_v9 = vld [vmem:[%s4634_s1 + $0xa4] ss:$16 sps:$4 sm:$0xff]   ;;  %v3035_v10 = vld [vmem:[%s4634_s1 + $0xac] ss:$16 sps:$4 sm:$0xff]   ;;  %v3037_v11 = vld [vmem:[%s4634_s1 + $0xa0] ss:$16 sps:$4 sm:$0xff]  }
  0x14   :  { %v3038_v12 = vld [vmem:[%s4634_s1 + $0xa8] ss:$16 sps:$4 sm:$0xff]   ;;  %v3039_v13 = vld [vmem:[%s4634_s1 + $0x84] ss:$16 sps:$4 sm:$0xff]   ;;  %v3041_v14 = vld [vmem:[%s4634_s1 + $0x8c] ss:$16 sps:$4 sm:$0xff]  }
  0x15   :  { %v3043_v15 = vld [vmem:[%s4634_s1 + $0x80] ss:$16 sps:$4 sm:$0xff]   ;;  %v3044_v16 = vld [vmem:[%s4634_s1 + $0x88] ss:$16 sps:$4 sm:$0xff]   ;;  %v3045_v17 = vld [vmem:[%s4634_s1 + $0x64] ss:$16 sps:$4 sm:$0xff]  }
  0x16   :  { %643 = vmatpush1.bf16.msra.mxu0 %v3031_v7  ;;  %836 = vmatpush1.bf16.msra.mxu1 %v3032_v8  ;;  %v3047_v18 = vld [vmem:[%s4634_s1 + $0x6c] ss:$16 sps:$4 sm:$0xff]   ;;  %v3049_v19 = vld [vmem:[%s4634_s1 + $0x60] ss:$16 sps:$4 sm:$0xff]   ;;  %v3050_v20 = vld [vmem:[%s4634_s1 + $0x68] ss:$16 sps:$4 sm:$0xff]  }
  0x17   :  { %644 = vmatprep.subr.bf16.mxu0 %v3033_v9  ;;  %837 = vmatprep.subr.bf16.mxu1 %v3035_v10  ;;  %v3051_v21 = vld [vmem:[%s4634_s1 + $0x44] ss:$16 sps:$4 sm:$0xff]   ;;  %v3053_v22 = vld [vmem:[%s4634_s1 + $0x4c] ss:$16 sps:$4 sm:$0xff]   ;;  %v3055_v23 = vld [vmem:[%s4634_s1 + $0x40] ss:$16 sps:$4 sm:$0xff]  }
  0x18   :  { %v3056_v24 = vld [vmem:[%s4634_s1 + $0x48] ss:$16 sps:$4 sm:$0xff]   ;;  %v3057_v25 = vld [vmem:[%s4634_s1 + $0x24] ss:$16 sps:$4 sm:$0xff]   ;;  %v3059_v26 = vld [vmem:[%s4634_s1 + $0x2c] ss:$16 sps:$4 sm:$0xff]  }
  0x19   :  { %v3061_v27 = vld [vmem:[%s4634_s1 + $0x20] ss:$16 sps:$4 sm:$0xff]   ;;  %v3062_v28 = vld [vmem:[%s4634_s1 + $0x28] ss:$16 sps:$4 sm:$0xff]   ;;  %v3063_v29 = vld [vmem:[%s4634_s1 + $0x4] ss:$16 sps:$4 sm:$0xff]  }
  0x1a   :  { %645 = vmatpush1.bf16.msra.mxu0 %v3037_v11  ;;  %838 = vmatpush1.bf16.msra.mxu1 %v3038_v12  ;;  %v3065_v30 = vld [vmem:[%s4634_s1 + $0xc] ss:$16 sps:$4 sm:$0xff]   ;;  %v3067_v31 = vld [vmem:[%s4634_s1] ss:$16 sps:$4 sm:$0xff]   ;;  %v3068_v32 = vld [vmem:[%s4634_s1 + $0x8] ss:$16 sps:$4 sm:$0xff]  }
  0x1b   :  { %646 = vmatprep.subr.bf16.mxu0 %v3039_v13  ;;  %839 = vmatprep.subr.bf16.mxu1 %v3041_v14  ;;  %v3069_v33 = vld [vmem:[%s4634_s1 + $0x1e4] ss:$16 sps:$4 sm:$0xff]   ;;  %v3071_v34 = vld [vmem:[%s4634_s1 + $0x1ec] ss:$16 sps:$4 sm:$0xff]   ;;  %v3073_v35 = vld [vmem:[%s4634_s1 + $0x1e0] ss:$16 sps:$4 sm:$0xff]  }
  0x1c   :  { %v3074_v36 = vld [vmem:[%s4634_s1 + $0x1e8] ss:$16 sps:$4 sm:$0xff]   ;;  %v3075_v37 = vld [vmem:[%s4634_s1 + $0x1c4] ss:$16 sps:$4 sm:$0xff]   ;;  %v3077_v38 = vld [vmem:[%s4634_s1 + $0x1cc] ss:$16 sps:$4 sm:$0xff]  }
  0x1d   :  { %v3079_v39 = vld [vmem:[%s4634_s1 + $0x1c0] ss:$16 sps:$4 sm:$0xff]   ;;  %v3080_v40 = vld [vmem:[%s4634_s1 + $0x1c8] ss:$16 sps:$4 sm:$0xff]   ;;  %v3081_v41 = vld [vmem:[%s4634_s1 + $0x1a4] ss:$16 sps:$4 sm:$0xff]  }
  0x1e   :  { %647 = vmatpush1.bf16.msra.mxu0 %v3043_v15  ;;  %840 = vmatpush1.bf16.msra.mxu1 %v3044_v16  ;;  %v3083_v42 = vld [vmem:[%s4634_s1 + $0x1ac] ss:$16 sps:$4 sm:$0xff]   ;;  %v3085_v43 = vld [vmem:[%s4634_s1 + $0x1a0] ss:$16 sps:$4 sm:$0xff]   ;;  %v3086_v44 = vld [vmem:[%s4634_s1 + $0x1a8] ss:$16 sps:$4 sm:$0xff]  }
  0x1f   :  { %648 = vmatprep.subr.bf16.mxu0 %v3045_v17  ;;  %841 = vmatprep.subr.bf16.mxu1 %v3047_v18  ;;  %v3087_v45 = vld [vmem:[%s4634_s1 + $0x184] ss:$16 sps:$4 sm:$0xff]   ;;  %v3089_v46 = vld [vmem:[%s4634_s1 + $0x18c] ss:$16 sps:$4 sm:$0xff]   ;;  %v3091_v47 = vld [vmem:[%s4634_s1 + $0x180] ss:$16 sps:$4 sm:$0xff]  }
  0x20   :  { %v3092_v48 = vld [vmem:[%s4634_s1 + $0x188] ss:$16 sps:$4 sm:$0xff]   ;;  %v3119_v49 = vld [vmem:[%s4633_s0 + $0x4] ss:$8 sps:$4 sm:$0xff]   ;;  %v3097_v52 = vld [vmem:[%s4634_s1 + $0x160] ss:$16 sps:$4 sm:$0xff]  }
  0x21   :  { %v3093_v50 = vld [vmem:[%s4634_s1 + $0x164] ss:$16 sps:$4 sm:$0xff]   ;;  %v3095_v51 = vld [vmem:[%s4634_s1 + $0x16c] ss:$16 sps:$4 sm:$0xff]   ;;  %672 = vmatprep.mubr.bf16.mxu0 %v3119_v49  ;;  %865 = vmatprep.mubr.bf16.mxu1 %v3119_v49  ;;  %v3098_v53 = vld [vmem:[%s4634_s1 + $0x168] ss:$16 sps:$4 sm:$0xff]  }
  0x22   :  { %649 = vmatpush1.bf16.msra.mxu0 %v3049_v19  ;;  %842 = vmatpush1.bf16.msra.mxu1 %v3050_v20  ;;  %v3099_v54 = vld [vmem:[%s4634_s1 + $0x144] ss:$16 sps:$4 sm:$0xff]   ;;  %v3101_v55 = vld [vmem:[%s4634_s1 + $0x14c] ss:$16 sps:$4 sm:$0xff]   ;;  %v3103_v56 = vld [vmem:[%s4634_s1 + $0x140] ss:$16 sps:$4 sm:$0xff]  }
  0x23   :  { %650 = vmatprep.subr.bf16.mxu0 %v3051_v21  ;;  %843 = vmatprep.subr.bf16.mxu1 %v3053_v22  ;;  %v3104_v57 = vld [vmem:[%s4634_s1 + $0x148] ss:$16 sps:$4 sm:$0xff]   ;;  %v3105_v58 = vld [vmem:[%s4634_s1 + $0x124] ss:$16 sps:$4 sm:$0xff]   ;;  %v3107_v59 = vld [vmem:[%s4634_s1 + $0x12c] ss:$16 sps:$4 sm:$0xff]  }
  0x24   :  { %v3109_v60 = vld [vmem:[%s4634_s1 + $0x120] ss:$16 sps:$4 sm:$0xff]   ;;  %v3110_v61 = vld [vmem:[%s4634_s1 + $0x128] ss:$16 sps:$4 sm:$0xff]   ;;  %v3111_v62 = vld [vmem:[%s4634_s1 + $0x104] ss:$16 sps:$4 sm:$0xff]  }
  0x25   :  { %v3113_v63 = vld [vmem:[%s4634_s1 + $0x10c] ss:$16 sps:$4 sm:$0xff]   ;;  %v3115_v0 = vld [vmem:[%s4634_s1 + $0x100] ss:$16 sps:$4 sm:$0xff]   ;;  %v3116_v1 = vld [vmem:[%s4634_s1 + $0x108] ss:$16 sps:$4 sm:$0xff]  }
  0x26   :  { %651 = vmatpush1.bf16.msra.mxu0 %v3055_v23  ;;  %844 = vmatpush1.bf16.msra.mxu1 %v3056_v24  ;;  %v3149_v2 = vld [vmem:[#allocation3 + $0x74] ss:$8 sps:$4 sm:$0xff]   ;;  %v3147_v6 = vld [vmem:[#allocation3 + $0x70] ss:$8 sps:$4 sm:$0xff]   ;;  %v3158_v8 = vld [vmem:[#allocation3 + $0x64] ss:$8 sps:$4 sm:$0xff]  }
  0x27   :  { %652 = vmatprep.subr.bf16.mxu0 %v3057_v25  ;;  %845 = vmatprep.subr.bf16.mxu1 %v3059_v26  ;;  %v3155_v3 = vld [vmem:[#allocation3 + $0x174] ss:$8 sps:$4 sm:$0xff]   ;;  %v3153_v7 = vld [vmem:[#allocation3 + $0x170] ss:$8 sps:$4 sm:$0xff]   ;;  %v3164_v9 = vld [vmem:[#allocation3 + $0x164] ss:$8 sps:$4 sm:$0xff]  }
  0x28   :  { %v3117_v4 = vld [vmem:[%s4633_s0] ss:$8 sps:$4 sm:$0xff]   ;;  %v3120_v5 = vld [vmem:[%s4633_s0 + $0x14] ss:$8 sps:$4 sm:$0xff]   ;;  %v3122_v14 = vld [vmem:[%s4633_s0 + $0x10] ss:$8 sps:$4 sm:$0xff]  }
  0x29   :  { %v3156_v10 = vld [vmem:[#allocation3 + $0x60] ss:$8 sps:$4 sm:$0xff]   ;;  %v3167_v12 = vld [vmem:[#allocation3 + $0x54] ss:$8 sps:$4 sm:$0xff]   ;;  %v3165_v16 = vld [vmem:[#allocation3 + $0x50] ss:$8 sps:$4 sm:$0xff]  }
  0x2a   :  { %653 = vmatpush1.bf16.msra.mxu0 %v3061_v27  ;;  %846 = vmatpush1.bf16.msra.mxu1 %v3062_v28  ;;  %v3162_v11 = vld [vmem:[#allocation3 + $0x160] ss:$8 sps:$4 sm:$0xff]   ;;  %v3173_v13 = vld [vmem:[#allocation3 + $0x154] ss:$8 sps:$4 sm:$0xff]   ;;  %v3171_v17 = vld [vmem:[#allocation3 + $0x150] ss:$8 sps:$4 sm:$0xff]  }
  0x2b   :  { %654 = vmatprep.subr.bf16.mxu0 %v3063_v29  ;;  %847 = vmatprep.subr.bf16.mxu1 %v3065_v30  ;;  %v3123_v15 = vld [vmem:[%s4633_s0 + $0x24] ss:$8 sps:$4 sm:$0xff]   ;;  %v3185_v22 = vld [vmem:[#allocation3 + $0x34] ss:$8 sps:$4 sm:$0xff]   ;;  %v3183_v26 = vld [vmem:[#allocation3 + $0x30] ss:$8 sps:$4 sm:$0xff]  }
  0x2c   :  { %v3176_v18 = vld [vmem:[#allocation3 + $0x44] ss:$8 sps:$4 sm:$0xff]   ;;  %v3174_v20 = vld [vmem:[#allocation3 + $0x40] ss:$8 sps:$4 sm:$0xff]   ;;  %v3191_v23 = vld [vmem:[#allocation3 + $0x134] ss:$8 sps:$4 sm:$0xff]  }
  0x2d   :  { %v3182_v19 = vld [vmem:[#allocation3 + $0x144] ss:$8 sps:$4 sm:$0xff]   ;;  %v3180_v21 = vld [vmem:[#allocation3 + $0x140] ss:$8 sps:$4 sm:$0xff]   ;;  %v3126_v25 = vld [vmem:[%s4633_s0 + $0x34] ss:$8 sps:$4 sm:$0xff]  }
  0x2e   :  { %655 = vmatpush1.bf16.msra.mxu0 %v3067_v31  ;;  %848 = vmatpush1.bf16.msra.mxu1 %v3068_v32  ;;  %v3125_v24 = vld [vmem:[%s4633_s0 + $0x20] ss:$8 sps:$4 sm:$0xff]   ;;  %v3189_v27 = vld [vmem:[#allocation3 + $0x130] ss:$8 sps:$4 sm:$0xff]  }
  0x2f   :  { %656 = vmatprep.subr.bf16.mxu0 %v3069_v33  ;;  %849 = vmatprep.subr.bf16.mxu1 %v3071_v34  ;;  %v3194_v28 = vld [vmem:[#allocation3 + $0x24] ss:$8 sps:$4 sm:$0xff]   ;;  %v3192_v30 = vld [vmem:[#allocation3 + $0x20] ss:$8 sps:$4 sm:$0xff]   ;;  %v3203_v32 = vld [vmem:[#allocation3 + $0x14] ss:$8 sps:$4 sm:$0xff]  }
  0x30   :  { %v3200_v29 = vld [vmem:[#allocation3 + $0x124] ss:$8 sps:$4 sm:$0xff]   ;;  %v3198_v31 = vld [vmem:[#allocation3 + $0x120] ss:$8 sps:$4 sm:$0xff]   ;;  %v3206_v33 = vld [vmem:[#allocation3 + $0x114] ss:$8 sps:$4 sm:$0xff]  }
  0x31   :  { %v3128_v34 = vld [vmem:[%s4633_s0 + $0x30] ss:$8 sps:$4 sm:$0xff]  }
  0x32   :  { %657 = vmatpush2.bf16.msra.mxu0 %v3073_v35  ;;  %850 = vmatpush2.bf16.msra.mxu1 %v3074_v36  ;;  %v3129_v35 = vld [vmem:[%s4633_s0 + $0x44] ss:$8 sps:$4 sm:$0xff]   ;;  %v3201_v36 = vld [vmem:[#allocation3 + $0x10] ss:$8 sps:$4 sm:$0xff]  }
  0x33   :  { %658 = vmatprep.subr.bf16.mxu0 %v3075_v37  ;;  %851 = vmatprep.subr.bf16.mxu1 %v3077_v38  ;;  %v3204_v37 = vld [vmem:[#allocation3 + $0x110] ss:$8 sps:$4 sm:$0xff]   ;;  %v3209_v38 = vld [vmem:[#allocation3 + $0x4] ss:$8 sps:$4 sm:$0xff]  }
  0x34   :  { %v3224_v49 = vld [vmem:[#allocation3 + $0x1e4] ss:$8 sps:$4 sm:$0xff]  }
  0x36   :  { %659 = vmatpush2.bf16.msra.mxu0 %v3079_v39  ;;  %852 = vmatpush2.bf16.msra.mxu1 %v3080_v40  ;;  %v3212_v39 = vld [vmem:[#allocation3 + $0x104] ss:$8 sps:$4 sm:$0xff]   ;;  %v3207_v40 = vld [vmem:[#allocation3] ss:$8 sps:$4 sm:$0xff]  }
  0x37   :  { %660 = vmatprep.subr.bf16.mxu0 %v3081_v41  ;;  %853 = vmatprep.subr.bf16.mxu1 %v3083_v42  ;;  %v3210_v41 = vld [vmem:[#allocation3 + $0x100] ss:$8 sps:$4 sm:$0xff]   ;;  %v3215_v42 = vld [vmem:[#allocation3 + $0xf4] ss:$8 sps:$4 sm:$0xff]  }
  0x3a   :  { %661 = vmatpush2.bf16.msra.mxu0 %v3085_v43  ;;  %854 = vmatpush2.bf16.msra.mxu1 %v3086_v44  ;;  %v3218_v43 = vld [vmem:[#allocation3 + $0x1f4] ss:$8 sps:$4 sm:$0xff]  }
  0x3b   :  { %662 = vmatprep.subr.bf16.mxu0 %v3087_v45  ;;  %855 = vmatprep.subr.bf16.mxu1 %v3089_v46  ;;  %v3131_v44 = vld [vmem:[%s4633_s0 + $0x40] ss:$8 sps:$4 sm:$0xff]   ;;  %v3132_v45 = vld [vmem:[%s4633_s0 + $0x54] ss:$8 sps:$4 sm:$0xff]  }
  0x3c   :  { %v3213_v46 = vld [vmem:[#allocation3 + $0xf0] ss:$8 sps:$4 sm:$0xff]  }
  0x3e   :  { %663 = vmatpush2.bf16.msra.mxu0 %v3091_v47  ;;  %856 = vmatpush2.bf16.msra.mxu1 %v3092_v48  ;;  %v3216_v47 = vld [vmem:[#allocation3 + $0x1f0] ss:$8 sps:$4 sm:$0xff]   ;;  %v3221_v48 = vld [vmem:[#allocation3 + $0xe4] ss:$8 sps:$4 sm:$0xff]  }
  0x3f   :  { %664 = vmatprep.subr.bf16.mxu0 %v3093_v50  ;;  %857 = vmatprep.subr.bf16.mxu1 %v3095_v51  ;;  %v3219_v50 = vld [vmem:[#allocation3 + $0xe0] ss:$8 sps:$4 sm:$0xff]   ;;  %v3134_v51 = vld [vmem:[%s4633_s0 + $0x50] ss:$8 sps:$4 sm:$0xff]  }
  0x42   :  { %665 = vmatpush2.bf16.msra.mxu0 %v3097_v52  ;;  %858 = vmatpush2.bf16.msra.mxu1 %v3098_v53  ;;  %v3222_v52 = vld [vmem:[#allocation3 + $0x1e0] ss:$8 sps:$4 sm:$0xff]  }
  0x43   :  { %666 = vmatprep.subr.bf16.mxu0 %v3099_v54  ;;  %859 = vmatprep.subr.bf16.mxu1 %v3101_v55  ;;  %v3135_v53 = vld [vmem:[%s4633_s0 + $0x64] ss:$8 sps:$4 sm:$0xff]   ;;  %v3227_v54 = vld [vmem:[#allocation3 + $0xd4] ss:$8 sps:$4 sm:$0xff]  }
  0x44   :  { %v3230_v55 = vld [vmem:[#allocation3 + $0x1d4] ss:$8 sps:$4 sm:$0xff]  }
  0x46   :  { %667 = vmatpush2.bf16.msra.mxu0 %v3103_v56  ;;  %860 = vmatpush2.bf16.msra.mxu1 %v3104_v57  ;;  %v3225_v56 = vld [vmem:[#allocation3 + $0xd0] ss:$8 sps:$4 sm:$0xff]  }
  0x47   :  { %668 = vmatprep.subr.bf16.mxu0 %v3105_v58  ;;  %861 = vmatprep.subr.bf16.mxu1 %v3107_v59  ;;  %v3228_v57 = vld [vmem:[#allocation3 + $0x1d0] ss:$8 sps:$4 sm:$0xff]   ;;  %v3233_v58 = vld [vmem:[#allocation3 + $0xc4] ss:$8 sps:$4 sm:$0xff]  }
  0x48   :  { %v3236_v59 = vld [vmem:[#allocation3 + $0x1c4] ss:$8 sps:$4 sm:$0xff]  }
  0x4a   :  { %669 = vmatpush2.bf16.msra.mxu0 %v3109_v60  ;;  %862 = vmatpush2.bf16.msra.mxu1 %v3110_v61  ;;  %v3231_v60 = vld [vmem:[#allocation3 + $0xc0] ss:$8 sps:$4 sm:$0xff]  }
  0x4b   :  { %670 = vmatprep.subr.bf16.mxu0 %v3111_v62  ;;  %863 = vmatprep.subr.bf16.mxu1 %v3113_v63  ;;  %v3234_v61 = vld [vmem:[#allocation3 + $0x1c0] ss:$8 sps:$4 sm:$0xff]   ;;  %v3239_v62 = vld [vmem:[#allocation3 + $0xb4] ss:$8 sps:$4 sm:$0xff]  }
  0x4c   :  { %v3242_v63 = vld [vmem:[#allocation3 + $0x1b4] ss:$8 sps:$4 sm:$0xff]  }
  0x4e   :  { %671 = vmatpush2.bf16.msra.mxu0 %v3115_v0  ;;  %864 = vmatpush2.bf16.msra.mxu1 %v3116_v1  ;;  %v3137_v0 = vld [vmem:[%s4633_s0 + $0x60] ss:$8 sps:$4 sm:$0xff]   ;;  %v3138_v1 = vld [vmem:[%s4633_s0 + $0x74] ss:$8 sps:$4 sm:$0xff]  }
  0x4f   :  { %1870 = vmatprep.subr.bf16.mxu0 %v3149_v2  ;;  %2063 = vmatprep.subr.bf16.mxu1 %v3155_v3  ;;  %v3237_v2 = vld [vmem:[#allocation3 + $0xb0] ss:$8 sps:$4 sm:$0xff]  }
  0x50   :  { %v3240_v3 = vld [vmem:[#allocation3 + $0x1b0] ss:$8 sps:$4 sm:$0xff]  }
  0x51   :  { %673 = vmatmul.mubr.bf16.vlgmr.msra.gmra.mxu0 %v3117_v4  ;;  %866 = vmatmul.mubr.bf16.vlgmr.msra.gmra.mxu1 %v3117_v4  ;;  %v3245_v4 = vld [vmem:[#allocation3 + $0xa4] ss:$8 sps:$4 sm:$0xff]  }
  0x52   :  { %682 = vmatprep.mubr.bf16.mxu0 %v3120_v5  ;;  %875 = vmatprep.mubr.bf16.mxu1 %v3120_v5  ;;  %v3248_v5 = vld [vmem:[#allocation3 + $0x1a4] ss:$8 sps:$4 sm:$0xff]  }
  0x53   :  { %1871 = vmatpush1.bf16.msra.mxu0 %v3147_v6  ;;  %2064 = vmatpush1.bf16.msra.mxu1 %v3153_v7  ;;  %v3243_v6 = vld [vmem:[#allocation3 + $0xa0] ss:$8 sps:$4 sm:$0xff]  }
  0x54   :  { %1872 = vmatprep.subr.bf16.mxu0 %v3158_v8  ;;  %2065 = vmatprep.subr.bf16.mxu1 %v3164_v9  ;;  %v3246_v7 = vld [vmem:[#allocation3 + $0x1a0] ss:$8 sps:$4 sm:$0xff]   ;;  %v3251_v8 = vld [vmem:[#allocation3 + $0x94] ss:$8 sps:$4 sm:$0xff]  }
  0x55   :  { %v3140_v9 = vld [vmem:[%s4633_s0 + $0x70] ss:$8 sps:$4 sm:$0xff]  }
  0x57   :  { %1873 = vmatpush1.bf16.msra.mxu0 %v3156_v10  ;;  %2066 = vmatpush1.bf16.msra.mxu1 %v3162_v11  ;;  %v3141_v10 = vld [vmem:[%s4633_s0 + $0x84] ss:$8 sps:$4 sm:$0xff]   ;;  %v3249_v11 = vld [vmem:[#allocation3 + $0x90] ss:$8 sps:$4 sm:$0xff]  }
  0x58   :  { %1874 = vmatprep.subr.bf16.mxu0 %v3167_v12  ;;  %2067 = vmatprep.subr.bf16.mxu1 %v3173_v13  ;;  %v3143_v12 = vld [vmem:[%s4633_s0 + $0x80] ss:$8 sps:$4 sm:$0xff]   ;;  %v3144_v13 = vld [vmem:[%s4633_s0 + $0x94] ss:$8 sps:$4 sm:$0xff]  }
  0x59   :  { %683 = vmatmul.mubr.bf16.gmra.mxu0 %v3122_v14  ;;  %876 = vmatmul.mubr.bf16.gmra.mxu1 %v3122_v14  ;;  %v3146_v14 = vld [vmem:[%s4633_s0 + $0x90] ss:$8 sps:$4 sm:$0xff]  }
  0x5a   :  { %692 = vmatprep.mubr.bf16.mxu0 %v3123_v15  ;;  %885 = vmatprep.mubr.bf16.mxu1 %v3123_v15  ;;  %v3150_v15 = vld [vmem:[%s4633_s0 + $0xa4] ss:$8 sps:$4 sm:$0xff]  }
  0x5b   :  { %1875 = vmatpush1.bf16.msra.mxu0 %v3165_v16  ;;  %2068 = vmatpush1.bf16.msra.mxu1 %v3171_v17  ;;  %v3254_v16 = vld [vmem:[#allocation3 + $0x194] ss:$8 sps:$4 sm:$0xff]   ;;  %v3252_v17 = vld [vmem:[#allocation3 + $0x190] ss:$8 sps:$4 sm:$0xff]  }
  0x5c   :  { %1876 = vmatprep.subr.bf16.mxu0 %v3176_v18  ;;  %2069 = vmatprep.subr.bf16.mxu1 %v3182_v19  ;;  %v3255_v18 = vld [vmem:[#allocation3 + $0x80] ss:$8 sps:$4 sm:$0xff]   ;;  %v3257_v19 = vld [vmem:[#allocation3 + $0x84] ss:$8 sps:$4 sm:$0xff]  }
  0x5f   :  { %1877 = vmatpush1.bf16.msra.mxu0 %v3174_v20  ;;  %2070 = vmatpush1.bf16.msra.mxu1 %v3180_v21  ;;  %v3260_v20 = vld [vmem:[#allocation3 + $0x184] ss:$8 sps:$4 sm:$0xff]  }
  0x60   :  { %1878 = vmatprep.subr.bf16.mxu0 %v3185_v22  ;;  %2071 = vmatprep.subr.bf16.mxu1 %v3191_v23  ;;  %v3152_v21 = vld [vmem:[%s4633_s0 + $0xa0] ss:$8 sps:$4 sm:$0xff]   ;;  %v3159_v23 = vld [vmem:[%s4633_s0 + $0xb4] ss:$8 sps:$4 sm:$0xff]  }
  0x61   :  { %693 = vmatmul.mubr.bf16.gmra.mxu0 %v3125_v24  ;;  %886 = vmatmul.mubr.bf16.gmra.mxu1 %v3125_v24  ;;  %v3258_v22 = vld [vmem:[#allocation3 + $0x180] ss:$8 sps:$4 sm:$0xff]   ;;  %v3161_v24 = vld [vmem:[%s4633_s0 + $0xb0] ss:$8 sps:$4 sm:$0xff]  }
  0x62   :  { %702 = vmatprep.mubr.bf16.mxu0 %v3126_v25  ;;  %895 = vmatprep.mubr.bf16.mxu1 %v3126_v25  ;;  %v3168_v25 = vld [vmem:[%s4633_s0 + $0xc4] ss:$8 sps:$4 sm:$0xff]  }
  0x63   :  { %1879 = vmatpush1.bf16.msra.mxu0 %v3183_v26  ;;  %2072 = vmatpush1.bf16.msra.mxu1 %v3189_v27  ;;  %v3170_v26 = vld [vmem:[%s4633_s0 + $0xc0] ss:$8 sps:$4 sm:$0xff]   ;;  %v3177_v27 = vld [vmem:[%s4633_s0 + $0xd4] ss:$8 sps:$4 sm:$0xff]  }
  0x64   :  { %1880 = vmatprep.subr.bf16.mxu0 %v3194_v28  ;;  %2073 = vmatprep.subr.bf16.mxu1 %v3200_v29  ;;  %v3179_v28 = vld [vmem:[%s4633_s0 + $0xd0] ss:$8 sps:$4 sm:$0xff]   ;;  %v3186_v29 = vld [vmem:[%s4633_s0 + $0xe4] ss:$8 sps:$4 sm:$0xff]  }
  0x67   :  { %1881 = vmatpush1.bf16.msra.mxu0 %v3192_v30  ;;  %2074 = vmatpush1.bf16.msra.mxu1 %v3198_v31  ;;  %v3188_v30 = vld [vmem:[%s4633_s0 + $0xe0] ss:$8 sps:$4 sm:$0xff]   ;;  %v3195_v31 = vld [vmem:[%s4633_s0 + $0xf4] ss:$8 sps:$4 sm:$0xff]  }
  0x68   :  { %1882 = vmatprep.subr.bf16.mxu0 %v3203_v32  ;;  %2075 = vmatprep.subr.bf16.mxu1 %v3206_v33  ;;  %v3197_v32 = vld [vmem:[%s4633_s0 + $0xf0] ss:$8 sps:$4 sm:$0xff]   ;;  %v140_v33 = vlaneseq }
  0x69   :  { %703 = vmatmul.mubr.bf16.gmra.mxu0 %v3128_v34  ;;  %896 = vmatmul.mubr.bf16.gmra.mxu1 %v3128_v34 }
  0x6a   :  { %712 = vmatprep.mubr.bf16.mxu0 %v3129_v35  ;;  %905 = vmatprep.mubr.bf16.mxu1 %v3129_v35  ;;  %v141_v34 = vshrl.u32 %v140_v33, 7 }
  0x6b   :  { %1883 = vmatpush1.bf16.msra.mxu0 %v3201_v36  ;;  %2076 = vmatpush1.bf16.msra.mxu1 %v3204_v37  ;;  %v138_v36 = vld [vmem:[%s4635_s2] sm:$0xf] }
  0x6c   :  { %1884 = vmatprep.subr.bf16.mxu0 %v3209_v38  ;;  %2077 = vmatprep.subr.bf16.mxu1 %v3212_v39  ;;  %v3748_v35 = vsub.s32 0, %v141_v34  ;;  %v150_v37 = vsub.s32 2, %v141_v34  ;;  %v3753_v38 = vsub.s32 1, %v141_v34  ;;  %v154_v39 = vsub.s32 3, %v141_v34 }
  0x6f   :  { %1885 = vmatpush1.bf16.msra.mxu0 %v3207_v40  ;;  %2078 = vmatpush1.bf16.msra.mxu1 %v3210_v41  ;;  %v3756_v40 = vrot.slane %v138_v36, %v3748_v35 }
  0x70   :  { %1886 = vmatprep.subr.bf16.mxu0 %v3215_v42  ;;  %2079 = vmatprep.subr.bf16.mxu1 %v3218_v43  ;;  %v3758_v42 = vrot.slane %v138_v36, %v150_v37 }
  0x71   :  { %713 = vmatmul.mubr.bf16.gmra.mxu0 %v3131_v44  ;;  %906 = vmatmul.mubr.bf16.gmra.mxu1 %v3131_v44  ;;  %v3761_v44 = vrot.slane %v138_v36, %v3753_v38 }
  0x72   :  { %722 = vmatprep.mubr.bf16.mxu0 %v3132_v45  ;;  %915 = vmatprep.mubr.bf16.mxu1 %v3132_v45  ;;  %v3763_v45 = vrot.slane %v138_v36, %v154_v39 }
  0x73   :  { %1887 = vmatpush2.bf16.msra.mxu0 %v3213_v46  ;;  %2080 = vmatpush2.bf16.msra.mxu1 %v3216_v47 }
  0x74   :  { %1888 = vmatprep.subr.bf16.mxu0 %v3221_v48  ;;  %2081 = vmatprep.subr.bf16.mxu1 %v3224_v49 }
  0x77   :  { %1889 = vmatpush2.bf16.msra.mxu0 %v3219_v50  ;;  %2082 = vmatpush2.bf16.msra.mxu1 %v3222_v52 }
  0x78   :  { %1890 = vmatprep.subr.bf16.mxu0 %v3227_v54  ;;  %2083 = vmatprep.subr.bf16.mxu1 %v3230_v55 }
  0x79   :  { %723 = vmatmul.mubr.bf16.gmra.mxu0 %v3134_v51  ;;  %916 = vmatmul.mubr.bf16.gmra.mxu1 %v3134_v51 }
  0x7a   :  { %732 = vmatprep.mubr.bf16.mxu0 %v3135_v53  ;;  %925 = vmatprep.mubr.bf16.mxu1 %v3135_v53 }
  0x7b   :  { %1891 = vmatpush2.bf16.msra.mxu0 %v3225_v56  ;;  %2084 = vmatpush2.bf16.msra.mxu1 %v3228_v57 }
  0x7c   :  { %1892 = vmatprep.subr.bf16.mxu0 %v3233_v58  ;;  %2085 = vmatprep.subr.bf16.mxu1 %v3236_v59 }
  0x7f   :  { %1893 = vmatpush2.bf16.msra.mxu0 %v3231_v60  ;;  %2086 = vmatpush2.bf16.msra.mxu1 %v3234_v61 }
  0x80   :  { %1894 = vmatprep.subr.bf16.mxu0 %v3239_v62  ;;  %2087 = vmatprep.subr.bf16.mxu1 %v3242_v63 }
  0x81   :  { %733 = vmatmul.mubr.bf16.gmra.mxu0 %v3137_v0  ;;  %926 = vmatmul.mubr.bf16.gmra.mxu1 %v3137_v0 }
  0x82   :  { %742 = vmatprep.mubr.bf16.mxu0 %v3138_v1  ;;  %935 = vmatprep.mubr.bf16.mxu1 %v3138_v1 }
  0x83   :  { %1895 = vmatpush2.bf16.msra.mxu0 %v3237_v2  ;;  %2088 = vmatpush2.bf16.msra.mxu1 %v3240_v3 }
  0x84   :  { %1896 = vmatprep.subr.bf16.mxu0 %v3245_v4  ;;  %2089 = vmatprep.subr.bf16.mxu1 %v3248_v5 }
  0x87   :  { %1897 = vmatpush2.bf16.msra.mxu0 %v3243_v6  ;;  %2090 = vmatpush2.bf16.msra.mxu1 %v3246_v7 }
  0x88   :  { %1898 = vmatprep.subr.bf16.mxu0 %v3251_v8  ;;  %2091 = vmatprep.subr.bf16.mxu1 %v3254_v16 }
  0x89   :  { %743 = vmatmul.mubr.bf16.gmra.mxu0 %v3140_v9  ;;  %936 = vmatmul.mubr.bf16.gmra.mxu1 %v3140_v9 }
  0x8a   :  { %752 = vmatprep.mubr.bf16.mxu0 %v3141_v10  ;;  %945 = vmatprep.mubr.bf16.mxu1 %v3141_v10 }
  0x8b   :  { %1899 = vmatpush2.bf16.msra.mxu0 %v3249_v11  ;;  %2092 = vmatpush2.bf16.msra.mxu1 %v3252_v17 }
  0x8c   :  { %1900 = vmatprep.subr.bf16.mxu0 %v3257_v19  ;;  %2093 = vmatprep.subr.bf16.mxu1 %v3260_v20 }
  0x8f   :  { %1901 = vmatpush2.bf16.msra.mxu0 %v3255_v18  ;;  %2094 = vmatpush2.bf16.msra.mxu1 %v3258_v22 }
  0x91   :  { %753 = vmatmul.mubr.bf16.gmra.mxu0 %v3143_v12  ;;  %946 = vmatmul.mubr.bf16.gmra.mxu1 %v3143_v12 }
  0x92   :  { %762 = vmatprep.mubr.bf16.mxu0 %v3144_v13  ;;  %955 = vmatprep.mubr.bf16.mxu1 %v3144_v13 }
  0x99   :  { %763 = vmatmul.mubr.bf16.gmra.mxu0 %v3146_v14  ;;  %956 = vmatmul.mubr.bf16.gmra.mxu1 %v3146_v14 }
  0x9a   :  { %772 = vmatprep.mubr.bf16.mxu0 %v3150_v15  ;;  %965 = vmatprep.mubr.bf16.mxu1 %v3150_v15 }
  0xa1   :  { %773 = vmatmul.mubr.bf16.gmra.mxu0 %v3152_v21  ;;  %966 = vmatmul.mubr.bf16.gmra.mxu1 %v3152_v21 }
  0xa2   :  { %782 = vmatprep.mubr.bf16.mxu0 %v3159_v23  ;;  %975 = vmatprep.mubr.bf16.mxu1 %v3159_v23 }
  0xa9   :  { %783 = vmatmul.mubr.bf16.gmra.mxu0 %v3161_v24  ;;  %976 = vmatmul.mubr.bf16.gmra.mxu1 %v3161_v24 }
  0xaa   :  { %792 = vmatprep.mubr.bf16.mxu0 %v3168_v25  ;;  %985 = vmatprep.mubr.bf16.mxu1 %v3168_v25 }
  0xb1   :  { %793 = vmatmul.mubr.bf16.gmra.mxu0 %v3170_v26  ;;  %986 = vmatmul.mubr.bf16.gmra.mxu1 %v3170_v26 }
  0xb2   :  { %802 = vmatprep.mubr.bf16.mxu0 %v3177_v27  ;;  %995 = vmatprep.mubr.bf16.mxu1 %v3177_v27 }
  0xb9   :  { %803 = vmatmul.mubr.bf16.gmra.mxu0 %v3179_v28  ;;  %996 = vmatmul.mubr.bf16.gmra.mxu1 %v3179_v28 }
  0xba   :  { %812 = vmatprep.mubr.bf16.mxu0 %v3186_v29  ;;  %1005 = vmatprep.mubr.bf16.mxu1 %v3186_v29 }
  0xc1   :  { %813 = vmatmul.mubr.bf16.gmra.mxu0 %v3188_v30  ;;  %1006 = vmatmul.mubr.bf16.gmra.mxu1 %v3188_v30 }
  0xc2   :  { %822 = vmatprep.mubr.bf16.mxu0 %v3195_v31  ;;  %1015 = vmatprep.mubr.bf16.mxu1 %v3195_v31 }
  0xc9   :  { %823 = vmatmul.mubr.bf16.gmra.mxu0 %v3197_v32  ;;  %1016 = vmatmul.mubr.bf16.gmra.mxu1 %v3197_v32 }
 0x111   :  { %v674_v41 = vpop.f32.mrf.mxu0  ;;  %v867_v43 = vpop.f32.mrf.mxu1 }
 0x112   :  { %v675_v48 = vadd.f32 %v674_v41, %v3756_v40  ;;  %v868_v49 = vadd.f32 %v867_v43, %v3758_v42 }
 0x113   :  { %v676_v46 = vpop.f32.mrf.mxu0  ;;  %v869_v47 = vpop.f32.mrf.mxu1 }
 0x114   :  { %v677_v52 = vadd.f32 %v676_v46, %v3761_v44  ;;  %v870_v53 = vadd.f32 %v869_v47, %v3763_v45  ;;  %vm1026_vm0 = vcmp.ge.f32.partialorder %v675_v48, 0.0  ;;  %v1154_v58 = vmul.f32 0.2, %v675_v48 }
 0x115   :  { %v678_v50 = vpop.f32.mrf.mxu0  ;;  %v871_v51 = vpop.f32.mrf.mxu1  ;;  %v1156_v59 = vmul.f32 0.2, %v868_v49  ;;  %vm1028_vm1 = vcmp.ge.f32.partialorder %v868_v49, 0.0 }
 0x116   :  { %v679_v54 = vadd.f32 %v678_v50, %v3756_v40  ;;  %v872_v55 = vadd.f32 %v871_v51, %v3758_v42  ;;  %v1155_v1 = vmul.f32 0.2, %v677_v52  ;;  %v1157_v2 = vmul.f32 0.2, %v870_v53 }
 0x117   :  { %v680_v56 = vpop.f32.mrf.mxu0  ;;  %v873_v57 = vpop.f32.mrf.mxu1  ;;  %vm1027_vm3 = vcmp.ge.f32.partialorder %v677_v52, 0.0  ;;  %vm1029_vm5 = vcmp.ge.f32.partialorder %v870_v53, 0.0  ;;  %v1282_v8 = vsel %vm1026_vm0, %v675_v48, %v1154_v58  ;;  %v1284_v14 = vsel %vm1028_vm1, %v868_v49, %v1156_v59 }
 0x118   :  { %v1158_v60 = vmul.f32 0.2, %v679_v54  ;;  %v681_v61 = vadd.f32 %v680_v56, %v3761_v44  ;;  %v874_v62 = vadd.f32 %v873_v57, %v3763_v45  ;;  %vm1030_vm2 = vcmp.ge.f32.partialorder %v679_v54, 0.0 }
 0x119   :  { %v684_v63 = vpop.f32.mrf.mxu0  ;;  %v877_v0 = vpop.f32.mrf.mxu1  ;;  %v1160_v3 = vmul.f32 0.2, %v872_v55  ;;  %vm1032_vm6 = vcmp.ge.f32.partialorder %v872_v55, 0.0  ;;  %v1283_v15 = vsel %vm1027_vm3, %v677_v52, %v1155_v1  ;;  %v1285_v23 = vsel %vm1029_vm5, %v870_v53, %v1157_v2 }
 0x11a   :  { %vm1031_vm4 = vcmp.ge.f32.partialorder %v681_v61, 0.0  ;;  %v1159_v4 = vmul.f32 0.2, %v681_v61  ;;  %vm1033_vm7 = vcmp.ge.f32.partialorder %v874_v62, 0.0  ;;  %v1161_v7 = vmul.f32 0.2, %v874_v62 }
 0x11b   :  { %v686_v5 = vpop.f32.mrf.mxu0  ;;  %v879_v6 = vpop.f32.mrf.mxu1  ;;  %v1286_v9 = vsel %vm1030_vm2, %v679_v54, %v1158_v60  ;;  %v1288_v18 = vsel %vm1032_vm6, %v872_v55, %v1160_v3  ;;  %v685_v19 = vadd.f32 %v684_v63, %v3756_v40  ;;  %v3781_v20 = vadd.f32 %v877_v0, %v3758_v42 }
 0x11c   :  { %v687_v10 = vadd.f32 %v686_v5, %v3761_v44  ;;  %v880_v11 = vadd.f32 %v879_v6, %v3763_v45  ;;  %v1287_v16 = vsel %vm1031_vm4, %v681_v61, %v1159_v4  ;;  %v1289_v17 = vsel %vm1033_vm7, %v874_v62, %v1161_v7 }
 0x11d   :  { %v688_v12 = vpop.f32.mrf.mxu0  ;;  %v881_v13 = vpop.f32.mrf.mxu1  ;;  %v1410_v24 = vpack.c.bf16 %v1286_v9, %v1282_v8  ;;  %v1411_v30 = vpack.c.bf16 %v1287_v16, %v1283_v15  ;;  %v1413_v31 = vpack.c.bf16 %v1289_v17, %v1285_v23  ;;  %v1412_v34 = vpack.c.bf16 %v1288_v18, %v1284_v14 }
 0x11e   :  { %v1163_v25 = vmul.f32 0.2, %v687_v10  ;;  %v1165_v26 = vmul.f32 0.2, %v880_v11  ;;  %v689_v27 = vadd.f32 %v688_v12, %v3756_v40  ;;  %vm1035_vm8 = vcmp.ge.f32.partialorder %v687_v10, 0.0 }
 0x11f   :  { %v690_v21 = vpop.f32.mrf.mxu0  ;;  %v883_v22 = vpop.f32.mrf.mxu1  ;;  %vm1037_vm9 = vcmp.ge.f32.partialorder %v880_v11, 0.0  ;;  %v882_v36 = vadd.f32 %v881_v13, %v3758_v42  ;;  %1902 = vmatprep.mubr.bf16.mxu0 %v1411_v30  ;;  %2095 = vmatprep.mubr.bf16.mxu1 %v1413_v31  ;;  %vm1034_vm12 = vcmp.ge.f32.partialorder %v685_v19, 0.0  ;;  %v1162_v46 = vmul.f32 0.2, %v685_v19 }
 0x120   :  { %v691_v28 = vadd.f32 %v690_v21, %v3761_v44  ;;  %v884_v29 = vadd.f32 %v883_v22, %v3763_v45  ;;  %v1166_v47 = vmul.f32 0.2, %v689_v27  ;;  %1903 = vmatmul.mubr.bf16.vlgmr.msra.gmra.mxu0 %v1410_v24  ;;  %2096 = vmatmul.mubr.bf16.vlgmr.msra.gmra.mxu1 %v1412_v34  ;;  %v1291_v50 = vsel %vm1035_vm8, %v687_v10, %v1163_v25 }
 0x121   :  { %v694_v32 = vpop.f32.mrf.mxu0  ;;  %v887_v33 = vpop.f32.mrf.mxu1  ;;  %v1293_v52 = vsel %vm1037_vm9, %v880_v11, %v1165_v26  ;;  %vm1038_vm13 = vcmp.ge.f32.partialorder %v689_v27, 0.0  ;;  %v1168_v54 = vmul.f32 0.2, %v882_v36  ;;  %v1164_v57 = vmul.f32 0.2, %v3781_v20 }
 0x122   :  { %vm1039_vm10 = vcmp.ge.f32.partialorder %v691_v28, 0.0  ;;  %v1167_v37 = vmul.f32 0.2, %v691_v28  ;;  %vm1041_vm11 = vcmp.ge.f32.partialorder %v884_v29, 0.0  ;;  %v1169_v39 = vmul.f32 0.2, %v884_v29 }
 0x123   :  { %v696_v41 = vpop.f32.mrf.mxu0  ;;  %v889_v43 = vpop.f32.mrf.mxu1  ;;  %vm1040_vm14 = vcmp.ge.f32.partialorder %v882_v36, 0.0  ;;  %vm1036_vm15 = vcmp.ge.f32.partialorder %v3781_v20, 0.0  ;;  %v695_v60 = vadd.f32 %v694_v32, %v3756_v40  ;;  %v888_v62 = vadd.f32 %v887_v33, %v3758_v42 }
 0x124   :  { %v1295_v51 = vsel %vm1039_vm10, %v691_v28, %v1167_v37  ;;  %v1297_v53 = vsel %vm1041_vm11, %v884_v29, %v1169_v39  ;;  %v697_v61 = vadd.f32 %v696_v41, %v3761_v44  ;;  %v1290_v0 = vsel %vm1034_vm12, %v685_v19, %v1162_v46 }
 0x125   :  { %v698_v48 = vpop.f32.mrf.mxu0  ;;  %v891_v49 = vpop.f32.mrf.mxu1  ;;  %v1415_v55 = vpack.c.bf16 %v1295_v51, %v1291_v50  ;;  %v1417_v56 = vpack.c.bf16 %v1297_v53, %v1293_v52  ;;  %v1294_v1 = vsel %vm1038_vm13, %v689_v27, %v1166_v47  ;;  %v1296_v7 = vsel %vm1040_vm14, %v882_v36, %v1168_v54 }
 0x126   :  { %v699_v4 = vadd.f32 %v698_v48, %v3756_v40  ;;  %v1414_v6 = vpack.c.bf16 %v1294_v1, %v1290_v0  ;;  %v890_v8 = vadd.f32 %v889_v43, %v3763_v45  ;;  %v1292_v10 = vsel %vm1036_vm15, %v3781_v20, %v1164_v57 }
 0x127   :  { %v700_v58 = vpop.f32.mrf.mxu0  ;;  %v893_v59 = vpop.f32.mrf.mxu1  ;;  %1912 = vmatprep.mubr.bf16.mxu0 %v1415_v55  ;;  %2105 = vmatprep.mubr.bf16.mxu1 %v1417_v56  ;;  %v1171_v13 = vmul.f32 0.2, %v697_v61  ;;  %v892_v14 = vadd.f32 %v891_v49, %v3758_v42  ;;  %v1416_v15 = vpack.c.bf16 %v1296_v7, %v1292_v10  ;;  %vm1042_vm1 = vcmp.ge.f32.partialorder %v695_v60, 0.0 }
 0x128   :  { %v701_v63 = vadd.f32 %v700_v58, %v3761_v44  ;;  %v894_v5 = vadd.f32 %v893_v59, %v3763_v45  ;;  %1913 = vmatmul.mubr.bf16.gmra.mxu0 %v1414_v6  ;;  %v1170_v16 = vmul.f32 0.2, %v695_v60  ;;  %vm1043_vm2 = vcmp.ge.f32.partialorder %v697_v61, 0.0 }
 0x129   :  { %v704_v2 = vpop.f32.mrf.mxu0  ;;  %v897_v3 = vpop.f32.mrf.mxu1  ;;  %vm1044_vm3 = vcmp.ge.f32.partialorder %v888_v62, 0.0  ;;  %v1174_v21 = vmul.f32 0.2, %v699_v4  ;;  %2106 = vmatmul.mubr.bf16.gmra.mxu1 %v1416_v15  ;;  %v1172_v23 = vmul.f32 0.2, %v888_v62  ;;  %vm1046_vm4 = vcmp.ge.f32.partialorder %v699_v4, 0.0 }
 0x12a   :  { %vm1047_vm0 = vcmp.ge.f32.partialorder %v701_v63, 0.0  ;;  %v1175_v9 = vmul.f32 0.2, %v701_v63  ;;  %v3809_v17 = vadd.f32 %v704_v2, %v3756_v40  ;;  %v1177_v22 = vmul.f32 0.2, %v894_v5 }
 0x12b   :  { %v706_v11 = vpop.f32.mrf.mxu0  ;;  %v899_v12 = vpop.f32.mrf.mxu1  ;;  %v1173_v24 = vmul.f32 0.2, %v890_v8  ;;  %vm1049_vm5 = vcmp.ge.f32.partialorder %v894_v5, 0.0  ;;  %vm1045_vm6 = vcmp.ge.f32.partialorder %v890_v8, 0.0  ;;  %vm1048_vm7 = vcmp.ge.f32.partialorder %v892_v14, 0.0 }
 0x12c   :  { %v1303_v20 = vsel %vm1047_vm0, %v701_v63, %v1175_v9  ;;  %v1176_v27 = vmul.f32 0.2, %v892_v14  ;;  %v1299_v28 = vsel %vm1043_vm2, %v697_v61, %v1171_v13  ;;  %vm1050_vm8 = vcmp.ge.f32.partialorder %v3809_v17, 0.0 }
 0x12d   :  { %v708_v18 = vpop.f32.mrf.mxu0  ;;  %v901_v19 = vpop.f32.mrf.mxu1  ;;  %v3815_v29 = vadd.f32 %v897_v3, %v3758_v42  ;;  %v707_v30 = vadd.f32 %v706_v11, %v3761_v44  ;;  %v1419_v31 = vpack.c.bf16 %v1303_v20, %v1299_v28  ;;  %v1305_v37 = vsel %vm1049_vm5, %v894_v5, %v1177_v22 }
 0x12e   :  { %v1302_v39 = vsel %vm1046_vm4, %v699_v4, %v1174_v21  ;;  %v900_v41 = vadd.f32 %v899_v12, %v3763_v45  ;;  %v709_v43 = vadd.f32 %v708_v18, %v3756_v40  ;;  %v1301_v46 = vsel %vm1045_vm6, %v890_v8, %v1173_v24 }
 0x12f   :  { %v710_v25 = vpop.f32.mrf.mxu0  ;;  %v903_v26 = vpop.f32.mrf.mxu1  ;;  %1922 = vmatprep.mubr.bf16.mxu0 %v1419_v31  ;;  %v1298_v47 = vsel %vm1042_vm1, %v695_v60, %v1170_v16  ;;  %v1421_v50 = vpack.c.bf16 %v1305_v37, %v1301_v46  ;;  %v1300_v52 = vsel %vm1044_vm3, %v888_v62, %v1172_v23  ;;  %v1304_v53 = vsel %vm1048_vm7, %v892_v14, %v1176_v27 }
 0x130   :  { %v711_v34 = vadd.f32 %v710_v25, %v3761_v44  ;;  %v904_v36 = vadd.f32 %v903_v26, %v3763_v45  ;;  %v1418_v51 = vpack.c.bf16 %v1302_v39, %v1298_v47  ;;  %v1178_v54 = vmul.f32 0.2, %v3809_v17 }
 0x131   :  { %v714_v32 = vpop.f32.mrf.mxu0  ;;  %v907_v33 = vpop.f32.mrf.mxu1  ;;  %vm1052_vm9 = vcmp.ge.f32.partialorder %v3815_v29, 0.0  ;;  %v902_v55 = vadd.f32 %v901_v19, %v3758_v42  ;;  %v1420_v56 = vpack.c.bf16 %v1304_v53, %v1300_v52  ;;  %v1180_v59 = vmul.f32 0.2, %v3815_v29  ;;  %2115 = vmatprep.mubr.bf16.mxu1 %v1421_v50 }
 0x132   :  { %v1183_v60 = vmul.f32 0.2, %v711_v34  ;;  %v1185_v61 = vmul.f32 0.2, %v904_v36  ;;  %1923 = vmatmul.mubr.bf16.gmra.mxu0 %v1418_v51  ;;  %v1179_v63 = vmul.f32 0.2, %v707_v30  ;;  %v3832_v4 = vadd.f32 %v714_v32, %v3756_v40 }
 0x133   :  { %v716_v48 = vpop.f32.mrf.mxu0  ;;  %v909_v49 = vpop.f32.mrf.mxu1  ;;  %v1181_v0 = vmul.f32 0.2, %v900_v41  ;;  %vm1055_vm10 = vcmp.ge.f32.partialorder %v711_v34, 0.0  ;;  %vm1057_vm11 = vcmp.ge.f32.partialorder %v904_v36, 0.0  ;;  %2116 = vmatmul.mubr.bf16.gmra.mxu1 %v1420_v56  ;;  %vm1051_vm12 = vcmp.ge.f32.partialorder %v707_v30, 0.0 }
 0x134   :  { %vm1053_vm13 = vcmp.ge.f32.partialorder %v900_v41, 0.0  ;;  %vm1054_vm14 = vcmp.ge.f32.partialorder %v709_v43, 0.0  ;;  %v1182_v2 = vmul.f32 0.2, %v709_v43  ;;  %vm1056_vm15 = vcmp.ge.f32.partialorder %v902_v55, 0.0 }
 0x135   :  { %v718_v57 = vpop.f32.mrf.mxu0  ;;  %v911_v58 = vpop.f32.mrf.mxu1  ;;  %v1184_v3 = vmul.f32 0.2, %v902_v55  ;;  %v3835_v5 = vadd.f32 %v907_v33, %v3758_v42  ;;  %v717_v8 = vadd.f32 %v716_v48, %v3761_v44  ;;  %v910_v9 = vadd.f32 %v909_v49, %v3763_v45 }
 0x136   :  { %v1311_v10 = vsel %vm1055_vm10, %v711_v34, %v1183_v60  ;;  %v1313_v11 = vsel %vm1057_vm11, %v904_v36, %v1185_v61  ;;  %v1307_v14 = vsel %vm1051_vm12, %v707_v30, %v1179_v63  ;;  %v1309_v15 = vsel %vm1053_vm13, %v900_v41, %v1181_v0 }
 0x137   :  { %v720_v62 = vpop.f32.mrf.mxu0  ;;  %v913_v1 = vpop.f32.mrf.mxu1  ;;  %v1423_v19 = vpack.c.bf16 %v1311_v10, %v1307_v14  ;;  %v1425_v21 = vpack.c.bf16 %v1313_v11, %v1309_v15  ;;  %v1306_v22 = vsel %vm1050_vm8, %v3809_v17, %v1178_v54  ;;  %v1310_v20 = vsel %vm1054_vm14, %v709_v43, %v1182_v2 }
 0x138   :  { %v721_v12 = vadd.f32 %v720_v62, %v3761_v44  ;;  %v914_v13 = vadd.f32 %v913_v1, %v3763_v45  ;;  %v719_v23 = vadd.f32 %v718_v57, %v3756_v40  ;;  %v1422_v24 = vpack.c.bf16 %v1310_v20, %v1306_v22 }
 0x139   :  { %v724_v6 = vpop.f32.mrf.mxu0  ;;  %v917_v7 = vpop.f32.mrf.mxu1  ;;  %v1308_v25 = vsel %vm1052_vm9, %v3815_v29, %v1180_v59  ;;  %v1312_v26 = vsel %vm1056_vm15, %v902_v55, %v1184_v3  ;;  %vm1058_vm0 = vcmp.ge.f32.partialorder %v3832_v4, 0.0  ;;  %v1186_v30 = vmul.f32 0.2, %v3832_v4  ;;  %1932 = vmatprep.mubr.bf16.mxu0 %v1423_v19  ;;  %2125 = vmatprep.mubr.bf16.mxu1 %v1425_v21 }
 0x13a   :  { %v912_v31 = vadd.f32 %v911_v58, %v3758_v42  ;;  %v1424_v17 = vpack.c.bf16 %v1312_v26, %v1308_v25  ;;  %vm1060_vm1 = vcmp.ge.f32.partialorder %v3835_v5, 0.0  ;;  %v1191_v32 = vmul.f32 0.2, %v721_v12  ;;  %1933 = vmatmul.mubr.bf16.gmra.mxu0 %v1422_v24 }
 0x13b   :  { %v726_v16 = vpop.f32.mrf.mxu0  ;;  %v919_v18 = vpop.f32.mrf.mxu1  ;;  %v1193_v33 = vmul.f32 0.2, %v914_v13  ;;  %v3859_v29 = vadd.f32 %v724_v6, %v3756_v40  ;;  %v1187_v37 = vmul.f32 0.2, %v717_v8  ;;  %v1189_v39 = vmul.f32 0.2, %v910_v9 }
 0x13c   :  { %vm1063_vm2 = vcmp.ge.f32.partialorder %v721_v12, 0.0  ;;  %vm1065_vm3 = vcmp.ge.f32.partialorder %v914_v13, 0.0  ;;  %2126 = vmatmul.mubr.bf16.gmra.mxu1 %v1424_v17  ;;  %v1188_v41 = vmul.f32 0.2, %v3835_v5  ;;  %vm1059_vm4 = vcmp.ge.f32.partialorder %v717_v8, 0.0 }
 0x13d   :  { %v728_v27 = vpop.f32.mrf.mxu0  ;;  %v921_v28 = vpop.f32.mrf.mxu1  ;;  %vm1061_vm5 = vcmp.ge.f32.partialorder %v910_v9, 0.0  ;;  %vm1062_vm6 = vcmp.ge.f32.partialorder %v719_v23, 0.0  ;;  %v1190_v47 = vmul.f32 0.2, %v719_v23  ;;  %vm1064_vm7 = vcmp.ge.f32.partialorder %v912_v31, 0.0 }
 0x13e   :  { %v1192_v48 = vmul.f32 0.2, %v912_v31  ;;  %v3863_v49 = vadd.f32 %v917_v7, %v3758_v42  ;;  %vm1066_vm8 = vcmp.ge.f32.partialorder %v3859_v29, 0.0  ;;  %v727_v50 = vadd.f32 %v726_v16, %v3761_v44 }
 0x13f   :  { %v730_v34 = vpop.f32.mrf.mxu0  ;;  %v923_v36 = vpop.f32.mrf.mxu1  ;;  %v1319_v51 = vsel %vm1063_vm2, %v721_v12, %v1191_v32  ;;  %v1321_v52 = vsel %vm1065_vm3, %v914_v13, %v1193_v33  ;;  %v920_v55 = vadd.f32 %v919_v18, %v3763_v45  ;;  %v1315_v57 = vsel %vm1059_vm4, %v717_v8, %v1187_v37 }
 0x140   :  { %v731_v56 = vadd.f32 %v730_v34, %v3761_v44  ;;  %v1317_v58 = vsel %vm1061_vm5, %v910_v9, %v1189_v39  ;;  %v729_v59 = vadd.f32 %v728_v27, %v3756_v40  ;;  %v924_v60 = vadd.f32 %v923_v36, %v3763_v45 }
 0x141   :  { %v734_v43 = vpop.f32.mrf.mxu0  ;;  %v927_v46 = vpop.f32.mrf.mxu1  ;;  %v1427_v61 = vpack.c.bf16 %v1319_v51, %v1315_v57  ;;  %v1429_v63 = vpack.c.bf16 %v1321_v52, %v1317_v58  ;;  %v1314_v1 = vsel %vm1058_vm0, %v3832_v4, %v1186_v30  ;;  %v1318_v2 = vsel %vm1062_vm6, %v719_v23, %v1190_v47 }
 0x142   :  { %v1316_v3 = vsel %vm1060_vm1, %v3835_v5, %v1188_v41  ;;  %v1320_v6 = vsel %vm1064_vm7, %v912_v31, %v1192_v48  ;;  %v1194_v7 = vmul.f32 0.2, %v3859_v29  ;;  %v922_v8 = vadd.f32 %v921_v28, %v3758_v42 }
 0x143   :  { %v736_v53 = vpop.f32.mrf.mxu0  ;;  %v929_v54 = vpop.f32.mrf.mxu1  ;;  %1942 = vmatprep.mubr.bf16.mxu0 %v1427_v61  ;;  %2135 = vmatprep.mubr.bf16.mxu1 %v1429_v63  ;;  %v1426_v9 = vpack.c.bf16 %v1318_v2, %v1314_v1  ;;  %v1428_v10 = vpack.c.bf16 %v1320_v6, %v1316_v3  ;;  %vm1068_vm9 = vcmp.ge.f32.partialorder %v3863_v49, 0.0  ;;  %v1195_v4 = vmul.f32 0.2, %v727_v50 }
 0x144   :  { %v1199_v13 = vmul.f32 0.2, %v731_v56  ;;  %v3885_v14 = vadd.f32 %v734_v43, %v3756_v40  ;;  %v1196_v5 = vmul.f32 0.2, %v3863_v49  ;;  %vm1067_vm10 = vcmp.ge.f32.partialorder %v727_v50, 0.0 }
 0x145   :  { %v738_v0 = vpop.f32.mrf.mxu0  ;;  %v931_v62 = vpop.f32.mrf.mxu1  ;;  %vm1071_vm11 = vcmp.ge.f32.partialorder %v731_v56, 0.0  ;;  %v1201_v15 = vmul.f32 0.2, %v924_v60  ;;  %1943 = vmatmul.mubr.bf16.gmra.mxu0 %v1426_v9  ;;  %2136 = vmatmul.mubr.bf16.gmra.mxu1 %v1428_v10  ;;  %vm1069_vm12 = vcmp.ge.f32.partialorder %v920_v55, 0.0  ;;  %v1197_v19 = vmul.f32 0.2, %v920_v55 }
 0x146   :  { %vm1070_vm13 = vcmp.ge.f32.partialorder %v729_v59, 0.0  ;;  %vm1073_vm14 = vcmp.ge.f32.partialorder %v924_v60, 0.0  ;;  %v1198_v21 = vmul.f32 0.2, %v729_v59  ;;  %vm1072_vm15 = vcmp.ge.f32.partialorder %v922_v8, 0.0 }
 0x147   :  { %v740_v11 = vpop.f32.mrf.mxu0  ;;  %v933_v12 = vpop.f32.mrf.mxu1  ;;  %v1200_v22 = vmul.f32 0.2, %v922_v8  ;;  %v3889_v20 = vadd.f32 %v927_v46, %v3758_v42  ;;  %vm1074_vm0 = vcmp.ge.f32.partialorder %v3885_v14, 0.0  ;;  %v1202_v25 = vmul.f32 0.2, %v3885_v14 }
 0x148   :  { %v737_v26 = vadd.f32 %v736_v53, %v3761_v44  ;;  %v1323_v27 = vsel %vm1067_vm10, %v727_v50, %v1195_v4  ;;  %v1327_v28 = vsel %vm1071_vm11, %v731_v56, %v1199_v13  ;;  %v930_v30 = vadd.f32 %v929_v54, %v3763_v45 }
 0x149   :  { %v744_v16 = vpop.f32.mrf.mxu0  ;;  %v937_v18 = vpop.f32.mrf.mxu1  ;;  %v741_v31 = vadd.f32 %v740_v11, %v3761_v44  ;;  %v1431_v17 = vpack.c.bf16 %v1327_v28, %v1323_v27  ;;  %v1329_v32 = vsel %vm1073_vm14, %v924_v60, %v1201_v15  ;;  %v739_v36 = vadd.f32 %v738_v0, %v3756_v40 }
 0x14a   :  { %v934_v37 = vadd.f32 %v933_v12, %v3763_v45  ;;  %v1325_v39 = vsel %vm1069_vm12, %v920_v55, %v1197_v19  ;;  %v1322_v41 = vsel %vm1066_vm8, %v3859_v29, %v1194_v7  ;;  %v1326_v46 = vsel %vm1070_vm13, %v729_v59, %v1198_v21 }
 0x14b   :  { %v746_v23 = vpop.f32.mrf.mxu0  ;;  %v939_v24 = vpop.f32.mrf.mxu1  ;;  %1952 = vmatprep.mubr.bf16.mxu0 %v1431_v17  ;;  %v1433_v43 = vpack.c.bf16 %v1329_v32, %v1325_v39  ;;  %v1324_v47 = vsel %vm1068_vm9, %v3863_v49, %v1196_v5  ;;  %v1328_v48 = vsel %vm1072_vm15, %v922_v8, %v1200_v22  ;;  %v1204_v52 = vmul.f32 0.2, %v3889_v20 }
 0x14c   :  { %v932_v53 = vadd.f32 %v931_v62, %v3758_v42  ;;  %v1430_v54 = vpack.c.bf16 %v1326_v46, %v1322_v41  ;;  %v1432_v55 = vpack.c.bf16 %v1328_v48, %v1324_v47  ;;  %vm1076_vm1 = vcmp.ge.f32.partialorder %v3889_v20, 0.0 }
 0x14d   :  { %v748_v33 = vpop.f32.mrf.mxu0  ;;  %v941_v34 = vpop.f32.mrf.mxu1  ;;  %vm1075_vm2 = vcmp.ge.f32.partialorder %v737_v26, 0.0  ;;  %v1203_v29 = vmul.f32 0.2, %v737_v26  ;;  %v1207_v56 = vmul.f32 0.2, %v741_v31  ;;  %2145 = vmatprep.mubr.bf16.mxu1 %v1433_v43  ;;  %vm1077_vm3 = vcmp.ge.f32.partialorder %v930_v30, 0.0 }
 0x14e   :  { %v1205_v49 = vmul.f32 0.2, %v930_v30  ;;  %vm1079_vm4 = vcmp.ge.f32.partialorder %v741_v31, 0.0  ;;  %v1209_v59 = vmul.f32 0.2, %v934_v37  ;;  %1953 = vmatmul.mubr.bf16.gmra.mxu0 %v1430_v54  ;;  %2146 = vmatmul.mubr.bf16.gmra.mxu1 %v1432_v55  ;;  %vm1078_vm5 = vcmp.ge.f32.partialorder %v739_v36, 0.0 }
 0x14f   :  { %v750_v50 = vpop.f32.mrf.mxu0  ;;  %v943_v51 = vpop.f32.mrf.mxu1  ;;  %v1206_v60 = vmul.f32 0.2, %v739_v36  ;;  %vm1081_vm6 = vcmp.ge.f32.partialorder %v934_v37, 0.0  ;;  %v3915_v61 = vadd.f32 %v744_v16, %v3756_v40  ;;  %vm1080_vm7 = vcmp.ge.f32.partialorder %v932_v53, 0.0 }
 0x150   :  { %v1208_v62 = vmul.f32 0.2, %v932_v53  ;;  %v3918_v1 = vadd.f32 %v937_v18, %v3758_v42  ;;  %v747_v2 = vadd.f32 %v746_v23, %v3761_v44  ;;  %v3922_v3 = vadd.f32 %v939_v24, %v3763_v45 }
 0x151   :  { %v754_v57 = vpop.f32.mrf.mxu0  ;;  %v3912_v58 = vpop.f32.mrf.mxu1  ;;  %v3925_v6 = vadd.f32 %v748_v33, %v3756_v40  ;;  %v1331_v7 = vsel %vm1075_vm2, %v737_v26, %v1203_v29  ;;  %v1335_v8 = vsel %vm1079_vm4, %v741_v31, %v1207_v56  ;;  %v3930_v11 = vadd.f32 %v941_v34, %v3758_v42 }
 0x152   :  { %v751_v12 = vadd.f32 %v750_v50, %v3761_v44  ;;  %v1435_v4 = vpack.c.bf16 %v1335_v8, %v1331_v7  ;;  %v1337_v13 = vsel %vm1081_vm6, %v934_v37, %v1209_v59  ;;  %vm1082_vm8 = vcmp.ge.f32.partialorder %v3915_v61, 0.0 }
 0x153   :  { %v756_v63 = vpop.f32.mrf.mxu0  ;;  %v949_v0 = vpop.f32.mrf.mxu1  ;;  %v944_v5 = vadd.f32 %v943_v51, %v3763_v45  ;;  %v1333_v15 = vsel %vm1077_vm3, %v930_v30, %v1205_v49  ;;  %v1330_v16 = vsel %vm1074_vm0, %v3885_v14, %v1202_v25  ;;  %v1334_v22 = vsel %vm1078_vm5, %v739_v36, %v1206_v60 }
 0x154   :  { %1962 = vmatprep.mubr.bf16.mxu0 %v1435_v4  ;;  %v1437_v21 = vpack.c.bf16 %v1337_v13, %v1333_v15  ;;  %v1332_v23 = vsel %vm1076_vm1, %v3889_v20, %v1204_v52  ;;  %v1336_v24 = vsel %vm1080_vm7, %v932_v53, %v1208_v62  ;;  %v1210_v26 = vmul.f32 0.2, %v3915_v61 }
 0x155   :  { %v758_v9 = vpop.f32.mrf.mxu0  ;;  %v951_v10 = vpop.f32.mrf.mxu1  ;;  %v1212_v27 = vmul.f32 0.2, %v3918_v1  ;;  %v1434_v28 = vpack.c.bf16 %v1334_v22, %v1330_v16  ;;  %v1436_v30 = vpack.c.bf16 %v1336_v24, %v1332_v23  ;;  %vm1084_vm9 = vcmp.ge.f32.partialorder %v3918_v1, 0.0 }
 0x156   :  { %vm1083_vm10 = vcmp.ge.f32.partialorder %v747_v2, 0.0  ;;  %v1211_v25 = vmul.f32 0.2, %v747_v2  ;;  %v1215_v17 = vmul.f32 0.2, %v751_v12  ;;  %2155 = vmatprep.mubr.bf16.mxu1 %v1437_v21  ;;  %vm1085_vm11 = vcmp.ge.f32.partialorder %v3922_v3, 0.0 }
 0x157   :  { %v760_v18 = vpop.f32.mrf.mxu0  ;;  %v953_v19 = vpop.f32.mrf.mxu1  ;;  %v1213_v20 = vmul.f32 0.2, %v3922_v3  ;;  %vm1087_vm12 = vcmp.ge.f32.partialorder %v751_v12, 0.0  ;;  %v1217_v32 = vmul.f32 0.2, %v944_v5  ;;  %1963 = vmatmul.mubr.bf16.gmra.mxu0 %v1434_v28  ;;  %2156 = vmatmul.mubr.bf16.gmra.mxu1 %v1436_v30  ;;  %vm1086_vm13 = vcmp.ge.f32.partialorder %v3925_v6, 0.0 }
 0x158   :  { %v1214_v36 = vmul.f32 0.2, %v3925_v6  ;;  %vm1089_vm14 = vcmp.ge.f32.partialorder %v944_v5, 0.0  ;;  %v3957_v37 = vadd.f32 %v754_v57, %v3756_v40  ;;  %vm1088_vm15 = vcmp.ge.f32.partialorder %v3930_v11, 0.0 }
 0x159   :  { %v3947_v31 = vpop.f32.mrf.mxu0  ;;  %v3949_v14 = vpop.f32.mrf.mxu1  ;;  %v1216_v39 = vmul.f32 0.2, %v3930_v11  ;;  %v3963_v41 = vadd.f32 %v3912_v58, %v3758_v42  ;;  %v757_v43 = vadd.f32 %v756_v63, %v3761_v44  ;;  %v950_v48 = vadd.f32 %v949_v0, %v3763_v45 }
 0x15a   :  { %v3968_v50 = vadd.f32 %v758_v9, %v3756_v40  ;;  %v1339_v51 = vsel %vm1083_vm10, %v747_v2, %v1211_v25  ;;  %v1343_v52 = vsel %vm1087_vm12, %v751_v12, %v1215_v17  ;;  %v3973_v53 = vadd.f32 %v951_v10, %v3758_v42 }
 0x15b   :  { %v766_v33 = vpop.f32.mrf.mxu0  ;;  %v959_v34 = vpop.f32.mrf.mxu1  ;;  %v761_v54 = vadd.f32 %v760_v18, %v3761_v44  ;;  %v1439_v55 = vpack.c.bf16 %v1343_v52, %v1339_v51  ;;  %v1345_v29 = vsel %vm1089_vm14, %v944_v5, %v1217_v32  ;;  %vm1090_vm0 = vcmp.ge.f32.partialorder %v3957_v37, 0.0 }
 0x15c   :  { %v954_v58 = vadd.f32 %v953_v19, %v3763_v45  ;;  %v1341_v49 = vsel %vm1085_vm11, %v3922_v3, %v1213_v20  ;;  %v1338_v59 = vsel %vm1082_vm8, %v3915_v61, %v1210_v26  ;;  %v1342_v63 = vsel %vm1086_vm13, %v3925_v6, %v1214_v36 }
 0x15d   :  { %v768_v46 = vpop.f32.mrf.mxu0  ;;  %v961_v47 = vpop.f32.mrf.mxu1  ;;  %1972 = vmatprep.mubr.bf16.mxu0 %v1439_v55  ;;  %v1441_v60 = vpack.c.bf16 %v1345_v29, %v1341_v49  ;;  %v1340_v0 = vsel %vm1084_vm9, %v3918_v1, %v1212_v27  ;;  %v1344_v62 = vsel %vm1088_vm15, %v3930_v11, %v1216_v39  ;;  %v1218_v61 = vmul.f32 0.2, %v3957_v37 }
 0x15e   :  { %v1220_v7 = vmul.f32 0.2, %v3963_v41  ;;  %v1438_v8 = vpack.c.bf16 %v1342_v63, %v1338_v59  ;;  %v1440_v9 = vpack.c.bf16 %v1344_v62, %v1340_v0  ;;  %vm1092_vm1 = vcmp.ge.f32.partialorder %v3963_v41, 0.0 }
 0x15f   :  { %v770_v56 = vpop.f32.mrf.mxu0  ;;  %v963_v57 = vpop.f32.mrf.mxu1  ;;  %vm1091_vm2 = vcmp.ge.f32.partialorder %v757_v43, 0.0  ;;  %v1219_v6 = vmul.f32 0.2, %v757_v43  ;;  %v1223_v10 = vmul.f32 0.2, %v761_v54  ;;  %2165 = vmatprep.mubr.bf16.mxu1 %v1441_v60  ;;  %vm1093_vm3 = vcmp.ge.f32.partialorder %v950_v48, 0.0 }
 0x160   :  { %v1221_v11 = vmul.f32 0.2, %v950_v48  ;;  %vm1095_vm4 = vcmp.ge.f32.partialorder %v761_v54, 0.0  ;;  %v1225_v4 = vmul.f32 0.2, %v954_v58  ;;  %1973 = vmatmul.mubr.bf16.gmra.mxu0 %v1438_v8  ;;  %2166 = vmatmul.mubr.bf16.gmra.mxu1 %v1440_v9  ;;  %vm1094_vm5 = vcmp.ge.f32.partialorder %v3968_v50, 0.0 }
 0x161   :  { %v3993_v2 = vpop.f32.mrf.mxu0  ;;  %v3995_v3 = vpop.f32.mrf.mxu1  ;;  %v1222_v13 = vmul.f32 0.2, %v3968_v50  ;;  %vm1097_vm6 = vcmp.ge.f32.partialorder %v954_v58, 0.0  ;;  %v4008_v5 = vadd.f32 %v3947_v31, %v3756_v40  ;;  %vm1096_vm7 = vcmp.ge.f32.partialorder %v3973_v53, 0.0 }
 0x162   :  { %v1224_v18 = vmul.f32 0.2, %v3973_v53  ;;  %v4014_v19 = vadd.f32 %v3949_v14, %v3758_v42  ;;  %v767_v21 = vadd.f32 %v766_v33, %v3761_v44  ;;  %v4018_v22 = vadd.f32 %v959_v34, %v3763_v45 }
 0x163   :  { %v4000_v1 = vpop.f32.mrf.mxu0  ;;  %v4002_v12 = vpop.f32.mrf.mxu1  ;;  %v4021_v23 = vadd.f32 %v768_v46, %v3756_v40  ;;  %v1347_v24 = vsel %vm1091_vm2, %v757_v43, %v1219_v6  ;;  %v1351_v26 = vsel %vm1095_vm4, %v761_v54, %v1223_v10  ;;  %v4026_v30 = vadd.f32 %v961_v47, %v3758_v42 }
 0x164   :  { %v771_v31 = vadd.f32 %v770_v56, %v3761_v44  ;;  %v1443_v14 = vpack.c.bf16 %v1351_v26, %v1347_v24  ;;  %v1353_v25 = vsel %vm1097_vm6, %v954_v58, %v1225_v4  ;;  %vm1098_vm8 = vcmp.ge.f32.partialorder %v4008_v5, 0.0 }
 0x165   :  { %v778_v15 = vpop.f32.mrf.mxu0  ;;  %v971_v16 = vpop.f32.mrf.mxu1  ;;  %v964_v17 = vadd.f32 %v963_v57, %v3763_v45  ;;  %v1349_v20 = vsel %vm1093_vm3, %v950_v48, %v1221_v11  ;;  %v1346_v32 = vsel %vm1090_vm0, %v3957_v37, %v1218_v61  ;;  %v1350_v39 = vsel %vm1094_vm5, %v3968_v50, %v1222_v13 }
 0x166   :  { %1982 = vmatprep.mubr.bf16.mxu0 %v1443_v14  ;;  %v1445_v36 = vpack.c.bf16 %v1353_v25, %v1349_v20  ;;  %v1348_v43 = vsel %vm1092_vm1, %v3963_v41, %v1220_v7  ;;  %v1352_v46 = vsel %vm1096_vm7, %v3973_v53, %v1224_v18  ;;  %v1226_v37 = vmul.f32 0.2, %v4008_v5 }
 0x167   :  { %v780_v27 = vpop.f32.mrf.mxu0  ;;  %v973_v28 = vpop.f32.mrf.mxu1  ;;  %v1228_v47 = vmul.f32 0.2, %v4014_v19  ;;  %v1442_v48 = vpack.c.bf16 %v1350_v39, %v1346_v32  ;;  %v1444_v51 = vpack.c.bf16 %v1352_v46, %v1348_v43  ;;  %vm1100_vm9 = vcmp.ge.f32.partialorder %v4014_v19, 0.0 }
 0x168   :  { %vm1099_vm10 = vcmp.ge.f32.partialorder %v767_v21, 0.0  ;;  %v1227_v50 = vmul.f32 0.2, %v767_v21  ;;  %v1231_v55 = vmul.f32 0.2, %v771_v31  ;;  %2175 = vmatprep.mubr.bf16.mxu1 %v1445_v36  ;;  %vm1101_vm11 = vcmp.ge.f32.partialorder %v4018_v22, 0.0 }
 0x169   :  { %v4036_v33 = vpop.f32.mrf.mxu0  ;;  %v4038_v34 = vpop.f32.mrf.mxu1  ;;  %v1229_v41 = vmul.f32 0.2, %v4018_v22  ;;  %vm1103_vm12 = vcmp.ge.f32.partialorder %v771_v31, 0.0  ;;  %v1233_v53 = vmul.f32 0.2, %v964_v17  ;;  %1983 = vmatmul.mubr.bf16.gmra.mxu0 %v1442_v48  ;;  %2176 = vmatmul.mubr.bf16.gmra.mxu1 %v1444_v51  ;;  %vm1102_vm13 = vcmp.ge.f32.partialorder %v4021_v23, 0.0 }
 0x16a   :  { %v1230_v57 = vmul.f32 0.2, %v4021_v23  ;;  %vm1105_vm14 = vcmp.ge.f32.partialorder %v964_v17, 0.0  ;;  %v4066_v58 = vadd.f32 %v3993_v2, %v3756_v40  ;;  %vm1104_vm15 = vcmp.ge.f32.partialorder %v4026_v30, 0.0 }
 0x16b   :  { %v4051_v52 = vpop.f32.mrf.mxu0  ;;  %v4053_v54 = vpop.f32.mrf.mxu1  ;;  %v1232_v49 = vmul.f32 0.2, %v4026_v30  ;;  %v4072_v59 = vadd.f32 %v3995_v3, %v3758_v42  ;;  %v777_v60 = vadd.f32 %v4000_v1, %v3761_v44  ;;  %v970_v62 = vadd.f32 %v4002_v12, %v3763_v45 }
 0x16c   :  { %v4081_v2 = vadd.f32 %v778_v15, %v3756_v40  ;;  %v1355_v61 = vsel %vm1099_vm10, %v767_v21, %v1227_v50  ;;  %v1359_v7 = vsel %vm1103_vm12, %v771_v31, %v1231_v55  ;;  %v4086_v8 = vadd.f32 %v971_v16, %v3758_v42 }
 0x16d   :  { %v4058_v29 = vpop.f32.mrf.mxu0  ;;  %v4060_v56 = vpop.f32.mrf.mxu1  ;;  %v781_v3 = vadd.f32 %v780_v27, %v3761_v44  ;;  %v1447_v9 = vpack.c.bf16 %v1359_v7, %v1355_v61  ;;  %v1361_v6 = vsel %vm1105_vm14, %v964_v17, %v1233_v53  ;;  %vm1106_vm0 = vcmp.ge.f32.partialorder %v4066_v58, 0.0 }
 0x16e   :  { %v974_v12 = vadd.f32 %v973_v28, %v3763_v45  ;;  %v1357_v11 = vsel %vm1101_vm11, %v4018_v22, %v1229_v41  ;;  %v1354_v4 = vsel %vm1098_vm8, %v4008_v5, %v1226_v37  ;;  %v1358_v15 = vsel %vm1102_vm13, %v4021_v23, %v1230_v57 }
 0x16f   :  { %v790_v63 = vpop.f32.mrf.mxu0  ;;  %v4076_v0 = vpop.f32.mrf.mxu1  ;;  %1992 = vmatprep.mubr.bf16.mxu0 %v1447_v9  ;;  %v1449_v13 = vpack.c.bf16 %v1361_v6, %v1357_v11  ;;  %v1356_v16 = vsel %vm1100_vm9, %v4014_v19, %v1228_v47  ;;  %v1360_v18 = vsel %vm1104_vm15, %v4026_v30, %v1232_v49  ;;  %v1234_v5 = vmul.f32 0.2, %v4066_v58 }
 0x170   :  { %vm1108_vm1 = vcmp.ge.f32.partialorder %v4072_v59, 0.0  ;;  %v1446_v24 = vpack.c.bf16 %v1358_v15, %v1354_v4  ;;  %v1448_v26 = vpack.c.bf16 %v1360_v18, %v1356_v16  ;;  %v1236_v23 = vmul.f32 0.2, %v4072_v59 }
 0x171   :  { %v4089_v10 = vpop.f32.mrf.mxu0  ;;  %v4091_v1 = vpop.f32.mrf.mxu1  ;;  %v1235_v27 = vmul.f32 0.2, %v777_v60  ;;  %v1239_v28 = vmul.f32 0.2, %v781_v3  ;;  %2185 = vmatprep.mubr.bf16.mxu1 %v1449_v13  ;;  %vm1107_vm2 = vcmp.ge.f32.partialorder %v777_v60, 0.0  ;;  %vm1109_vm3 = vcmp.ge.f32.partialorder %v970_v62, 0.0 }
 0x172   :  { %vm1111_vm4 = vcmp.ge.f32.partialorder %v781_v3, 0.0  ;;  %v1241_v30 = vmul.f32 0.2, %v974_v12  ;;  %1993 = vmatmul.mubr.bf16.gmra.mxu0 %v1446_v24  ;;  %2186 = vmatmul.mubr.bf16.gmra.mxu1 %v1448_v26  ;;  %v1237_v14 = vmul.f32 0.2, %v970_v62  ;;  %vm1110_vm5 = vcmp.ge.f32.partialorder %v4081_v2, 0.0 }
 0x173   :  { %v4110_v21 = vpop.f32.mrf.mxu0  ;;  %v4112_v22 = vpop.f32.mrf.mxu1  ;;  %vm1113_vm6 = vcmp.ge.f32.partialorder %v974_v12, 0.0  ;;  %v4120_v25 = vadd.f32 %v4036_v33, %v3756_v40  ;;  %v1238_v32 = vmul.f32 0.2, %v4081_v2  ;;  %vm1112_vm7 = vcmp.ge.f32.partialorder %v4086_v8, 0.0 }
 0x174   :  { %v1240_v36 = vmul.f32 0.2, %v4086_v8  ;;  %v4131_v39 = vadd.f32 %v4038_v34, %v3758_v42  ;;  %v4135_v43 = vadd.f32 %v4051_v52, %v3761_v44  ;;  %v4139_v33 = vadd.f32 %v4053_v54, %v3763_v45 }
 0x175   :  { %v798_v19 = vpop.f32.mrf.mxu0  ;;  %v991_v31 = vpop.f32.mrf.mxu1  ;;  %v1363_v46 = vsel %vm1107_vm2, %v777_v60, %v1235_v27  ;;  %v1367_v37 = vsel %vm1111_vm4, %v781_v3, %v1239_v28  ;;  %v4149_v34 = vadd.f32 %v4058_v29, %v3756_v40  ;;  %v4153_v51 = vadd.f32 %v4060_v56, %v3758_v42 }
 0x176   :  { %v1451_v52 = vpack.c.bf16 %v1367_v37, %v1363_v46  ;;  %v1369_v54 = vsel %vm1113_vm6, %v974_v12, %v1241_v30  ;;  %vm1114_vm8 = vcmp.ge.f32.partialorder %v4120_v25, 0.0  ;;  %v1242_v50 = vmul.f32 0.2, %v4120_v25 }
 0x177   :  { %v4122_v17 = vpop.f32.mrf.mxu0  ;;  %v4124_v20 = vpop.f32.mrf.mxu1  ;;  %v791_v55 = vadd.f32 %v790_v63, %v3761_v44  ;;  %v1365_v41 = vsel %vm1109_vm3, %v970_v62, %v1237_v14  ;;  %v1362_v53 = vsel %vm1106_vm0, %v4066_v58, %v1234_v5  ;;  %vm1116_vm9 = vcmp.ge.f32.partialorder %v4131_v39, 0.0 }
 0x178   :  { %2002 = vmatprep.mubr.bf16.mxu0 %v1451_v52  ;;  %v1453_v56 = vpack.c.bf16 %v1369_v54, %v1365_v41  ;;  %v1366_v49 = vsel %vm1110_vm5, %v4081_v2, %v1238_v32  ;;  %v1364_v60 = vsel %vm1108_vm1, %v4072_v59, %v1236_v23  ;;  %v1368_v58 = vsel %vm1112_vm7, %v4086_v8, %v1240_v36 }
 0x179   :  { %v4143_v47 = vpop.f32.mrf.mxu0  ;;  %v4145_v48 = vpop.f32.mrf.mxu1  ;;  %v1244_v63 = vmul.f32 0.2, %v4131_v39  ;;  %v984_v62 = vadd.f32 %v4076_v0, %v3763_v45  ;;  %v1450_v61 = vpack.c.bf16 %v1366_v49, %v1362_v53  ;;  %v1452_v7 = vpack.c.bf16 %v1368_v58, %v1364_v60 }
 0x17a   :  { %vm1115_vm10 = vcmp.ge.f32.partialorder %v4135_v43, 0.0  ;;  %v1243_v2 = vmul.f32 0.2, %v4135_v43  ;;  %vm1117_vm11 = vcmp.ge.f32.partialorder %v4139_v33, 0.0  ;;  %2195 = vmatprep.mubr.bf16.mxu1 %v1453_v56  ;;  %v795_v59 = vadd.f32 %v4089_v10, %v3756_v40 }
 0x17b   :  { %v4163_v29 = vpop.f32.mrf.mxu0  ;;  %v4165_v57 = vpop.f32.mrf.mxu1  ;;  %v1245_v8 = vmul.f32 0.2, %v4139_v33  ;;  %v1247_v6 = vmul.f32 0.2, %v791_v55  ;;  %2003 = vmatmul.mubr.bf16.gmra.mxu0 %v1450_v61  ;;  %2196 = vmatmul.mubr.bf16.gmra.mxu1 %v1452_v7  ;;  %v988_v0 = vadd.f32 %v4091_v1, %v3758_v42  ;;  %v4194_v12 = vadd.f32 %v4110_v21, %v3761_v44 }
 0x17c   :  { %vm1118_vm12 = vcmp.ge.f32.partialorder %v4149_v34, 0.0  ;;  %vm1119_vm13 = vcmp.ge.f32.partialorder %v791_v55, 0.0  ;;  %v799_v10 = vadd.f32 %v798_v19, %v3756_v40  ;;  %v992_v13 = vadd.f32 %v991_v31, %v3758_v42 }
 0x17d   :  { %v4180_v3 = vpop.f32.mrf.mxu0  ;;  %v4182_v9 = vpop.f32.mrf.mxu1  ;;  %v1246_v15 = vmul.f32 0.2, %v4149_v34  ;;  %vm1120_vm14 = vcmp.ge.f32.partialorder %v4153_v51, 0.0  ;;  %v1248_v1 = vmul.f32 0.2, %v4153_v51  ;;  %vm1121_vm15 = vcmp.ge.f32.partialorder %v984_v62, 0.0 }
 0x17e   :  { %v1249_v21 = vmul.f32 0.2, %v984_v62  ;;  %vm1122_vm0 = vcmp.ge.f32.partialorder %v795_v59, 0.0  ;;  %v1250_v5 = vmul.f32 0.2, %v795_v59  ;;  %v4212_v24 = vadd.f32 %v4112_v22, %v3763_v45 }
 0x17f   :  { %v4196_v11 = vpop.f32.mrf.mxu0  ;;  %v4198_v4 = vpop.f32.mrf.mxu1  ;;  %vm1124_vm1 = vcmp.ge.f32.partialorder %v988_v0, 0.0  ;;  %v1252_v26 = vmul.f32 0.2, %v988_v0  ;;  %vm1123_vm2 = vcmp.ge.f32.partialorder %v4194_v12, 0.0  ;;  %v1375_v23 = vsel %vm1119_vm13, %v791_v55, %v1247_v6 }
 0x180   :  { %v1251_v27 = vmul.f32 0.2, %v4194_v12  ;;  %v1254_v28 = vmul.f32 0.2, %v799_v10  ;;  %v1256_v19 = vmul.f32 0.2, %v992_v13  ;;  %v1371_v31 = vsel %vm1115_vm10, %v4135_v43, %v1243_v2 }
 0x181   :  { %v4206_v16 = vpop.f32.mrf.mxu0  ;;  %v4208_v18 = vpop.f32.mrf.mxu1  ;;  %vm1126_vm3 = vcmp.ge.f32.partialorder %v799_v10, 0.0  ;;  %vm1128_vm4 = vcmp.ge.f32.partialorder %v992_v13, 0.0  ;;  %v801_v22 = vadd.f32 %v4122_v17, %v3761_v44  ;;  %v1455_v32 = vpack.c.bf16 %v1375_v23, %v1371_v31 }
 0x182   :  { %v1373_v36 = vsel %vm1117_vm11, %v4139_v33, %v1245_v8  ;;  %v1377_v46 = vsel %vm1121_vm15, %v984_v62, %v1249_v21  ;;  %v1370_v43 = vsel %vm1114_vm8, %v4120_v25, %v1242_v50  ;;  %v1374_v37 = vsel %vm1118_vm12, %v4149_v34, %v1246_v15 }
 0x183   :  { %v4220_v30 = vpop.f32.mrf.mxu0  ;;  %v4222_v14 = vpop.f32.mrf.mxu1  ;;  %2012 = vmatprep.mubr.bf16.mxu0 %v1455_v32  ;;  %v1457_v52 = vpack.c.bf16 %v1377_v46, %v1373_v36  ;;  %v1454_v54 = vpack.c.bf16 %v1374_v37, %v1370_v43  ;;  %v1372_v17 = vsel %vm1116_vm9, %v4131_v39, %v1244_v63  ;;  %v1376_v33 = vsel %vm1120_vm14, %v4153_v51, %v1248_v1 }
 0x184   :  { %v1382_v55 = vsel %vm1126_vm3, %v799_v10, %v1254_v28  ;;  %v1384_v41 = vsel %vm1128_vm4, %v992_v13, %v1256_v19  ;;  %v994_v25 = vadd.f32 %v4124_v20, %v3763_v45  ;;  %v1456_v50 = vpack.c.bf16 %v1376_v33, %v1372_v17 }
 0x185   :  { %v818_v53 = vpop.f32.mrf.mxu0  ;;  %v1011_v56 = vpop.f32.mrf.mxu1  ;;  %vm1125_vm5 = vcmp.ge.f32.partialorder %v4212_v24, 0.0  ;;  %v1255_v34 = vmul.f32 0.2, %v801_v22  ;;  %2205 = vmatprep.mubr.bf16.mxu1 %v1457_v52  ;;  %2013 = vmatmul.mubr.bf16.gmra.mxu0 %v1454_v54  ;;  %v805_v39 = vadd.f32 %v4143_v47, %v3756_v40  ;;  %v809_v49 = vadd.f32 %v4180_v3, %v3756_v40 }
 0x186   :  { %v1378_v51 = vsel %vm1122_vm0, %v795_v59, %v1250_v5  ;;  %v1380_v60 = vsel %vm1124_vm1, %v988_v0, %v1252_v26  ;;  %v1253_v20 = vmul.f32 0.2, %v4212_v24  ;;  %vm1127_vm6 = vcmp.ge.f32.partialorder %v801_v22, 0.0  ;;  %2206 = vmatmul.mubr.bf16.gmra.mxu1 %v1456_v50 }
 0x187   :  { %v1458_v58 = vpack.c.bf16 %v1382_v55, %v1378_v51  ;;  %v1460_v63 = vpack.c.bf16 %v1384_v41, %v1380_v60  ;;  %v998_v62 = vadd.f32 %v4145_v48, %v3758_v42  ;;  %v807_v61 = vadd.f32 %v4163_v29, %v3761_v44  ;;  %v820_v2 = vpop.f32.mrf.mxu0  ;;  %v1013_v59 = vpop.f32.mrf.mxu1 }
 0x188   :  { %vm1129_vm7 = vcmp.ge.f32.partialorder %v994_v25, 0.0  ;;  %v1257_v47 = vmul.f32 0.2, %v994_v25  ;;  %v4258_v7 = vadd.f32 %v4165_v57, %v3763_v45  ;;  %v1002_v3 = vadd.f32 %v4182_v9, %v3758_v42 }
 0x189   :  { %vm1130_vm8 = vcmp.ge.f32.partialorder %v805_v39, 0.0  ;;  %v1262_v8 = vmul.f32 0.2, %v809_v49  ;;  %v1379_v48 = vsel %vm1123_vm2, %v4194_v12, %v1251_v27  ;;  %v1383_v6 = vsel %vm1127_vm6, %v801_v22, %v1255_v34  ;;  %v4273_v21 = vpop.f32.mrf.mxu0  ;;  %v4275_v5 = vpop.f32.mrf.mxu1 }
 0x18a   :  { %v1258_v0 = vmul.f32 0.2, %v805_v39  ;;  %vm1134_vm9 = vcmp.ge.f32.partialorder %v809_v49, 0.0  ;;  %v811_v29 = vadd.f32 %v4196_v11, %v3761_v44  ;;  %v1459_v10 = vpack.c.bf16 %v1383_v6, %v1379_v48 }
 0x18b   :  { %vm1132_vm10 = vcmp.ge.f32.partialorder %v998_v62, 0.0  ;;  %v1260_v57 = vmul.f32 0.2, %v998_v62  ;;  %vm1131_vm11 = vcmp.ge.f32.partialorder %v807_v61, 0.0  ;;  %v1259_v13 = vmul.f32 0.2, %v807_v61  ;;  %v826_v36 = vpop.f32.mrf.mxu0  ;;  %v1019_v46 = vpop.f32.mrf.mxu1 }
 0x18c   :  { %v1264_v9 = vmul.f32 0.2, %v1002_v3  ;;  %v1004_v15 = vadd.f32 %v4198_v4, %v3763_v45  ;;  %2022 = vmatprep.mubr.bf16.mxu0 %v1459_v10  ;;  %v1381_v12 = vsel %vm1125_vm5, %v4212_v24, %v1253_v20  ;;  %v1385_v1 = vsel %vm1129_vm7, %v994_v25, %v1257_v47 }
 0x18d   :  { %v1390_v11 = vsel %vm1134_vm9, %v809_v49, %v1262_v8  ;;  %vm1136_vm12 = vcmp.ge.f32.partialorder %v1002_v3, 0.0  ;;  %v1461_v26 = vpack.c.bf16 %v1385_v1, %v1381_v12  ;;  %2023 = vmatmul.mubr.bf16.gmra.mxu0 %v1458_v58  ;;  %v815_v23 = vadd.f32 %v4206_v16, %v3756_v40 }
 0x18e   :  { %v1386_v4 = vsel %vm1130_vm8, %v805_v39, %v1258_v0  ;;  %v1263_v27 = vmul.f32 0.2, %v811_v29  ;;  %v819_v28 = vadd.f32 %v818_v53, %v3756_v40  ;;  %v1012_v24 = vadd.f32 %v1011_v56, %v3758_v42  ;;  %v828_v56 = vpop.f32.mrf.mxu0 }
 0x18f   :  { %v1388_v19 = vsel %vm1132_vm10, %v998_v62, %v1260_v57  ;;  %vm1133_vm13 = vcmp.ge.f32.partialorder %v4258_v7, 0.0  ;;  %v1261_v31 = vmul.f32 0.2, %v4258_v7  ;;  %vm1135_vm14 = vcmp.ge.f32.partialorder %v811_v29, 0.0  ;;  %2215 = vmatprep.mubr.bf16.mxu1 %v1461_v26 }
 0x190   :  { %v1462_v22 = vpack.c.bf16 %v1390_v11, %v1386_v4  ;;  %v1392_v32 = vsel %vm1136_vm12, %v1002_v3, %v1264_v9  ;;  %vm1137_vm15 = vcmp.ge.f32.partialorder %v1004_v15, 0.0  ;;  %2216 = vmatmul.mubr.bf16.gmra.mxu1 %v1460_v63  ;;  %v1008_v16 = vadd.f32 %v4208_v18, %v3758_v42 }
 0x191   :  { %v1265_v43 = vmul.f32 0.2, %v1004_v15  ;;  %v1266_v37 = vmul.f32 0.2, %v815_v23  ;;  %v817_v52 = vadd.f32 %v4220_v30, %v3761_v44  ;;  %v1010_v54 = vadd.f32 %v4222_v14, %v3763_v45  ;;  %v1021_v30 = vpop.f32.mrf.mxu1 }
 0x192   :  { %v1270_v17 = vmul.f32 0.2, %v819_v28  ;;  %v1272_v33 = vmul.f32 0.2, %v1012_v24  ;;  %v1387_v55 = vsel %vm1131_vm11, %v807_v61, %v1259_v13  ;;  %v1391_v41 = vsel %vm1135_vm14, %v811_v29, %v1263_v27 }
 0x193   :  { %vm1142_vm0 = vcmp.ge.f32.partialorder %v819_v28, 0.0  ;;  %vm1144_vm1 = vcmp.ge.f32.partialorder %v1012_v24, 0.0  ;;  %v821_v18 = vadd.f32 %v820_v2, %v3761_v44  ;;  %v1463_v25 = vpack.c.bf16 %v1391_v41, %v1387_v55  ;;  %v1023_v2 = vpop.f32.mrf.mxu1 }
 0x194   :  { %v1464_v50 = vpack.c.bf16 %v1392_v32, %v1388_v19  ;;  %vm1138_vm2 = vcmp.ge.f32.partialorder %v815_v23, 0.0  ;;  %vm1140_vm3 = vcmp.ge.f32.partialorder %v1008_v16, 0.0  ;;  %v1268_v53 = vmul.f32 0.2, %v1008_v16 }
 0x195   :  { %vm1139_vm4 = vcmp.ge.f32.partialorder %v817_v52, 0.0  ;;  %v1014_v14 = vadd.f32 %v1013_v59, %v3763_v45  ;;  %2032 = vmatprep.mubr.bf16.mxu0 %v1463_v25  ;;  %v1389_v34 = vsel %vm1133_vm13, %v4258_v7, %v1261_v31  ;;  %v1393_v39 = vsel %vm1137_vm15, %v1004_v15, %v1265_v43  ;;  %v830_v7 = vpop.f32.mrf.mxu0 }
 0x196   :  { %v1398_v49 = vsel %vm1142_vm0, %v819_v28, %v1270_v17  ;;  %v1400_v51 = vsel %vm1144_vm1, %v1012_v24, %v1272_v33  ;;  %v1465_v60 = vpack.c.bf16 %v1393_v39, %v1389_v34  ;;  %2033 = vmatmul.mubr.bf16.gmra.mxu0 %v1462_v22  ;;  %v827_v20 = vadd.f32 %v826_v36, %v3761_v44 }
 0x197   :  { %v1394_v58 = vsel %vm1138_vm2, %v815_v23, %v1266_v37  ;;  %v1267_v63 = vmul.f32 0.2, %v817_v52  ;;  %vm1141_vm5 = vcmp.ge.f32.partialorder %v1010_v54, 0.0  ;;  %v1271_v62 = vmul.f32 0.2, %v821_v18 }
 0x198   :  { %v1396_v61 = vsel %vm1140_vm3, %v1008_v16, %v1268_v53  ;;  %v1269_v47 = vmul.f32 0.2, %v1010_v54  ;;  %vm1143_vm6 = vcmp.ge.f32.partialorder %v821_v18, 0.0  ;;  %2225 = vmatprep.mubr.bf16.mxu1 %v1465_v60  ;;  %v1020_v3 = vadd.f32 %v1019_v46, %v3763_v45 }
 0x199   :  { %v1466_v59 = vpack.c.bf16 %v1398_v49, %v1394_v58  ;;  %v1468_v8 = vpack.c.bf16 %v1400_v51, %v1396_v61  ;;  %vm1145_vm7 = vcmp.ge.f32.partialorder %v1014_v14, 0.0  ;;  %2226 = vmatmul.mubr.bf16.gmra.mxu1 %v1464_v50  ;;  %v829_v48 = vadd.f32 %v828_v56, %v3756_v40  ;;  %v2448_v49 = vld [vmem:[%s4638_s5] sm:$0x3] }
 0x19a   :  { %v1273_v6 = vmul.f32 0.2, %v1014_v14  ;;  %v825_v0 = vadd.f32 %v4273_v21, %v3756_v40  ;;  %v1018_v29 = vadd.f32 %v4275_v5, %v3758_v42  ;;  %v1275_v10 = vmul.f32 0.2, %v827_v20 }
 0x19b   :  { %v831_v57 = vadd.f32 %v830_v7, %v3761_v44  ;;  %v1024_v13 = vadd.f32 %v1023_v2, %v3763_v45  ;;  %v1395_v9 = vsel %vm1139_vm4, %v817_v52, %v1267_v63  ;;  %v1399_v15 = vsel %vm1143_vm6, %v821_v18, %v1271_v62  ;;  %v1538_v52 = vld [vmem:[%s4637_s4] sm:$0x3] }
 0x19c   :  { %vm1147_vm8 = vcmp.ge.f32.partialorder %v827_v20, 0.0  ;;  %v1277_v12 = vmul.f32 0.2, %v1020_v3  ;;  %v1022_v1 = vadd.f32 %v1021_v30, %v3758_v42  ;;  %v1467_v11 = vpack.c.bf16 %v1399_v15, %v1395_v9 }
 0x19d   :  { %vm1149_vm9 = vcmp.ge.f32.partialorder %v1020_v3, 0.0  ;;  %v1278_v26 = vmul.f32 0.2, %v829_v48  ;;  %vm1151_vm10 = vcmp.ge.f32.partialorder %v831_v57, 0.0  ;;  %v1279_v40 = vmul.f32 0.2, %v831_v57 }
 0x19e   :  { %vm1153_vm11 = vcmp.ge.f32.partialorder %v1024_v13, 0.0  ;;  %v1281_v21 = vmul.f32 0.2, %v1024_v13  ;;  %2042 = vmatprep.mubr.bf16.mxu0 %v1467_v11  ;;  %v1397_v44 = vsel %vm1141_vm5, %v1010_v54, %v1269_v47  ;;  %v1401_v45 = vsel %vm1145_vm7, %v1014_v14, %v1273_v6 }
 0x19f   :  { %vm1150_vm12 = vcmp.ge.f32.partialorder %v829_v48, 0.0  ;;  %v1469_v5 = vpack.c.bf16 %v1401_v45, %v1397_v44  ;;  %2043 = vmatmul.mubr.bf16.gmra.mxu0 %v1466_v59  ;;  %v1403_v23 = vsel %vm1147_vm8, %v827_v20, %v1275_v10  ;;  %v1407_v4 = vsel %vm1151_vm10, %v831_v57, %v1279_v40 }
 0x1a0   :  { %v1274_v27 = vmul.f32 0.2, %v825_v0  ;;  %v1471_v42 = vpack.c.bf16 %v1407_v4, %v1403_v23  ;;  %v1405_v28 = vsel %vm1149_vm9, %v1020_v3, %v1277_v12  ;;  %v1409_v24 = vsel %vm1153_vm11, %v1024_v13, %v1281_v21 }
 0x1a1   :  { %vm1146_vm13 = vcmp.ge.f32.partialorder %v825_v0, 0.0  ;;  %v1280_v19 = vmul.f32 0.2, %v1022_v1  ;;  %2235 = vmatprep.mubr.bf16.mxu1 %v1469_v5  ;;  %v1473_v31 = vpack.c.bf16 %v1409_v24, %v1405_v28  ;;  %v1406_v22 = vsel %vm1150_vm12, %v829_v48, %v1278_v26 }
 0x1a2   :  { %vm1152_vm14 = vcmp.ge.f32.partialorder %v1022_v1, 0.0  ;;  %2236 = vmatmul.mubr.bf16.gmra.mxu1 %v1468_v8  ;;  %2052 = vmatprep.mubr.bf16.mxu0 %v1471_v42  ;;  %v1276_v32 = vmul.f32 0.2, %v1018_v29  ;;  %v1402_v16 = vsel %vm1146_vm13, %v825_v0, %v1274_v27  ;;  %vm1148_vm15 = vcmp.ge.f32.partialorder %v1018_v29, 0.0 }
 0x1a3   :  { %2245 = vmatprep.mubr.bf16.mxu1 %v1473_v31  ;;  %v1470_v36 = vpack.c.bf16 %v1406_v22, %v1402_v16  ;;  %v1408_v46 = vsel %vm1152_vm14, %v1022_v1, %v1280_v19  ;;  %v4320_v54 = vrot.slane %v1538_v52, %v3748_v35  ;;  %v4323_v17 = vrot.slane %v1538_v52, %v3753_v38 }
 0x1a4   :  { %v1404_v43 = vsel %vm1148_vm15, %v1018_v29, %v1276_v32  ;;  %v4333_v47 = vrot.slane %v2448_v49, %v3748_v35  ;;  %v4336_v3 = vrot.slane %v2448_v49, %v3753_v38 }
 0x1a5   :  { %v1472_v37 = vpack.c.bf16 %v1408_v46, %v1404_v43 }
 0x1a7   :  { %2053 = vmatmul.mubr.bf16.gmra.mxu0 %v1470_v36 }
 0x1aa   :  { %2246 = vmatmul.mubr.bf16.gmra.mxu1 %v1472_v37 }
 0x1e0   :  { %v1904_v33 = vpop.f32.mrf.mxu0  ;;  %v2097_v55 = vpop.f32.mrf.mxu1 }
 0x1e1   :  { %v1905_v41 = vadd.f32 %v1904_v33, %v4320_v54 }
 0x1e2   :  { %v1906_v18 = vpop.f32.mrf.mxu0  ;;  %v2099_v25 = vpop.f32.mrf.mxu1 }
 0x1e3   :  { %v2098_v50 = vadd.f32 %v2097_v55, %v1905_v41  ;;  %v1907_v53 = vadd.f32 %v1906_v18, %v4323_v17 }
 0x1e4   :  { %v1908_v56 = vpop.f32.mrf.mxu0  ;;  %v2101_v30 = vpop.f32.mrf.mxu1 }
 0x1e5   :  { %vm2256_vm0 = vcmp.ge.f32.partialorder %v2098_v50, 0.0  ;;  %v2320_v14 = vmul.f32 0.2, %v2098_v50  ;;  %v2100_v34 = vadd.f32 %v2099_v25, %v1907_v53  ;;  %v1909_v39 = vadd.f32 %v1908_v56, %v4320_v54 }
 0x1e6   :  { %v1910_v51 = vpop.f32.mrf.mxu0  ;;  %v2103_v60 = vpop.f32.mrf.mxu1 }
 0x1e7   :  { %vm2257_vm1 = vcmp.ge.f32.partialorder %v2100_v34, 0.0  ;;  %v2321_v20 = vmul.f32 0.2, %v2100_v34  ;;  %v2102_v58 = vadd.f32 %v2101_v30, %v1909_v39  ;;  %v1911_v63 = vadd.f32 %v1910_v51, %v4323_v17 }
 0x1e8   :  { %v1914_v62 = vpop.f32.mrf.mxu0  ;;  %v2384_v61 = vsel %vm2256_vm0, %v2098_v50, %v2320_v14 }
 0x1e9   :  { %vm2258_vm2 = vcmp.ge.f32.partialorder %v2102_v58, 0.0  ;;  %v2322_v7 = vmul.f32 0.2, %v2102_v58  ;;  %v2104_v2 = vadd.f32 %v2103_v60, %v1911_v63  ;;  %v1915_v59 = vadd.f32 %v1914_v62, %v4320_v54  ;;  %v2107_v8 = vpop.f32.mrf.mxu1 }
 0x1ea   :  { %v1916_v48 = vpop.f32.mrf.mxu0  ;;  %v2385_v6 = vsel %vm2257_vm1, %v2100_v34, %v2321_v20  ;;  %v2460_v35 = vmul.f32 %v4333_v47, %v2384_v61 }
 0x1eb   :  { %vm2259_vm3 = vcmp.ge.f32.partialorder %v2104_v2, 0.0  ;;  %v2323_v0 = vmul.f32 0.2, %v2104_v2  ;;  %v2108_v29 = vadd.f32 %v2107_v8, %v1915_v59  ;;  %v1917_v10 = vadd.f32 %v1916_v48, %v4323_v17  ;;  %v2109_v57 = vpop.f32.mrf.mxu1 }
 0x1ec   :  { %v1918_v13 = vpop.f32.mrf.mxu0  ;;  %v2461_v38 = vmul.f32 %v4336_v3, %v2385_v6  ;;  %v2386_v9 = vsel %vm2258_vm2, %v2102_v58, %v2322_v7 }
 0x1ed   :  { %vm2260_vm4 = vcmp.ge.f32.partialorder %v2108_v29, 0.0  ;;  %v2324_v15 = vmul.f32 0.2, %v2108_v29  ;;  %v2110_v12 = vadd.f32 %v2109_v57, %v1917_v10  ;;  %v1919_v1 = vadd.f32 %v1918_v13, %v4320_v54  ;;  %v2111_v11 = vpop.f32.mrf.mxu1 }
 0x1ee   :  { %v1920_v26 = vpop.f32.mrf.mxu0  ;;  %v2524_v40 = vadd.f32 %v2461_v38, %v2460_v35  ;;  %v2387_v21 = vsel %vm2259_vm3, %v2104_v2, %v2323_v0  ;;  %v2462_v4 = vmul.f32 %v4333_v47, %v2386_v9 }
 0x1ef   :  { %vm2261_vm5 = vcmp.ge.f32.partialorder %v2110_v12, 0.0  ;;  %v2325_v44 = vmul.f32 0.2, %v2110_v12  ;;  %v2112_v45 = vadd.f32 %v2111_v11, %v1919_v1  ;;  %v1921_v5 = vadd.f32 %v1920_v26, %v4323_v17  ;;  %v2113_v23 = vpop.f32.mrf.mxu1 }
 0x1f0   :  { %2525 = vadd.xlane.f32.xlu0 %v2524_v40  ;;  %v2463_v27 = vmul.f32 %v4336_v3, %v2387_v21  ;;  %v2388_v42 = vsel %vm2260_vm4, %v2108_v29, %v2324_v15 }
 0x1f1   :  { %vm2262_vm6 = vcmp.ge.f32.partialorder %v2112_v45, 0.0  ;;  %v2326_v28 = vmul.f32 0.2, %v2112_v45  ;;  %v2114_v24 = vadd.f32 %v2113_v23, %v1921_v5  ;;  %v2389_v19 = vsel %vm2261_vm5, %v2110_v12, %v2325_v44 }
 0x1f2   :  { %v1924_v31 = vpop.f32.mrf.mxu0  ;;  %v2527_v22 = vadd.f32 %v2463_v27, %v2462_v4  ;;  %v2464_v32 = vmul.f32 %v4333_v47, %v2388_v42  ;;  %v2465_v16 = vmul.f32 %v4336_v3, %v2389_v19 }
 0x1f3   :  { %vm2263_vm7 = vcmp.ge.f32.partialorder %v2114_v24, 0.0  ;;  %v2327_v36 = vmul.f32 0.2, %v2114_v24  ;;  %v1925_v46 = vadd.f32 %v1924_v31, %v4320_v54  ;;  %v2117_v43 = vpop.f32.mrf.mxu1  ;;  %v2390_v37 = vsel %vm2262_vm6, %v2112_v45, %v2326_v28 }
 0x1f4   :  { %v1926_v52 = vpop.f32.mrf.mxu0  ;;  %2528 = vadd.xlane.f32.xlu0 %v2527_v22  ;;  %v2530_v33 = vadd.f32 %v2465_v16, %v2464_v32  ;;  %v2466_v53 = vmul.f32 %v4333_v47, %v2390_v37 }
 0x1f5   :  { %v2118_v55 = vadd.f32 %v2117_v43, %v1925_v46  ;;  %v1927_v41 = vadd.f32 %v1926_v52, %v4323_v17  ;;  %v2119_v18 = vpop.f32.mrf.mxu1  ;;  %v2391_v25 = vsel %vm2263_vm7, %v2114_v24, %v2327_v36 }
 0x1f6   :  { %v1928_v50 = vpop.f32.mrf.mxu0  ;;  %2531 = vadd.xlane.f32.xlu1 %v2530_v33  ;;  %v2467_v56 = vmul.f32 %v4336_v3, %v2391_v25 }
 0x1f7   :  { %vm2264_vm8 = vcmp.ge.f32.partialorder %v2118_v55, 0.0  ;;  %v2328_v30 = vmul.f32 0.2, %v2118_v55  ;;  %v2120_v14 = vadd.f32 %v2119_v18, %v1927_v41  ;;  %v1929_v34 = vadd.f32 %v1928_v50, %v4320_v54  ;;  %v2121_v39 = vpop.f32.mrf.mxu1 }
 0x1f8   :  { %v1930_v49 = vpop.f32.mrf.mxu0  ;;  %v2533_v51 = vadd.f32 %v2467_v56, %v2466_v53 }
 0x1f9   :  { %vm2265_vm9 = vcmp.ge.f32.partialorder %v2120_v14, 0.0  ;;  %v2329_v60 = vmul.f32 0.2, %v2120_v14  ;;  %v2122_v20 = vadd.f32 %v2121_v39, %v1929_v34  ;;  %v1931_v58 = vadd.f32 %v1930_v49, %v4323_v17  ;;  %v2123_v63 = vpop.f32.mrf.mxu1 }
 0x1fa   :  { %2534 = vadd.xlane.f32.xlu1 %v2533_v51  ;;  %v2392_v62 = vsel %vm2264_vm8, %v2118_v55, %v2328_v30  ;;  %v1934_v2 = vpop.f32.mrf.mxu0 }
 0x1fb   :  { %vm2266_vm10 = vcmp.ge.f32.partialorder %v2122_v20, 0.0  ;;  %v2330_v61 = vmul.f32 0.2, %v2122_v20  ;;  %v2124_v7 = vadd.f32 %v2123_v63, %v1931_v58  ;;  %v2393_v59 = vsel %vm2265_vm9, %v2120_v14, %v2329_v60 }
 0x1fc   :  { %v1935_v8 = vadd.f32 %v1934_v2, %v4320_v54  ;;  %v2127_v48 = vpop.f32.mrf.mxu1  ;;  %v2468_v6 = vmul.f32 %v4333_v47, %v2392_v62  ;;  %v2469_v0 = vmul.f32 %v4336_v3, %v2393_v59  ;;  %v1936_v10 = vpop.f32.mrf.mxu0 }
 0x1fd   :  { %vm2267_vm11 = vcmp.ge.f32.partialorder %v2124_v7, 0.0  ;;  %v2331_v29 = vmul.f32 0.2, %v2124_v7  ;;  %v1937_v13 = vadd.f32 %v1936_v10, %v4323_v17  ;;  %v2394_v9 = vsel %vm2266_vm10, %v2122_v20, %v2330_v61 }
 0x1fe   :  { %v2128_v57 = vadd.f32 %v2127_v48, %v1935_v8  ;;  %v2129_v35 = vpop.f32.mrf.mxu1  ;;  %v2536_v38 = vadd.f32 %v2469_v0, %v2468_v6  ;;  %v1938_v15 = vpop.f32.mrf.mxu0  ;;  %v2470_v44 = vmul.f32 %v4333_v47, %v2394_v9 }
 0x1ff   :  { %v2395_v12 = vsel %vm2267_vm11, %v2124_v7, %v2331_v29  ;;  %v2130_v11 = vadd.f32 %v2129_v35, %v1937_v13  ;;  %v1939_v26 = vadd.f32 %v1938_v15, %v4320_v54 }
 0x200   :  { %vm2268_vm12 = vcmp.ge.f32.partialorder %v2128_v57, 0.0  ;;  %v2332_v1 = vmul.f32 0.2, %v2128_v57  ;;  %v2131_v40 = vpop.f32.mrf.mxu1  ;;  %2537 = vadd.xlane.f32.xlu0 %v2536_v38  ;;  %v1940_v21 = vpop.f32.mrf.mxu0  ;;  %v2471_v45 = vmul.f32 %v4336_v3, %v2395_v12 }
 0x201   :  { %vm2269_vm13 = vcmp.ge.f32.partialorder %v2130_v11, 0.0  ;;  %v2333_v5 = vmul.f32 0.2, %v2130_v11  ;;  %v2132_v23 = vadd.f32 %v2131_v40, %v1939_v26  ;;  %v1941_v4 = vadd.f32 %v1940_v21, %v4323_v17 }
 0x202   :  { %v2133_v27 = vpop.f32.mrf.mxu1  ;;  %v2539_v42 = vadd.f32 %v2471_v45, %v2470_v44  ;;  %v2396_v28 = vsel %vm2268_vm12, %v2128_v57, %v2332_v1 }
 0x203   :  { %vm2270_vm14 = vcmp.ge.f32.partialorder %v2132_v23, 0.0  ;;  %v2334_v24 = vmul.f32 0.2, %v2132_v23  ;;  %v2134_v19 = vadd.f32 %v2133_v27, %v1941_v4  ;;  %v2397_v31 = vsel %vm2269_vm13, %v2130_v11, %v2333_v5 }
 0x204   :  { %2540 = vadd.xlane.f32.xlu1 %v2539_v42  ;;  %v2472_v16 = vmul.f32 %v4333_v47, %v2396_v28  ;;  %v2473_v36 = vmul.f32 %v4336_v3, %v2397_v31 }
 0x205   :  { %v1944_v22 = vpop.f32.mrf.mxu0  ;;  %v2137_v32 = vpop.f32.mrf.mxu1  ;;  %vm2271_vm15 = vcmp.ge.f32.partialorder %v2134_v19, 0.0  ;;  %v2335_v46 = vmul.f32 0.2, %v2134_v19  ;;  %v2398_v37 = vsel %vm2270_vm14, %v2132_v23, %v2334_v24 }
 0x206   :  { %v1945_v43 = vadd.f32 %v1944_v22, %v4320_v54  ;;  %v2542_v55 = vadd.f32 %v2473_v36, %v2472_v16  ;;  %v2474_v56 = vmul.f32 %v4333_v47, %v2398_v37 }
 0x207   :  { %v1946_v52 = vpop.f32.mrf.mxu0  ;;  %v2139_v33 = vpop.f32.mrf.mxu1  ;;  %v2399_v25 = vsel %vm2271_vm15, %v2134_v19, %v2335_v46 }
 0x208   :  { %v2138_v41 = vadd.f32 %v2137_v32, %v1945_v43  ;;  %v1947_v18 = vadd.f32 %v1946_v52, %v4323_v17  ;;  %2543 = vadd.xlane.f32.xlu0 %v2542_v55  ;;  %v2475_v30 = vmul.f32 %v4336_v3, %v2399_v25 }
 0x209   :  { %v1948_v50 = vpop.f32.mrf.mxu0  ;;  %v2141_v53 = vpop.f32.mrf.mxu1 }
 0x20a   :  { %vm2272_vm0 = vcmp.ge.f32.partialorder %v2138_v41, 0.0  ;;  %v2336_v14 = vmul.f32 0.2, %v2138_v41  ;;  %v2140_v34 = vadd.f32 %v2139_v33, %v1947_v18  ;;  %v1949_v39 = vadd.f32 %v1948_v50, %v4320_v54 }
 0x20b   :  { %v1950_v49 = vpop.f32.mrf.mxu0  ;;  %v2143_v51 = vpop.f32.mrf.mxu1  ;;  %v2545_v60 = vadd.f32 %v2475_v30, %v2474_v56 }
 0x20c   :  { %vm2273_vm1 = vcmp.ge.f32.partialorder %v2140_v34, 0.0  ;;  %v2337_v20 = vmul.f32 0.2, %v2140_v34  ;;  %v2142_v58 = vadd.f32 %v2141_v53, %v1949_v39  ;;  %v1951_v63 = vadd.f32 %v1950_v49, %v4323_v17 }
 0x20d   :  { %2546 = vadd.xlane.f32.xlu1 %v2545_v60  ;;  %v2400_v62 = vsel %vm2272_vm0, %v2138_v41, %v2336_v14 }
 0x20e   :  { %vm2274_vm2 = vcmp.ge.f32.partialorder %v2142_v58, 0.0  ;;  %v2338_v61 = vmul.f32 0.2, %v2142_v58  ;;  %v2144_v7 = vadd.f32 %v2143_v51, %v1951_v63  ;;  %v1954_v2 = vpop.f32.mrf.mxu0  ;;  %v2147_v59 = vpop.f32.mrf.mxu1  ;;  %v2401_v8 = vsel %vm2273_vm1, %v2140_v34, %v2337_v20 }
 0x20f   :  { %v1955_v48 = vadd.f32 %v1954_v2, %v4320_v54  ;;  %v2476_v6 = vmul.f32 %v4333_v47, %v2400_v62  ;;  %v2477_v0 = vmul.f32 %v4336_v3, %v2401_v8 }
 0x210   :  { %vm2275_vm3 = vcmp.ge.f32.partialorder %v2144_v7, 0.0  ;;  %v2339_v29 = vmul.f32 0.2, %v2144_v7  ;;  %v1956_v10 = vpop.f32.mrf.mxu0  ;;  %v2149_v57 = vpop.f32.mrf.mxu1  ;;  %v2402_v9 = vsel %vm2274_vm2, %v2142_v58, %v2338_v61 }
 0x211   :  { %v2148_v13 = vadd.f32 %v2147_v59, %v1955_v48  ;;  %v1957_v35 = vadd.f32 %v1956_v10, %v4323_v17  ;;  %v2548_v38 = vadd.f32 %v2477_v0, %v2476_v6  ;;  %v2478_v45 = vmul.f32 %v4333_v47, %v2402_v9 }
 0x212   :  { %v1958_v15 = vpop.f32.mrf.mxu0  ;;  %v2151_v12 = vpop.f32.mrf.mxu1  ;;  %v2403_v1 = vsel %vm2275_vm3, %v2144_v7, %v2339_v29 }
 0x213   :  { %vm2276_vm4 = vcmp.ge.f32.partialorder %v2148_v13, 0.0  ;;  %v2340_v11 = vmul.f32 0.2, %v2148_v13  ;;  %v2150_v26 = vadd.f32 %v2149_v57, %v1957_v35  ;;  %v1959_v40 = vadd.f32 %v1958_v15, %v4320_v54  ;;  %2549 = vadd.xlane.f32.xlu0 %v2548_v38 }
 0x214   :  { %v1960_v21 = vpop.f32.mrf.mxu0  ;;  %v2153_v44 = vpop.f32.mrf.mxu1  ;;  %v2479_v5 = vmul.f32 %v4336_v3, %v2403_v1 }
 0x215   :  { %vm2277_vm5 = vcmp.ge.f32.partialorder %v2150_v26, 0.0  ;;  %v2341_v23 = vmul.f32 0.2, %v2150_v26  ;;  %v2152_v4 = vadd.f32 %v2151_v12, %v1959_v40  ;;  %v1961_v27 = vadd.f32 %v1960_v21, %v4323_v17 }
 0x216   :  { %v2551_v42 = vadd.f32 %v2479_v5, %v2478_v45  ;;  %v2404_v28 = vsel %vm2276_vm4, %v2148_v13, %v2340_v11 }
 0x217   :  { %vm2278_vm6 = vcmp.ge.f32.partialorder %v2152_v4, 0.0  ;;  %v2342_v24 = vmul.f32 0.2, %v2152_v4  ;;  %v2154_v19 = vadd.f32 %v2153_v44, %v1961_v27  ;;  %v1964_v31 = vpop.f32.mrf.mxu0  ;;  %v2157_v22 = vpop.f32.mrf.mxu1  ;;  %v2405_v32 = vsel %vm2277_vm5, %v2150_v26, %v2341_v23 }
 0x218   :  { %v1965_v16 = vadd.f32 %v1964_v31, %v4320_v54  ;;  %2552 = vadd.xlane.f32.xlu1 %v2551_v42  ;;  %v2480_v36 = vmul.f32 %v4333_v47, %v2404_v28  ;;  %v2481_v46 = vmul.f32 %v4336_v3, %v2405_v32 }
 0x219   :  { %vm2279_vm7 = vcmp.ge.f32.partialorder %v2154_v19, 0.0  ;;  %v2343_v43 = vmul.f32 0.2, %v2154_v19  ;;  %v1966_v37 = vpop.f32.mrf.mxu0  ;;  %v2159_v52 = vpop.f32.mrf.mxu1  ;;  %v2406_v18 = vsel %vm2278_vm6, %v2152_v4, %v2342_v24 }
 0x21a   :  { %v2158_v33 = vadd.f32 %v2157_v22, %v1965_v16  ;;  %v1967_v55 = vadd.f32 %v1966_v37, %v4323_v17  ;;  %v2554_v41 = vadd.f32 %v2481_v46, %v2480_v36  ;;  %v2482_v49 = vmul.f32 %v4333_v47, %v2406_v18 }
 0x21b   :  { %v1968_v25 = vpop.f32.mrf.mxu0  ;;  %v2161_v50 = vpop.f32.mrf.mxu1  ;;  %v2407_v53 = vsel %vm2279_vm7, %v2154_v19, %v2343_v43 }
 0x21c   :  { %vm2280_vm8 = vcmp.ge.f32.partialorder %v2158_v33, 0.0  ;;  %v2344_v56 = vmul.f32 0.2, %v2158_v33  ;;  %v2160_v30 = vadd.f32 %v2159_v52, %v1967_v55  ;;  %v1969_v14 = vadd.f32 %v1968_v25, %v4320_v54  ;;  %2555 = vadd.xlane.f32.xlu0 %v2554_v41 }
 0x21d   :  { %v1970_v34 = vpop.f32.mrf.mxu0  ;;  %v2163_v39 = vpop.f32.mrf.mxu1  ;;  %v2483_v51 = vmul.f32 %v4336_v3, %v2407_v53 }
 0x21e   :  { %vm2281_vm9 = vcmp.ge.f32.partialorder %v2160_v30, 0.0  ;;  %v2345_v60 = vmul.f32 0.2, %v2160_v30  ;;  %v2162_v20 = vadd.f32 %v2161_v50, %v1969_v14  ;;  %v1971_v58 = vadd.f32 %v1970_v34, %v4323_v17 }
 0x21f   :  { %v2557_v63 = vadd.f32 %v2483_v51, %v2482_v49  ;;  %v2408_v62 = vsel %vm2280_vm8, %v2158_v33, %v2344_v56 }
 0x220   :  { %vm2282_vm10 = vcmp.ge.f32.partialorder %v2162_v20, 0.0  ;;  %v2346_v61 = vmul.f32 0.2, %v2162_v20  ;;  %v2164_v7 = vadd.f32 %v2163_v39, %v1971_v58  ;;  %v1974_v2 = vpop.f32.mrf.mxu0  ;;  %v2167_v59 = vpop.f32.mrf.mxu1  ;;  %v2409_v8 = vsel %vm2281_vm9, %v2160_v30, %v2345_v60 }
 0x221   :  { %v1975_v48 = vadd.f32 %v1974_v2, %v4320_v54  ;;  %2558 = vadd.xlane.f32.xlu1 %v2557_v63  ;;  %v2484_v6 = vmul.f32 %v4333_v47, %v2408_v62  ;;  %v2485_v0 = vmul.f32 %v4336_v3, %v2409_v8 }
 0x222   :  { %vm2283_vm11 = vcmp.ge.f32.partialorder %v2164_v7, 0.0  ;;  %v2347_v29 = vmul.f32 0.2, %v2164_v7  ;;  %v1976_v10 = vpop.f32.mrf.mxu0  ;;  %v2169_v57 = vpop.f32.mrf.mxu1  ;;  %v2410_v9 = vsel %vm2282_vm10, %v2162_v20, %v2346_v61 }
 0x223   :  { %v2168_v13 = vadd.f32 %v2167_v59, %v1975_v48  ;;  %v1977_v35 = vadd.f32 %v1976_v10, %v4323_v17  ;;  %v2560_v38 = vadd.f32 %v2485_v0, %v2484_v6  ;;  %v2486_v45 = vmul.f32 %v4333_v47, %v2410_v9 }
 0x224   :  { %v1978_v15 = vpop.f32.mrf.mxu0  ;;  %v2171_v12 = vpop.f32.mrf.mxu1  ;;  %v2411_v1 = vsel %vm2283_vm11, %v2164_v7, %v2347_v29 }
 0x225   :  { %vm2284_vm12 = vcmp.ge.f32.partialorder %v2168_v13, 0.0  ;;  %v2348_v11 = vmul.f32 0.2, %v2168_v13  ;;  %v2170_v26 = vadd.f32 %v2169_v57, %v1977_v35  ;;  %v1979_v40 = vadd.f32 %v1978_v15, %v4320_v54  ;;  %2561 = vadd.xlane.f32.xlu0 %v2560_v38 }
 0x226   :  { %v1980_v21 = vpop.f32.mrf.mxu0  ;;  %v2173_v44 = vpop.f32.mrf.mxu1  ;;  %v2487_v5 = vmul.f32 %v4336_v3, %v2411_v1 }
 0x227   :  { %vm2285_vm13 = vcmp.ge.f32.partialorder %v2170_v26, 0.0  ;;  %v2349_v23 = vmul.f32 0.2, %v2170_v26  ;;  %v2172_v4 = vadd.f32 %v2171_v12, %v1979_v40  ;;  %v1981_v27 = vadd.f32 %v1980_v21, %v4323_v17 }
 0x228   :  { %v2563_v42 = vadd.f32 %v2487_v5, %v2486_v45  ;;  %v2412_v28 = vsel %vm2284_vm12, %v2168_v13, %v2348_v11 }
 0x229   :  { %vm2286_vm14 = vcmp.ge.f32.partialorder %v2172_v4, 0.0  ;;  %v2350_v24 = vmul.f32 0.2, %v2172_v4  ;;  %v2174_v19 = vadd.f32 %v2173_v44, %v1981_v27  ;;  %v1984_v31 = vpop.f32.mrf.mxu0  ;;  %v2177_v22 = vpop.f32.mrf.mxu1  ;;  %v2413_v32 = vsel %vm2285_vm13, %v2170_v26, %v2349_v23 }
 0x22a   :  { %v1985_v16 = vadd.f32 %v1984_v31, %v4320_v54  ;;  %2564 = vadd.xlane.f32.xlu1 %v2563_v42  ;;  %v2488_v36 = vmul.f32 %v4333_v47, %v2412_v28  ;;  %v2489_v46 = vmul.f32 %v4336_v3, %v2413_v32 }
 0x22b   :  { %vm2287_vm15 = vcmp.ge.f32.partialorder %v2174_v19, 0.0  ;;  %v2351_v43 = vmul.f32 0.2, %v2174_v19  ;;  %v1986_v37 = vpop.f32.mrf.mxu0  ;;  %v2179_v52 = vpop.f32.mrf.mxu1  ;;  %v2414_v18 = vsel %vm2286_vm14, %v2172_v4, %v2350_v24 }
 0x22c   :  { %v2178_v33 = vadd.f32 %v2177_v22, %v1985_v16  ;;  %v1987_v55 = vadd.f32 %v1986_v37, %v4323_v17  ;;  %v2566_v41 = vadd.f32 %v2489_v46, %v2488_v36  ;;  %v2490_v49 = vmul.f32 %v4333_v47, %v2414_v18 }
 0x22d   :  { %v1988_v25 = vpop.f32.mrf.mxu0  ;;  %v2181_v50 = vpop.f32.mrf.mxu1  ;;  %v2415_v53 = vsel %vm2287_vm15, %v2174_v19, %v2351_v43 }
 0x22e   :  { %vm2288_vm0 = vcmp.ge.f32.partialorder %v2178_v33, 0.0  ;;  %v2352_v56 = vmul.f32 0.2, %v2178_v33  ;;  %v2180_v30 = vadd.f32 %v2179_v52, %v1987_v55  ;;  %v1989_v14 = vadd.f32 %v1988_v25, %v4320_v54  ;;  %2567 = vadd.xlane.f32.xlu0 %v2566_v41 }
 0x22f   :  { %v1990_v34 = vpop.f32.mrf.mxu0  ;;  %v2183_v39 = vpop.f32.mrf.mxu1  ;;  %v2491_v51 = vmul.f32 %v4336_v3, %v2415_v53 }
 0x230   :  { %vm2289_vm1 = vcmp.ge.f32.partialorder %v2180_v30, 0.0  ;;  %v2353_v60 = vmul.f32 0.2, %v2180_v30  ;;  %v2182_v20 = vadd.f32 %v2181_v50, %v1989_v14  ;;  %v1991_v58 = vadd.f32 %v1990_v34, %v4323_v17 }
 0x231   :  { %v2569_v63 = vadd.f32 %v2491_v51, %v2490_v49  ;;  %v2416_v62 = vsel %vm2288_vm0, %v2178_v33, %v2352_v56 }
 0x232   :  { %vm2290_vm2 = vcmp.ge.f32.partialorder %v2182_v20, 0.0  ;;  %v2354_v61 = vmul.f32 0.2, %v2182_v20  ;;  %v2184_v7 = vadd.f32 %v2183_v39, %v1991_v58  ;;  %v1994_v2 = vpop.f32.mrf.mxu0  ;;  %v2187_v59 = vpop.f32.mrf.mxu1  ;;  %v2417_v8 = vsel %vm2289_vm1, %v2180_v30, %v2353_v60 }
 0x233   :  { %v1995_v48 = vadd.f32 %v1994_v2, %v4320_v54  ;;  %2570 = vadd.xlane.f32.xlu1 %v2569_v63  ;;  %v2492_v6 = vmul.f32 %v4333_v47, %v2416_v62  ;;  %v2493_v0 = vmul.f32 %v4336_v3, %v2417_v8 }
 0x234   :  { %vm2291_vm3 = vcmp.ge.f32.partialorder %v2184_v7, 0.0  ;;  %v2355_v29 = vmul.f32 0.2, %v2184_v7  ;;  %v1996_v10 = vpop.f32.mrf.mxu0  ;;  %v2189_v57 = vpop.f32.mrf.mxu1  ;;  %v2418_v9 = vsel %vm2290_vm2, %v2182_v20, %v2354_v61 }
 0x235   :  { %v2188_v13 = vadd.f32 %v2187_v59, %v1995_v48  ;;  %v1997_v35 = vadd.f32 %v1996_v10, %v4323_v17  ;;  %v2572_v38 = vadd.f32 %v2493_v0, %v2492_v6  ;;  %v2494_v45 = vmul.f32 %v4333_v47, %v2418_v9 }
 0x236   :  { %v1998_v15 = vpop.f32.mrf.mxu0  ;;  %v2191_v12 = vpop.f32.mrf.mxu1  ;;  %v2419_v1 = vsel %vm2291_vm3, %v2184_v7, %v2355_v29 }
 0x237   :  { %vm2292_vm4 = vcmp.ge.f32.partialorder %v2188_v13, 0.0  ;;  %v2356_v11 = vmul.f32 0.2, %v2188_v13  ;;  %v2190_v26 = vadd.f32 %v2189_v57, %v1997_v35  ;;  %v1999_v40 = vadd.f32 %v1998_v15, %v4320_v54  ;;  %2573 = vadd.xlane.f32.xlu0 %v2572_v38 }
 0x238   :  { %v2000_v21 = vpop.f32.mrf.mxu0  ;;  %v2193_v44 = vpop.f32.mrf.mxu1  ;;  %v2495_v5 = vmul.f32 %v4336_v3, %v2419_v1 }
 0x239   :  { %vm2293_vm5 = vcmp.ge.f32.partialorder %v2190_v26, 0.0  ;;  %v2357_v23 = vmul.f32 0.2, %v2190_v26  ;;  %v2192_v4 = vadd.f32 %v2191_v12, %v1999_v40  ;;  %v2001_v27 = vadd.f32 %v2000_v21, %v4323_v17 }
 0x23a   :  { %v2575_v42 = vadd.f32 %v2495_v5, %v2494_v45  ;;  %v2420_v28 = vsel %vm2292_vm4, %v2188_v13, %v2356_v11 }
 0x23b   :  { %vm2294_vm6 = vcmp.ge.f32.partialorder %v2192_v4, 0.0  ;;  %v2358_v24 = vmul.f32 0.2, %v2192_v4  ;;  %v2194_v19 = vadd.f32 %v2193_v44, %v2001_v27  ;;  %v2004_v31 = vpop.f32.mrf.mxu0  ;;  %v2197_v22 = vpop.f32.mrf.mxu1  ;;  %v2421_v32 = vsel %vm2293_vm5, %v2190_v26, %v2357_v23 }
 0x23c   :  { %v2005_v16 = vadd.f32 %v2004_v31, %v4320_v54  ;;  %2576 = vadd.xlane.f32.xlu1 %v2575_v42  ;;  %v2496_v36 = vmul.f32 %v4333_v47, %v2420_v28  ;;  %v2497_v46 = vmul.f32 %v4336_v3, %v2421_v32 }
 0x23d   :  { %vm2295_vm7 = vcmp.ge.f32.partialorder %v2194_v19, 0.0  ;;  %v2359_v43 = vmul.f32 0.2, %v2194_v19  ;;  %v2006_v37 = vpop.f32.mrf.mxu0  ;;  %v2199_v52 = vpop.f32.mrf.mxu1  ;;  %v2422_v18 = vsel %vm2294_vm6, %v2192_v4, %v2358_v24 }
 0x23e   :  { %v2198_v33 = vadd.f32 %v2197_v22, %v2005_v16  ;;  %v2007_v55 = vadd.f32 %v2006_v37, %v4323_v17  ;;  %v2578_v41 = vadd.f32 %v2497_v46, %v2496_v36  ;;  %v2498_v39 = vmul.f32 %v4333_v47, %v2422_v18 }
 0x23f   :  { %v2008_v25 = vpop.f32.mrf.mxu0  ;;  %v2201_v50 = vpop.f32.mrf.mxu1  ;;  %v2423_v53 = vsel %vm2295_vm7, %v2194_v19, %v2359_v43 }
 0x240   :  { %vm2296_vm8 = vcmp.ge.f32.partialorder %v2198_v33, 0.0  ;;  %v2360_v56 = vmul.f32 0.2, %v2198_v33  ;;  %v2200_v30 = vadd.f32 %v2199_v52, %v2007_v55  ;;  %v2009_v14 = vadd.f32 %v2008_v25, %v4320_v54  ;;  %2579 = vadd.xlane.f32.xlu0 %v2578_v41 }
 0x241   :  { %v2010_v34 = vpop.f32.mrf.mxu0  ;;  %v2499_v49 = vmul.f32 %v4336_v3, %v2423_v53  ;;  %v2203_v58 = vpop.f32.mrf.mxu1 }
 0x242   :  { %vm2297_vm9 = vcmp.ge.f32.partialorder %v2200_v30, 0.0  ;;  %v2361_v51 = vmul.f32 0.2, %v2200_v30  ;;  %v2202_v60 = vadd.f32 %v2201_v50, %v2009_v14  ;;  %v2011_v20 = vadd.f32 %v2010_v34, %v4323_v17 }
 0x243   :  { %v2581_v63 = vadd.f32 %v2499_v49, %v2498_v39  ;;  %v2424_v62 = vsel %vm2296_vm8, %v2198_v33, %v2360_v56 }
 0x244   :  { %vm2298_vm10 = vcmp.ge.f32.partialorder %v2202_v60, 0.0  ;;  %v2362_v61 = vmul.f32 0.2, %v2202_v60  ;;  %v2204_v7 = vadd.f32 %v2203_v58, %v2011_v20  ;;  %v2425_v2 = vsel %vm2297_vm9, %v2200_v30, %v2361_v51 }
 0x245   :  { %v2014_v59 = vpop.f32.mrf.mxu0  ;;  %2582 = vadd.xlane.f32.xlu1 %v2581_v63  ;;  %v2500_v8 = vmul.f32 %v4333_v47, %v2424_v62  ;;  %v2501_v48 = vmul.f32 %v4336_v3, %v2425_v2 }
 0x246   :  { %vm2299_vm11 = vcmp.ge.f32.partialorder %v2204_v7, 0.0  ;;  %v2363_v6 = vmul.f32 0.2, %v2204_v7  ;;  %v2015_v0 = vadd.f32 %v2014_v59, %v4320_v54  ;;  %v2207_v29 = vpop.f32.mrf.mxu1  ;;  %v2426_v10 = vsel %vm2298_vm10, %v2202_v60, %v2362_v61 }
 0x247   :  { %v2016_v57 = vpop.f32.mrf.mxu0  ;;  %v2584_v13 = vadd.f32 %v2501_v48, %v2500_v8  ;;  %v2502_v1 = vmul.f32 %v4333_v47, %v2426_v10 }
 0x248   :  { %v2208_v35 = vadd.f32 %v2207_v29, %v2015_v0  ;;  %v2017_v38 = vadd.f32 %v2016_v57, %v4323_v17  ;;  %v2209_v9 = vpop.f32.mrf.mxu1  ;;  %v2427_v15 = vsel %vm2299_vm11, %v2204_v7, %v2363_v6 }
 0x249   :  { %v2018_v12 = vpop.f32.mrf.mxu0  ;;  %2585 = vadd.xlane.f32.xlu0 %v2584_v13  ;;  %v2503_v11 = vmul.f32 %v4336_v3, %v2427_v15 }
 0x24a   :  { %vm2300_vm12 = vcmp.ge.f32.partialorder %v2208_v35, 0.0  ;;  %v2364_v26 = vmul.f32 0.2, %v2208_v35  ;;  %v2210_v40 = vadd.f32 %v2209_v9, %v2017_v38  ;;  %v2019_v21 = vadd.f32 %v2018_v12, %v4320_v54  ;;  %v2211_v44 = vpop.f32.mrf.mxu1 }
 0x24b   :  { %v2020_v45 = vpop.f32.mrf.mxu0  ;;  %v2587_v5 = vadd.f32 %v2503_v11, %v2502_v1 }
 0x24c   :  { %vm2301_vm13 = vcmp.ge.f32.partialorder %v2210_v40, 0.0  ;;  %v2365_v23 = vmul.f32 0.2, %v2210_v40  ;;  %v2212_v4 = vadd.f32 %v2211_v44, %v2019_v21  ;;  %v2021_v27 = vadd.f32 %v2020_v45, %v4323_v17  ;;  %v2213_v42 = vpop.f32.mrf.mxu1 }
 0x24d   :  { %v2024_v28 = vpop.f32.mrf.mxu0  ;;  %2588 = vadd.xlane.f32.xlu1 %v2587_v5  ;;  %v2428_v24 = vsel %vm2300_vm12, %v2208_v35, %v2364_v26 }
 0x24e   :  { %vm2302_vm14 = vcmp.ge.f32.partialorder %v2212_v4, 0.0  ;;  %v2366_v19 = vmul.f32 0.2, %v2212_v4  ;;  %v2214_v31 = vadd.f32 %v2213_v42, %v2021_v27  ;;  %v2025_v22 = vadd.f32 %v2024_v28, %v4320_v54 }
 0x24f   :  { %v2026_v32 = vpop.f32.mrf.mxu0  ;;  %v2429_v16 = vsel %vm2301_vm13, %v2210_v40, %v2365_v23  ;;  %v2504_v36 = vmul.f32 %v4333_v47, %v2428_v24 }
 0x250   :  { %vm2303_vm15 = vcmp.ge.f32.partialorder %v2214_v31, 0.0  ;;  %v2367_v46 = vmul.f32 0.2, %v2214_v31  ;;  %v2217_v43 = vpop.f32.mrf.mxu1  ;;  %v2027_v37 = vadd.f32 %v2026_v32, %v4323_v17  ;;  %v2505_v52 = vmul.f32 %v4336_v3, %v2429_v16 }
 0x251   :  { %v2218_v33 = vadd.f32 %v2217_v43, %v2025_v22  ;;  %v2028_v55 = vpop.f32.mrf.mxu0  ;;  %v2430_v41 = vsel %vm2302_vm14, %v2212_v4, %v2366_v19 }
 0x252   :  { %v2219_v18 = vpop.f32.mrf.mxu1  ;;  %v2029_v25 = vadd.f32 %v2028_v55, %v4320_v54  ;;  %v2590_v50 = vadd.f32 %v2505_v52, %v2504_v36  ;;  %v2431_v53 = vsel %vm2303_vm15, %v2214_v31, %v2367_v46  ;;  %v2506_v56 = vmul.f32 %v4333_v47, %v2430_v41 }
 0x253   :  { %vm2304_vm0 = vcmp.ge.f32.partialorder %v2218_v33, 0.0  ;;  %v2368_v30 = vmul.f32 0.2, %v2218_v33  ;;  %v2220_v14 = vadd.f32 %v2219_v18, %v2027_v37  ;;  %v2030_v34 = vpop.f32.mrf.mxu0  ;;  %v2507_v39 = vmul.f32 %v4336_v3, %v2431_v53 }
 0x254   :  { %v2221_v49 = vpop.f32.mrf.mxu1  ;;  %v2031_v51 = vadd.f32 %v2030_v34, %v4323_v17  ;;  %2591 = vadd.xlane.f32.xlu0 %v2590_v50 }
 0x255   :  { %vm2305_vm1 = vcmp.ge.f32.partialorder %v2220_v14, 0.0  ;;  %v2369_v60 = vmul.f32 0.2, %v2220_v14  ;;  %v2222_v20 = vadd.f32 %v2221_v49, %v2029_v25  ;;  %v2593_v58 = vadd.f32 %v2507_v39, %v2506_v56 }
 0x256   :  { %v2223_v63 = vpop.f32.mrf.mxu1  ;;  %v2034_v62 = vpop.f32.mrf.mxu0  ;;  %v2432_v61 = vsel %vm2304_vm0, %v2218_v33, %v2368_v30  ;;  %vm2819_vm0 = vcmask 7168  }
 0x257   :  { %vm2306_vm2 = vcmp.ge.f32.partialorder %v2222_v20, 0.0  ;;  %v2370_v7 = vmul.f32 0.2, %v2222_v20  ;;  %v2224_v2 = vadd.f32 %v2223_v63, %v2031_v51  ;;  %v2035_v59 = vadd.f32 %v2034_v62, %v4320_v54  ;;  %2594 = vadd.xlane.f32.xlu1 %v2593_v58 }
 0x258   :  { %v2036_v8 = vpop.f32.mrf.mxu0  ;;  %v2433_v48 = vsel %vm2305_vm1, %v2220_v14, %v2369_v60  ;;  %v2508_v6 = vmul.f32 %v4333_v47, %v2432_v61 }
 0x259   :  { %vm2307_vm3 = vcmp.ge.f32.partialorder %v2224_v2, 0.0  ;;  %v2371_v0 = vmul.f32 0.2, %v2224_v2  ;;  %v2227_v29 = vpop.f32.mrf.mxu1  ;;  %v2037_v10 = vadd.f32 %v2036_v8, %v4323_v17  ;;  %v2509_v57 = vmul.f32 %v4336_v3, %v2433_v48 }
 0x25a   :  { %v2228_v13 = vadd.f32 %v2227_v29, %v2035_v59  ;;  %v2038_v35 = vpop.f32.mrf.mxu0  ;;  %v2434_v38 = vsel %vm2306_vm2, %v2222_v20, %v2370_v7 }
 0x25b   :  { %v2229_v9 = vpop.f32.mrf.mxu1  ;;  %v2039_v15 = vadd.f32 %v2038_v35, %v4320_v54  ;;  %v2596_v12 = vadd.f32 %v2509_v57, %v2508_v6  ;;  %v2435_v1 = vsel %vm2307_vm3, %v2224_v2, %v2371_v0  ;;  %v2510_v11 = vmul.f32 %v4333_v47, %v2434_v38 }
 0x25c   :  { %vm2308_vm4 = vcmp.ge.f32.partialorder %v2228_v13, 0.0  ;;  %v2372_v26 = vmul.f32 0.2, %v2228_v13  ;;  %v2230_v40 = vadd.f32 %v2229_v9, %v2037_v10  ;;  %v2040_v21 = vpop.f32.mrf.mxu0  ;;  %v2511_v44 = vmul.f32 %v4336_v3, %v2435_v1 }
 0x25d   :  { %v2231_v45 = vpop.f32.mrf.mxu1  ;;  %v2041_v5 = vadd.f32 %v2040_v21, %v4323_v17  ;;  %2597 = vadd.xlane.f32.xlu0 %v2596_v12 }
 0x25e   :  { %vm2309_vm5 = vcmp.ge.f32.partialorder %v2230_v40, 0.0  ;;  %v2373_v23 = vmul.f32 0.2, %v2230_v40  ;;  %v2232_v4 = vadd.f32 %v2231_v45, %v2039_v15  ;;  %v2599_v27 = vadd.f32 %v2511_v44, %v2510_v11 }
 0x25f   :  { %v2233_v42 = vpop.f32.mrf.mxu1  ;;  %v2044_v28 = vpop.f32.mrf.mxu0  ;;  %v2436_v24 = vsel %vm2308_vm4, %v2228_v13, %v2372_v26 }
 0x260   :  { %vm2310_vm6 = vcmp.ge.f32.partialorder %v2232_v4, 0.0  ;;  %v2374_v19 = vmul.f32 0.2, %v2232_v4  ;;  %v2234_v31 = vadd.f32 %v2233_v42, %v2041_v5  ;;  %v2045_v22 = vadd.f32 %v2044_v28, %v4320_v54  ;;  %2600 = vadd.xlane.f32.xlu1 %v2599_v27 }
 0x261   :  { %v2046_v32 = vpop.f32.mrf.mxu0  ;;  %v2437_v16 = vsel %vm2309_vm5, %v2230_v40, %v2373_v23  ;;  %v2512_v36 = vmul.f32 %v4333_v47, %v2436_v24 }
 0x262   :  { %vm2311_vm7 = vcmp.ge.f32.partialorder %v2234_v31, 0.0  ;;  %v2375_v46 = vmul.f32 0.2, %v2234_v31  ;;  %v2237_v43 = vpop.f32.mrf.mxu1  ;;  %v2047_v37 = vadd.f32 %v2046_v32, %v4323_v17  ;;  %v2513_v52 = vmul.f32 %v4336_v3, %v2437_v16 }
 0x263   :  { %v2238_v33 = vadd.f32 %v2237_v43, %v2045_v22  ;;  %v2048_v55 = vpop.f32.mrf.mxu0  ;;  %v2438_v41 = vsel %vm2310_vm6, %v2232_v4, %v2374_v19 }
 0x264   :  { %v2239_v18 = vpop.f32.mrf.mxu1  ;;  %v2049_v25 = vadd.f32 %v2048_v55, %v4320_v54  ;;  %v2602_v50 = vadd.f32 %v2513_v52, %v2512_v36  ;;  %v2439_v53 = vsel %vm2311_vm7, %v2234_v31, %v2375_v46  ;;  %v2514_v56 = vmul.f32 %v4333_v47, %v2438_v41 }
 0x265   :  { %vm2312_vm8 = vcmp.ge.f32.partialorder %v2238_v33, 0.0  ;;  %v2376_v30 = vmul.f32 0.2, %v2238_v33  ;;  %v2240_v14 = vadd.f32 %v2239_v18, %v2047_v37  ;;  %v2050_v34 = vpop.f32.mrf.mxu0  ;;  %v2515_v39 = vmul.f32 %v4336_v3, %v2439_v53  ;;  %v4471_v37 = vld [vmem:[#allocation2] ss:$0 sm:$0xff] }
 0x266   :  { %v2241_v49 = vpop.f32.mrf.mxu1  ;;  %v2051_v51 = vadd.f32 %v2050_v34, %v4323_v17  ;;  %2603 = vadd.xlane.f32.xlu0 %v2602_v50 }
 0x267   :  { %vm2313_vm9 = vcmp.ge.f32.partialorder %v2240_v14, 0.0  ;;  %v2377_v60 = vmul.f32 0.2, %v2240_v14  ;;  %v2242_v20 = vadd.f32 %v2241_v49, %v2049_v25  ;;  %v2054_v58 = vpop.f32.mrf.mxu0  ;;  %v2605_v63 = vadd.f32 %v2515_v39, %v2514_v56 }
 0x268   :  { %v2243_v62 = vpop.f32.mrf.mxu1  ;;  %v2055_v61 = vadd.f32 %v2054_v58, %v4320_v54  ;;  %v2440_v7 = vsel %vm2312_vm8, %v2238_v33, %v2376_v30 }
 0x269   :  { %vm2314_vm10 = vcmp.ge.f32.partialorder %v2242_v20, 0.0  ;;  %v2378_v2 = vmul.f32 0.2, %v2242_v20  ;;  %v2244_v59 = vadd.f32 %v2243_v62, %v2051_v51  ;;  %v2056_v8 = vpop.f32.mrf.mxu0  ;;  %2606 = vadd.xlane.f32.xlu1 %v2605_v63  ;;  %v2441_v48 = vsel %vm2313_vm9, %v2240_v14, %v2377_v60 }
 0x26a   :  { %v2247_v6 = vpop.f32.mrf.mxu1  ;;  %v2057_v0 = vadd.f32 %v2056_v8, %v4323_v17  ;;  %v2516_v29 = vmul.f32 %v4333_v47, %v2440_v7  ;;  %v2517_v10 = vmul.f32 %v4336_v3, %v2441_v48 }
 0x26b   :  { %vm2315_vm11 = vcmp.ge.f32.partialorder %v2244_v59, 0.0  ;;  %v2379_v57 = vmul.f32 0.2, %v2244_v59  ;;  %v2248_v13 = vadd.f32 %v2247_v6, %v2055_v61  ;;  %v2058_v35 = vpop.f32.mrf.mxu0  ;;  %v2442_v38 = vsel %vm2314_vm10, %v2242_v20, %v2378_v2 }
 0x26c   :  { %v2249_v9 = vpop.f32.mrf.mxu1  ;;  %v2059_v15 = vadd.f32 %v2058_v35, %v4320_v54  ;;  %v2608_v12 = vadd.f32 %v2517_v10, %v2516_v29  ;;  %v2518_v45 = vmul.f32 %v4333_v47, %v2442_v38 }
 0x26d   :  { %vm2316_vm12 = vcmp.ge.f32.partialorder %v2248_v13, 0.0  ;;  %v2380_v1 = vmul.f32 0.2, %v2248_v13  ;;  %v2250_v11 = vadd.f32 %v2249_v9, %v2057_v0  ;;  %v2060_v26 = vpop.f32.mrf.mxu0  ;;  %v2443_v40 = vsel %vm2315_vm11, %v2244_v59, %v2379_v57 }
 0x26e   :  { %v2251_v21 = vpop.f32.mrf.mxu1  ;;  %v2061_v44 = vadd.f32 %v2060_v26, %v4323_v17  ;;  %2609 = vadd.xlane.f32.xlu0 %v2608_v12  ;;  %v2519_v5 = vmul.f32 %v4336_v3, %v2443_v40 }
 0x26f   :  { %vm2317_vm13 = vcmp.ge.f32.partialorder %v2250_v11, 0.0  ;;  %v2381_v23 = vmul.f32 0.2, %v2250_v11  ;;  %v2252_v4 = vadd.f32 %v2251_v21, %v2059_v15  ;;  %v2444_v27 = vsel %vm2316_vm12, %v2248_v13, %v2380_v1 }
 0x270   :  { %v2253_v42 = vpop.f32.mrf.mxu1  ;;  %v2611_v54 = vadd.f32 %v2519_v5, %v2518_v45  ;;  %v2520_v31 = vmul.f32 %v4333_v47, %v2444_v27 }
 0x271   :  { %vm2318_vm14 = vcmp.ge.f32.partialorder %v2252_v4, 0.0  ;;  %v2382_v28 = vmul.f32 0.2, %v2252_v4  ;;  %v2254_v24 = vadd.f32 %v2253_v42, %v2061_v44  ;;  %v2445_v19 = vsel %vm2317_vm13, %v2250_v11, %v2381_v23 }
 0x272   :  { %2612 = vadd.xlane.f32.xlu1 %v2611_v54  ;;  %v2521_v17 = vmul.f32 %v4336_v3, %v2445_v19 }
 0x273   :  { %vm2319_vm15 = vcmp.ge.f32.partialorder %v2254_v24, 0.0  ;;  %v2383_v22 = vmul.f32 0.2, %v2254_v24  ;;  %v2446_v32 = vsel %vm2318_vm14, %v2252_v4, %v2382_v28 }
 0x274   :  { %v2614_v16 = vadd.f32 %v2521_v17, %v2520_v31  ;;  %v2522_v46 = vmul.f32 %v4333_v47, %v2446_v32 }
 0x275   :  { %v2447_v36 = vsel %vm2319_vm15, %v2254_v24, %v2383_v22 }
 0x276   :  { %2615 = vadd.xlane.f32.xlu0 %v2614_v16  ;;  %v2523_v43 = vmul.f32 %v4336_v3, %v2447_v36 }
 0x278   :  { %v2617_v52 = vadd.f32 %v2523_v43, %v2522_v46 }
 0x279   :  { %v2526_v33 = vpop.xlane.xlu0 %2525 }
 0x27a   :  { %2618 = vadd.xlane.f32.xlu1 %v2617_v52  ;;  %v2627_v55 = vadd.f32 %v4471_v37, %v2526_v33 }
 0x27c   :  { %v2659_v41 = vsub.f32 0.0, %v2627_v55 }
 0x27d   :  { %v2529_v18 = vpop.xlane.xlu0 %2528 }
 0x27e   :  { %v2691_v25 = vmul.f32 1.442695, %v2659_v41  ;;  %v2628_v50 = vadd.f32 %v4471_v37, %v2529_v18 }
 0x27f   :  { %v2532_v53 = vpop.xlane.xlu1 %2531 }
 0x280   :  { %3261 = vpow2.f32 %v2691_v25  ;;  %v2660_v56 = vsub.f32 0.0, %v2628_v50  ;;  %v2629_v30 = vadd.f32 %v4471_v37, %v2532_v53 }
 0x282   :  { %v2693_v47 = vmul.f32 1.442695, %v2660_v56  ;;  %v2661_v14 = vsub.f32 0.0, %v2629_v30 }
 0x283   :  { %v2535_v3 = vpop.xlane.xlu1 %2534 }
 0x284   :  { %3263 = vpow2.f32 %v2693_v47  ;;  %v2695_v34 = vmul.f32 1.442695, %v2661_v14  ;;  %v2630_v39 = vadd.f32 %v4471_v37, %v2535_v3 }
 0x286   :  { %3265 = vpow2.f32 %v2695_v34  ;;  %v2662_v49 = vsub.f32 0.0, %v2630_v39 }
 0x288   :  { %v2697_v51 = vmul.f32 1.442695, %v2662_v49 }
 0x289   :  { %v2538_v60 = vpop.xlane.xlu0 %2537 }
 0x28a   :  { %3267 = vpow2.f32 %v2697_v51  ;;  %v2631_v20 = vadd.f32 %v4471_v37, %v2538_v60 }
 0x28c   :  { %v2663_v58 = vsub.f32 0.0, %v2631_v20 }
 0x28d   :  { %v3262_v63 = vpop.eup %3261  ;;  %v2541_v7 = vpop.xlane.xlu1 %2540 }
 0x28e   :  { %v2755_v62 = vadd.f32 1.0, %v3262_v63  ;;  %v2699_v61 = vmul.f32 1.442695, %v2663_v58  ;;  %v2632_v2 = vadd.f32 %v4471_v37, %v2541_v7 }
 0x290   :  { %3269 = vrcp.f32 %v2755_v62  ;;  %v2664_v8 = vsub.f32 0.0, %v2632_v2 }
 0x291   :  { %v3264_v59 = vpop.eup %3263  ;;  %3271 = vpow2.f32 %v2699_v61  ;;  %v2544_v6 = vpop.xlane.xlu0 %2543 }
 0x292   :  { %v2756_v48 = vadd.f32 1.0, %v3264_v59  ;;  %v2701_v29 = vmul.f32 1.442695, %v2664_v8  ;;  %v2633_v10 = vadd.f32 %v4471_v37, %v2544_v6 }
 0x293   :  { %v3266_v0 = vpop.eup %3265 }
 0x294   :  { %3273 = vrcp.f32 %v2756_v48  ;;  %v2757_v57 = vadd.f32 1.0, %v3266_v0  ;;  %v2665_v13 = vsub.f32 0.0, %v2633_v10 }
 0x295   :  { %3275 = vpow2.f32 %v2701_v29 }
 0x296   :  { %3277 = vrcp.f32 %v2757_v57  ;;  %v2547_v35 = vpop.xlane.xlu1 %2546  ;;  %v2703_v9 = vmul.f32 1.442695, %v2665_v13 }
 0x297   :  { %v3268_v38 = vpop.eup %3267  ;;  %v2634_v15 = vadd.f32 %v4471_v37, %v2547_v35 }
 0x298   :  { %v2758_v12 = vadd.f32 1.0, %v3268_v38  ;;  %3279 = vpow2.f32 %v2703_v9 }
 0x299   :  { %v2666_v1 = vsub.f32 0.0, %v2634_v15 }
 0x29a   :  { %3281 = vrcp.f32 %v2758_v12 }
 0x29b   :  { %v2705_v11 = vmul.f32 1.442695, %v2666_v1 }
 0x29c   :  { %v2550_v26 = vpop.xlane.xlu0 %2549 }
 0x29d   :  { %v3270_v40 = vpop.eup %3269  ;;  %3283 = vpow2.f32 %v2705_v11  ;;  %v2635_v21 = vadd.f32 %v4471_v37, %v2550_v26 }
 0x29e   :  { %v3272_v44 = vpop.eup %3271  ;;  %2820 = vst.msk [vmem:[%s4640_s7] sm:$0xff] %vm2819_vm0, %v3270_v40 }
 0x29f   :  { %v2759_v45 = vadd.f32 1.0, %v3272_v44  ;;  %v2667_v5 = vsub.f32 0.0, %v2635_v21 }
 0x2a1   :  { %v3274_v23 = vpop.eup %3273  ;;  %3285 = vrcp.f32 %v2759_v45  ;;  %v2707_v4 = vmul.f32 1.442695, %v2667_v5  ;;  %v2553_v27 = vpop.xlane.xlu1 %2552 }
 0x2a2   :  { %v3276_v42 = vpop.eup %3275  ;;  %2821 = vst.msk [vmem:[%s4640_s7 + $0x8] sm:$0xff] %vm2819_vm0, %v3274_v23  ;;  %v2636_v54 = vadd.f32 %v4471_v37, %v2553_v27 }
 0x2a3   :  { %v3278_v28 = vpop.eup %3277  ;;  %v2760_v24 = vadd.f32 1.0, %v3276_v42  ;;  %3287 = vpow2.f32 %v2707_v4 }
 0x2a4   :  { %2822 = vst.msk [vmem:[%s4640_s7 + $0x10] sm:$0xff] %vm2819_vm0, %v3278_v28  ;;  %v2668_v19 = vsub.f32 0.0, %v2636_v54 }
 0x2a5   :  { %3289 = vrcp.f32 %v2760_v24  ;;  %v2556_v31 = vpop.xlane.xlu0 %2555  ;;  %v3280_v17 = vpop.eup %3279 }
 0x2a6   :  { %v2709_v22 = vmul.f32 1.442695, %v2668_v19  ;;  %v2637_v32 = vadd.f32 %v4471_v37, %v2556_v31  ;;  %v2761_v36 = vadd.f32 1.0, %v3280_v17 }
 0x2a7   :  { %v3282_v16 = vpop.eup %3281 }
 0x2a8   :  { %2823 = vst.msk [vmem:[%s4640_s7 + $0x18] sm:$0xff] %vm2819_vm0, %v3282_v16  ;;  %3291 = vpow2.f32 %v2709_v22  ;;  %v2669_v46 = vsub.f32 0.0, %v2637_v32 }
 0x2a9   :  { %3293 = vrcp.f32 %v2761_v36 }
 0x2aa   :  { %v3284_v43 = vpop.eup %3283  ;;  %v2711_v52 = vmul.f32 1.442695, %v2669_v46  ;;  %v2559_v33 = vpop.xlane.xlu1 %2558 }
 0x2ab   :  { %v2762_v55 = vadd.f32 1.0, %v3284_v43  ;;  %v2638_v41 = vadd.f32 %v4471_v37, %v2559_v33 }
 0x2ac   :  { %3295 = vpow2.f32 %v2711_v52 }
 0x2ad   :  { %3297 = vrcp.f32 %v2762_v55  ;;  %v2670_v18 = vsub.f32 0.0, %v2638_v41 }
 0x2ae   :  { %v3286_v25 = vpop.eup %3285  ;;  %v2562_v50 = vpop.xlane.xlu0 %2561 }
 0x2af   :  { %2824 = vst.msk [vmem:[%s4640_s7 + $0x20] sm:$0xff] %vm2819_vm0, %v3286_v25  ;;  %v2713_v53 = vmul.f32 1.442695, %v2670_v18  ;;  %v2639_v56 = vadd.f32 %v4471_v37, %v2562_v50 }
 0x2b0   :  { %v3288_v30 = vpop.eup %3287 }
 0x2b1   :  { %v2763_v47 = vadd.f32 1.0, %v3288_v30  ;;  %3299 = vpow2.f32 %v2713_v53  ;;  %v2671_v14 = vsub.f32 0.0, %v2639_v56 }
 0x2b2   :  { %v3290_v3 = vpop.eup %3289 }
 0x2b3   :  { %2825 = vst.msk [vmem:[%s4640_s7 + $0x28] sm:$0xff] %vm2819_vm0, %v3290_v3  ;;  %3301 = vrcp.f32 %v2763_v47  ;;  %v2715_v34 = vmul.f32 1.442695, %v2671_v14  ;;  %v2565_v39 = vpop.xlane.xlu1 %2564 }
 0x2b4   :  { %v2640_v49 = vadd.f32 %v4471_v37, %v2565_v39 }
 0x2b5   :  { %v3292_v51 = vpop.eup %3291  ;;  %3303 = vpow2.f32 %v2715_v34 }
 0x2b6   :  { %v3294_v60 = vpop.eup %3293  ;;  %v2764_v20 = vadd.f32 1.0, %v3292_v51  ;;  %v2672_v58 = vsub.f32 0.0, %v2640_v49 }
 0x2b7   :  { %2826 = vst.msk [vmem:[%s4640_s7 + $0x30] sm:$0xff] %vm2819_vm0, %v3294_v60  ;;  %v2568_v63 = vpop.xlane.xlu0 %2567 }
 0x2b8   :  { %3305 = vrcp.f32 %v2764_v20  ;;  %v2717_v62 = vmul.f32 1.442695, %v2672_v58  ;;  %v2641_v61 = vadd.f32 %v4471_v37, %v2568_v63 }
 0x2b9   :  { %v3296_v7 = vpop.eup %3295 }
 0x2ba   :  { %v3298_v2 = vpop.eup %3297  ;;  %v2765_v59 = vadd.f32 1.0, %v3296_v7  ;;  %3307 = vpow2.f32 %v2717_v62  ;;  %v2673_v8 = vsub.f32 0.0, %v2641_v61 }
 0x2bb   :  { %2827 = vst.msk [vmem:[%s4640_s7 + $0x38] sm:$0xff] %vm2819_vm0, %v3298_v2 }
 0x2bc   :  { %3309 = vrcp.f32 %v2765_v59  ;;  %v2719_v48 = vmul.f32 1.442695, %v2673_v8  ;;  %v2571_v6 = vpop.xlane.xlu1 %2570 }
 0x2bd   :  { %v2642_v0 = vadd.f32 %v4471_v37, %v2571_v6 }
 0x2be   :  { %v3300_v29 = vpop.eup %3299  ;;  %3311 = vpow2.f32 %v2719_v48 }
 0x2bf   :  { %v2766_v10 = vadd.f32 1.0, %v3300_v29  ;;  %v2674_v57 = vsub.f32 0.0, %v2642_v0 }
 0x2c0   :  { %v3302_v13 = vpop.eup %3301  ;;  %v2574_v35 = vpop.xlane.xlu0 %2573 }
 0x2c1   :  { %2828 = vst.msk [vmem:[%s4640_s7 + $0x40] sm:$0xff] %vm2819_vm0, %v3302_v13  ;;  %3313 = vrcp.f32 %v2766_v10  ;;  %v2721_v38 = vmul.f32 1.442695, %v2674_v57  ;;  %v2643_v9 = vadd.f32 %v4471_v37, %v2574_v35 }
 0x2c2   :  { %v3304_v15 = vpop.eup %3303 }
 0x2c3   :  { %v2767_v12 = vadd.f32 1.0, %v3304_v15  ;;  %3315 = vpow2.f32 %v2721_v38  ;;  %v2675_v1 = vsub.f32 0.0, %v2643_v9 }
 0x2c5   :  { %v3306_v11 = vpop.eup %3305  ;;  %3317 = vrcp.f32 %v2767_v12  ;;  %v2723_v26 = vmul.f32 1.442695, %v2675_v1  ;;  %v2577_v40 = vpop.xlane.xlu1 %2576 }
 0x2c6   :  { %2829 = vst.msk [vmem:[%s4640_s7 + $0x48] sm:$0xff] %vm2819_vm0, %v3306_v11  ;;  %v2644_v21 = vadd.f32 %v4471_v37, %v2577_v40 }
 0x2c7   :  { %v3308_v44 = vpop.eup %3307  ;;  %3319 = vpow2.f32 %v2723_v26 }
 0x2c8   :  { %v2768_v45 = vadd.f32 1.0, %v3308_v44  ;;  %v2676_v5 = vsub.f32 0.0, %v2644_v21 }
 0x2c9   :  { %v3310_v23 = vpop.eup %3309  ;;  %v2580_v4 = vpop.xlane.xlu0 %2579 }
 0x2ca   :  { %2830 = vst.msk [vmem:[%s4640_s7 + $0x50] sm:$0xff] %vm2819_vm0, %v3310_v23  ;;  %3321 = vrcp.f32 %v2768_v45  ;;  %v2725_v27 = vmul.f32 1.442695, %v2676_v5  ;;  %v2645_v42 = vadd.f32 %v4471_v37, %v2580_v4 }
 0x2cb   :  { %v3312_v54 = vpop.eup %3311 }
 0x2cc   :  { %v2769_v28 = vadd.f32 1.0, %v3312_v54  ;;  %3323 = vpow2.f32 %v2725_v27  ;;  %v2677_v24 = vsub.f32 0.0, %v2645_v42 }
 0x2ce   :  { %v3314_v19 = vpop.eup %3313  ;;  %3325 = vrcp.f32 %v2769_v28  ;;  %v2727_v31 = vmul.f32 1.442695, %v2677_v24  ;;  %v2583_v17 = vpop.xlane.xlu1 %2582 }
 0x2cf   :  { %2831 = vst.msk [vmem:[%s4640_s7 + $0x58] sm:$0xff] %vm2819_vm0, %v3314_v19  ;;  %v2646_v22 = vadd.f32 %v4471_v37, %v2583_v17 }
 0x2d0   :  { %v3316_v32 = vpop.eup %3315  ;;  %3327 = vpow2.f32 %v2727_v31 }
 0x2d1   :  { %v2770_v16 = vadd.f32 1.0, %v3316_v32  ;;  %v2678_v36 = vsub.f32 0.0, %v2646_v22 }
 0x2d2   :  { %v3318_v46 = vpop.eup %3317  ;;  %v2586_v43 = vpop.xlane.xlu0 %2585 }
 0x2d3   :  { %2832 = vst.msk [vmem:[%s4640_s7 + $0x60] sm:$0xff] %vm2819_vm0, %v3318_v46  ;;  %3329 = vrcp.f32 %v2770_v16  ;;  %v2729_v52 = vmul.f32 1.442695, %v2678_v36  ;;  %v2647_v33 = vadd.f32 %v4471_v37, %v2586_v43 }
 0x2d4   :  { %v3320_v55 = vpop.eup %3319 }
 0x2d5   :  { %v2771_v41 = vadd.f32 1.0, %v3320_v55  ;;  %3331 = vpow2.f32 %v2729_v52  ;;  %v2679_v18 = vsub.f32 0.0, %v2647_v33 }
 0x2d6   :  { %v2589_v25 = vpop.xlane.xlu1 %2588 }
 0x2d7   :  { %v3322_v50 = vpop.eup %3321  ;;  %3333 = vrcp.f32 %v2771_v41  ;;  %v2731_v53 = vmul.f32 1.442695, %v2679_v18  ;;  %v2648_v56 = vadd.f32 %v4471_v37, %v2589_v25 }
 0x2d8   :  { %2833 = vst.msk [vmem:[%s4640_s7 + $0x68] sm:$0xff] %vm2819_vm0, %v3322_v50 }
 0x2d9   :  { %v3324_v30 = vpop.eup %3323  ;;  %3335 = vpow2.f32 %v2731_v53  ;;  %v2680_v47 = vsub.f32 0.0, %v2648_v56 }
 0x2da   :  { %v2772_v14 = vadd.f32 1.0, %v3324_v30 }
 0x2db   :  { %v3326_v3 = vpop.eup %3325  ;;  %v2733_v34 = vmul.f32 1.442695, %v2680_v47 }
 0x2dc   :  { %2834 = vst.msk [vmem:[%s4640_s7 + $0x70] sm:$0xff] %vm2819_vm0, %v3326_v3  ;;  %3337 = vrcp.f32 %v2772_v14 }
 0x2dd   :  { %v3328_v39 = vpop.eup %3327  ;;  %3339 = vpow2.f32 %v2733_v34  ;;  %v2592_v49 = vpop.xlane.xlu0 %2591 }
 0x2de   :  { %v2773_v51 = vadd.f32 1.0, %v3328_v39  ;;  %v2649_v60 = vadd.f32 %v4471_v37, %v2592_v49 }
 0x2e0   :  { %v3330_v20 = vpop.eup %3329  ;;  %3341 = vrcp.f32 %v2773_v51  ;;  %v2681_v58 = vsub.f32 0.0, %v2649_v60  ;;  %v2595_v63 = vpop.xlane.xlu1 %2594 }
 0x2e1   :  { %2835 = vst.msk [vmem:[%s4640_s7 + $0x78] sm:$0xff] %vm2819_vm0, %v3330_v20  ;;  %v2650_v62 = vadd.f32 %v4471_v37, %v2595_v63 }
 0x2e2   :  { %v3332_v61 = vpop.eup %3331  ;;  %v2735_v7 = vmul.f32 1.442695, %v2681_v58 }
 0x2e3   :  { %v2774_v2 = vadd.f32 1.0, %v3332_v61  ;;  %v2682_v59 = vsub.f32 0.0, %v2650_v62 }
 0x2e4   :  { %v3334_v8 = vpop.eup %3333  ;;  %3343 = vpow2.f32 %v2735_v7 }
 0x2e5   :  { %2836 = vst.msk [vmem:[%s4640_s7 + $0x80] sm:$0xff] %vm2819_vm0, %v3334_v8  ;;  %3345 = vrcp.f32 %v2774_v2  ;;  %v2737_v48 = vmul.f32 1.442695, %v2682_v59 }
 0x2e6   :  { %v3336_v6 = vpop.eup %3335  ;;  %v2598_v0 = vpop.xlane.xlu0 %2597 }
 0x2e7   :  { %v2775_v29 = vadd.f32 1.0, %v3336_v6  ;;  %3347 = vpow2.f32 %v2737_v48  ;;  %v2651_v10 = vadd.f32 %v4471_v37, %v2598_v0 }
 0x2e9   :  { %v3338_v57 = vpop.eup %3337  ;;  %3349 = vrcp.f32 %v2775_v29  ;;  %v2683_v13 = vsub.f32 0.0, %v2651_v10  ;;  %v2601_v35 = vpop.xlane.xlu1 %2600 }
 0x2ea   :  { %v3340_v38 = vpop.eup %3339  ;;  %2837 = vst.msk [vmem:[%s4640_s7 + $0x88] sm:$0xff] %vm2819_vm0, %v3338_v57  ;;  %v2652_v9 = vadd.f32 %v4471_v37, %v2601_v35 }
 0x2eb   :  { %v2776_v15 = vadd.f32 1.0, %v3340_v38  ;;  %v2739_v12 = vmul.f32 1.442695, %v2683_v13 }
 0x2ec   :  { %v2684_v1 = vsub.f32 0.0, %v2652_v9 }
 0x2ed   :  { %v3342_v11 = vpop.eup %3341  ;;  %3351 = vrcp.f32 %v2776_v15 }
 0x2ee   :  { %2838 = vst.msk [vmem:[%s4640_s7 + $0x90] sm:$0xff] %vm2819_vm0, %v3342_v11  ;;  %3353 = vpow2.f32 %v2739_v12  ;;  %v2741_v26 = vmul.f32 1.442695, %v2684_v1 }
 0x2ef   :  { %v2604_v40 = vpop.xlane.xlu0 %2603 }
 0x2f0   :  { %3355 = vpow2.f32 %v2741_v26  ;;  %v2653_v21 = vadd.f32 %v4471_v37, %v2604_v40 }
 0x2f1   :  { %v3344_v44 = vpop.eup %3343 }
 0x2f2   :  { %v3346_v45 = vpop.eup %3345  ;;  %v2777_v5 = vadd.f32 1.0, %v3344_v44  ;;  %v2685_v23 = vsub.f32 0.0, %v2653_v21  ;;  %v2607_v4 = vpop.xlane.xlu1 %2606 }
 0x2f3   :  { %2839 = vst.msk [vmem:[%s4640_s7 + $0x98] sm:$0xff] %vm2819_vm0, %v3346_v45  ;;  %v2654_v27 = vadd.f32 %v4471_v37, %v2607_v4 }
 0x2f4   :  { %v3348_v42 = vpop.eup %3347  ;;  %3357 = vrcp.f32 %v2777_v5  ;;  %v2743_v54 = vmul.f32 1.442695, %v2685_v23 }
 0x2f5   :  { %v2778_v28 = vadd.f32 1.0, %v3348_v42  ;;  %v2686_v24 = vsub.f32 0.0, %v2654_v27 }
 0x2f6   :  { %v3350_v19 = vpop.eup %3349  ;;  %3359 = vpow2.f32 %v2743_v54 }
 0x2f7   :  { %2840 = vst.msk [vmem:[%s4640_s7 + $0xa0] sm:$0xff] %vm2819_vm0, %v3350_v19  ;;  %3361 = vrcp.f32 %v2778_v28  ;;  %v2745_v31 = vmul.f32 1.442695, %v2686_v24  ;;  %v2610_v17 = vpop.xlane.xlu0 %2609 }
 0x2f8   :  { %v2655_v22 = vadd.f32 %v4471_v37, %v2610_v17 }
 0x2f9   :  { %3363 = vpow2.f32 %v2745_v31 }
 0x2fa   :  { %v3352_v32 = vpop.eup %3351  ;;  %v2687_v16 = vsub.f32 0.0, %v2655_v22 }
 0x2fb   :  { %v3354_v36 = vpop.eup %3353  ;;  %2841 = vst.msk [vmem:[%s4640_s7 + $0xa8] sm:$0xff] %vm2819_vm0, %v3352_v32  ;;  %v2613_v46 = vpop.xlane.xlu1 %2612 }
 0x2fc   :  { %v2779_v43 = vadd.f32 1.0, %v3354_v36  ;;  %v2747_v52 = vmul.f32 1.442695, %v2687_v16  ;;  %v2656_v33 = vadd.f32 %v4471_v37, %v2613_v46 }
 0x2fd   :  { %v3356_v55 = vpop.eup %3355 }
 0x2fe   :  { %3365 = vrcp.f32 %v2779_v43  ;;  %v2780_v41 = vadd.f32 1.0, %v3356_v55  ;;  %v2688_v18 = vsub.f32 0.0, %v2656_v33 }
 0x2ff   :  { %3367 = vpow2.f32 %v2747_v52  ;;  %v2616_v25 = vpop.xlane.xlu0 %2615 }
 0x300   :  { %3369 = vrcp.f32 %v2780_v41  ;;  %v2749_v50 = vmul.f32 1.442695, %v2688_v18  ;;  %v2657_v53 = vadd.f32 %v4471_v37, %v2616_v25 }
 0x301   :  { %v3358_v56 = vpop.eup %3357 }
 0x302   :  { %2842 = vst.msk [vmem:[%s4640_s7 + $0xb0] sm:$0xff] %vm2819_vm0, %v3358_v56  ;;  %3371 = vpow2.f32 %v2749_v50  ;;  %v2689_v30 = vsub.f32 0.0, %v2657_v53 }
 0x303   :  { %v3360_v47 = vpop.eup %3359  ;;  %v2619_v14 = vpop.xlane.xlu1 %2618 }
 0x304   :  { %v3362_v3 = vpop.eup %3361  ;;  %v2781_v34 = vadd.f32 1.0, %v3360_v47  ;;  %v2751_v39 = vmul.f32 1.442695, %v2689_v30  ;;  %v2658_v49 = vadd.f32 %v4471_v37, %v2619_v14 }
 0x305   :  { %2843 = vst.msk [vmem:[%s4640_s7 + $0xb8] sm:$0xff] %vm2819_vm0, %v3362_v3 }
 0x306   :  { %v3364_v51 = vpop.eup %3363  ;;  %3373 = vrcp.f32 %v2781_v34  ;;  %v2690_v60 = vsub.f32 0.0, %v2658_v49 }
 0x307   :  { %v2782_v20 = vadd.f32 1.0, %v3364_v51  ;;  %3375 = vpow2.f32 %v2751_v39 }
 0x308   :  { %v2753_v58 = vmul.f32 1.442695, %v2690_v60 }
 0x309   :  { %3377 = vrcp.f32 %v2782_v20 }
 0x30a   :  { %3379 = vpow2.f32 %v2753_v58 }
 0x30b   :  { %v3366_v63 = vpop.eup %3365 }
 0x30c   :  { %v3368_v62 = vpop.eup %3367  ;;  %2844 = vst.msk [vmem:[%s4640_s7 + $0xc0] sm:$0xff] %vm2819_vm0, %v3366_v63 }
 0x30d   :  { %v3370_v37 = vpop.eup %3369  ;;  %v2783_v61 = vadd.f32 1.0, %v3368_v62 }
 0x30e   :  { %2845 = vst.msk [vmem:[%s4640_s7 + $0xc8] sm:$0xff] %vm2819_vm0, %v3370_v37 }
 0x30f   :  { %v3372_v7 = vpop.eup %3371  ;;  %3381 = vrcp.f32 %v2783_v61 }
 0x310   :  { %v2784_v2 = vadd.f32 1.0, %v3372_v7 }
 0x312   :  { %3383 = vrcp.f32 %v2784_v2 }
 0x313   :  { %v3374_v59 = vpop.eup %3373 }
 0x314   :  { %v3376_v8 = vpop.eup %3375  ;;  %2846 = vst.msk [vmem:[%s4640_s7 + $0xd0] sm:$0xff] %vm2819_vm0, %v3374_v59 }
 0x315   :  { %v2785_v48 = vadd.f32 1.0, %v3376_v8 }
 0x316   :  { %v3378_v6 = vpop.eup %3377 }
 0x317   :  { %v3380_v0 = vpop.eup %3379  ;;  %2847 = vst.msk [vmem:[%s4640_s7 + $0xd8] sm:$0xff] %vm2819_vm0, %v3378_v6  ;;  %3385 = vrcp.f32 %v2785_v48 }
 0x318   :  { %v2786_v29 = vadd.f32 1.0, %v3380_v0 }
 0x31a   :  { %3387 = vrcp.f32 %v2786_v29 }
 0x31c   :  { %v3382_v10 = vpop.eup %3381 }
 0x31d   :  { %2848 = vst.msk [vmem:[%s4640_s7 + $0xe0] sm:$0xff] %vm2819_vm0, %v3382_v10 }
 0x31f   :  { %v3384_v57 = vpop.eup %3383 }
 0x320   :  { %2849 = vst.msk [vmem:[%s4640_s7 + $0xe8] sm:$0xff] %vm2819_vm0, %v3384_v57 }
 0x324   :  { %v3386_v13 = vpop.eup %3385 }
 0x325   :  { %2850 = vst.msk [vmem:[%s4640_s7 + $0xf0] sm:$0xff] %vm2819_vm0, %v3386_v13 }
 0x327   :  { %v3388_v35 = vpop.eup %3387 }
 0x328   :  { %2851 = vst.msk [vmem:[%s4640_s7 + $0xf8] sm:$0xff] %vm2819_vm0, %v3388_v35 }
 0x329   :  { %2856 = vsyncpa [#allocation4], 1 }

</bundles_post_ra>
